<compile_context>
chip_gen: v7x
topology: tpu7x:2x2x1
jax: 0.10.0
libtpu: 0.0.40
codegen_flags: <defaults>
</compile_context>

<pallas_src>
import functools
import math

import jax
import jax.numpy as jnp
from jax import lax
from jax.experimental import pallas as pl
from jax.experimental.pallas import tpu as pltpu

RPAD = 128                 # lane-padded LoRA rank (lane-dense LoRA / expert matmuls)
RATIOS = (1, 2, 3, 4)      # multi-scale expert ratios (conv_lora_expert_num = 4)
GELU_APPROXIMATE = False   # False = exact erf GELU (parity with torch nn.GELU());
                           # True  = tanh GELU (runs on the otherwise-idle EUP slot).


# ----------------------------------------------------------------------------- helpers

def _gelu(v):
    if GELU_APPROXIMATE:
        return jax.nn.gelu(v, approximate=True)
    return 0.5 * v * (1.0 + lax.erf(v * (1.0 / math.sqrt(2.0))))


@functools.lru_cache(maxsize=None)
def _vmem_budget():
    """(vmem_limit_bytes, max_row_tile) — generation aware.

    v5e/v6e have 128 MiB physical VMEM per core -> 96 MiB limit, tm up to 1024.
    v7x has 64 MiB per TensorCore (or unknown)   -> 48 MiB limit, tm up to 512.
    """
    cap = None
    try:
        cap = int(pltpu.get_tpu_info().vmem_capacity_bytes)
    except Exception:
        cap = None
    if cap is not None and cap >= 96 * 1024 * 1024:
        return 96 * 1024 * 1024, 1024
    return 48 * 1024 * 1024, 512


_TILE_LADDER = (1024, 512, 256, 128, 64, 32, 16, 8)


def _row_tile(m):
    _, cap = _vmem_budget()
    # Prefer >= 2 row blocks so the "parallel" M axis can shard across 2 TensorCores (v7x).
    for t in _TILE_LADDER:
        if t <= cap and m % t == 0 and m // t >= 2:
            return t
    for t in _TILE_LADDER:
        if t <= cap and m % t == 0:
            return t
    return m   # awkward sizes: whole extent (only reached at tiny / odd shapes)


def _col_tile(n):
    for t in (512, 256, 128):
        if n % t == 0:
            return t
    return n


def _k_tile(k):
    if k <= 1024:
        return k
    for t in (1024, 512, 256):
        if k % t == 0:
            return t
    return k   # fallback: whole-K block (matches previous behaviour)


def _cparams(semantics):
    vmem, _ = _vmem_budget()
    return pltpu.CompilerParams(dimension_semantics=semantics,
                                vmem_limit_bytes=vmem)


# ----------------------------------------------------------------------------- kernels

def _lora_down_kernel(x_ref, at_ref, ld_ref):
    """LoRA down-projection: ld = x @ A^T (A^T zero-padded to 128 lanes), bf16 store."""
    ld_ref[...] = jnp.dot(x_ref[...], at_ref[...],
                          preferred_element_type=jnp.float32).astype(ld_ref.dtype)


def _fused_linear_kernel(x_ref, wt_ref, b_ref, lf_ref, bt_ref, out_ref, acc_ref,
                         *, apply_gelu):
    """Frozen linear + LoRA up fused, K-tiled: out = x@W^T + b + lf@(s*B^T) (+GELU)."""
    k = pl.program_id(2)

    @pl.when(k == 0)
    def _():
        acc_ref[...] = jnp.zeros_like(acc_ref)

    acc_ref[...] += jnp.dot(x_ref[...], wt_ref[...],
                            preferred_element_type=jnp.float32)

    @pl.when(k == pl.num_programs(2) - 1)
    def _():
        acc = acc_ref[...]
        acc = acc + jnp.dot(lf_ref[...], bt_ref[...],
                            preferred_element_type=jnp.float32)
        acc = acc + b_ref[...]
        if apply_gelu:
            acc = _gelu(acc)
        out_ref[...] = acc.astype(out_ref.dtype)


def _mm_bias_gelu_kernel(p_ref, w_ref, b_ref, out_ref):
    """im2col 3x3-conv expert: patches @ W_pad + b_pad, GELU; lane-dense 128-wide store."""
    out_ref[...] = _gelu(
        jnp.dot(p_ref[...], w_ref[...], preferred_element_type=jnp.float32)
        + b_ref[...]).astype(out_ref.dtype)


# ----------------------------------------------------------------------------- wrappers

def pallas_lora_down(x, at_pad):
    m, cin = x.shape
    rp = at_pad.shape[1]
    tm = _row_tile(m)
    return pl.pallas_call(
        _lora_down_kernel,
        grid=(m // tm,),
        in_specs=[
            pl.BlockSpec((tm, cin), lambda i: (i, 0)),
            pl.BlockSpec((cin, rp), lambda i: (0, 0)),
        ],
        out_specs=pl.BlockSpec((tm, rp), lambda i: (i, 0)),
        out_shape=jax.ShapeDtypeStruct((m, rp), jnp.bfloat16),
        compiler_params=_cparams(("parallel",)),
    )(x, at_pad)


def pallas_fused_linear(x, wt, b, lf, bt, apply_gelu, out_dtype):
    m, cin = x.shape
    cout = wt.shape[1]
    rp = lf.shape[1]
    tm, tn, tk = _row_tile(m), _col_tile(cout), _k_tile(cin)
    kernel = functools.partial(_fused_linear_kernel, apply_gelu=bool(apply_gelu))
    return pl.pallas_call(
        kernel,
        grid=(m // tm, cout // tn, cin // tk),
        in_specs=[
            pl.BlockSpec((tm, tk), lambda i, j, k: (i, k)),
            pl.BlockSpec((tk, tn), lambda i, j, k: (k, j)),
            pl.BlockSpec((1, tn), lambda i, j, k: (0, j)),
            pl.BlockSpec((tm, rp), lambda i, j, k: (i, 0)),
            pl.BlockSpec((rp, tn), lambda i, j, k: (0, j)),
        ],
        out_specs=pl.BlockSpec((tm, tn), lambda i, j, k: (i, j)),
        out_shape=jax.ShapeDtypeStruct((m, cout), out_dtype),
        scratch_shapes=[pltpu.VMEM((tm, tn), jnp.float32)],
        compiler_params=_cparams(("parallel", "parallel", "arbitrary")),
    )(x, wt, b, lf, bt)


def pallas_conv_matmul_bias_gelu(p, w_pad, b_pad):
    m, k = p.shape
    n = w_pad.shape[1]
    tm = _row_tile(m)
    return pl.pallas_call(
        _mm_bias_gelu_kernel,
        grid=(m // tm,),
        in_specs=[
            pl.BlockSpec((tm, k), lambda i: (i, 0)),
            pl.BlockSpec((k, n), lambda i: (0, 0)),
            pl.BlockSpec((1, n), lambda i: (0, 0)),
        ],
        out_specs=pl.BlockSpec((tm, n), lambda i: (i, 0)),
        out_shape=jax.ShapeDtypeStruct((m, n), jnp.float32),
        compiler_params=_cparams(("parallel",)),
    )(p, w_pad, b_pad)


# ----------------------------------------------------------------------------- module

def conv3x3_gelu_pad(z, wc_pad, bc_pad):
    """3x3 conv (stride 1, pad 1) + GELU as an im2col Pallas matmul.
    z: (B2, H*, W*, r) -> (B2, H*, W*, 128); lanes >= r are exactly zero (GELU(0)=0)."""
    bz, hs, ws, r = z.shape
    zp = jnp.pad(z, ((0, 0), (1, 1), (1, 1), (0, 0)))
    cols = [zp[:, di:di + hs, dj:dj + ws, :] for di in range(3) for dj in range(3)]
    patches = jnp.concatenate(cols, axis=-1).reshape(bz * hs * ws, 9 * r)
    out = pallas_conv_matmul_bias_gelu(patches.astype(jnp.bfloat16), wc_pad, bc_pad)
    return out.reshape(bz, hs, ws, wc_pad.shape[1])


def conv_lora_linear(t, p, apply_act_gelu, out_dtype):
    """One ConvLoRALinear1 applied to a stacked (B2, H, W, C_in) batch (both streams)."""
    b2, h, w, cin = t.shape
    m = b2 * h * w
    cout = p["Wt"].shape[1]
    r = p["Wg"].shape[1]                        # LoRA rank (static from weight shape)

    x2 = t.reshape(m, cin).astype(jnp.bfloat16)

    # LoRA down-projection, lane-padded to 128 (lanes >= r exactly zero), stored bf16.
    ld_pad = pallas_lora_down(x2, p["At_pad"])                       # (m, 128) bf16

    lr = ld_pad[:, :r].astype(jnp.float32).reshape(b2, h, w, r)      # rank-r feature map

    # Top-1 MoE gating on globally average-pooled rank-r features (tiny f32 XLA glue).
    gap = jnp.mean(lr, axis=(1, 2))                                  # (B2, r)
    logits = gap @ p["Wg"].T + p["bg"]                               # (B2, E)
    probs = jax.nn.softmax(logits, axis=-1)
    top = jnp.argmax(probs, axis=-1)
    gate = jnp.max(probs, axis=-1)
    coef = jax.nn.one_hot(top, len(RATIOS), dtype=jnp.float32) * gate[:, None]

    # Dense batched evaluation of the 4 rank-4 experts + per-sample top-1 select.
    # Every expert output is already 128-lane padded, so the residual adds straight
    # into the padded buffer (no slice->re-pad round trip).
    moe_pad = jnp.zeros((b2, h, w, RPAD), jnp.float32)
    for e, ratio in enumerate(RATIOS):
        z = lr
        if ratio != 1:
            z = jax.image.resize(z, (b2, h * ratio, w * ratio, r),
                                 method="bicubic", antialias=False)
        o = conv3x3_gelu_pad(z, p["conv_w"][e], p["conv_b"][e])
        if ratio != 1:
            o = jax.image.resize(o, (b2, h, w, RPAD),
                                 method="bicubic", antialias=False)
        moe_pad = moe_pad + o * coef[:, e][:, None, None, None]

    # Residual on the lane-padded rank-r path; lanes >= r are zero and Bt_pad rows >= r
    # are zero, so the padding never perturbs the result.
    lf_pad = (ld_pad.astype(jnp.float32)
              + moe_pad.reshape(m, RPAD)).astype(jnp.bfloat16)

    # Fused: out = x@W^T + b + lf@(scaling*B^T)  (+ GELU of the outer MLP act if asked).
    out = pallas_fused_linear(x2, p["Wt"], p["b"], lf_pad, p["Bt_pad"],
                              apply_act_gelu, out_dtype)
    return out.reshape(b2, h, w, cout)


def mlp_block2(x, y, params):
    # lin1/lin2 weights are shared between the x and y streams: stack along batch and run
    # each layer once (half the kernel launches, 2x rows per grid).
    b = x.shape[0]
    t = jnp.concatenate([x, y], axis=0)
    # act(lin1(.)) is fused: GELU is applied inside the lin1 fused-linear kernel; the lin1
    # output feeds lin2, so it is emitted in bf16.  lin2 output stays f32 (module output).
    h1 = conv_lora_linear(t, params["lin1"], apply_act_gelu=True, out_dtype=jnp.bfloat16)
    h2 = conv_lora_linear(h1, params["lin2"], apply_act_gelu=False, out_dtype=jnp.float32)
    return h2[:b], h2[b:]


# ----------------------------------------------------------------------------- init

def init_conv_lora_linear(key, cin, cout, r=4, n_experts=4, lora_alpha=1.0):
    assert n_experts == len(RATIOS)
    keys = jax.random.split(key, 6 + 2 * n_experts)
    s = 0.02
    w = s * jax.random.normal(keys[0], (cout, cin), jnp.float32)   # frozen Linear weight
    bias = s * jax.random.normal(keys[1], (cout,), jnp.float32)
    a = s * jax.random.normal(keys[2], (r, cin), jnp.float32)      # lora_A
    bm = s * jax.random.normal(keys[3], (cout, r), jnp.float32)    # lora_B (nonzero for test)
    wg = s * jax.random.normal(keys[4], (n_experts, r), jnp.float32)
    bg = jnp.zeros((n_experts,), jnp.float32)
    scaling = lora_alpha / r

    # Lane-pad LoRA factors to 128 and fold `scaling` into B^T (zero pad keeps math exact).
    at_pad = jnp.zeros((cin, RPAD), jnp.float32).at[:, :r].set(a.T)
    bt_pad = jnp.zeros((RPAD, cout), jnp.float32).at[:r, :].set(scaling * bm.T)

    conv_w, conv_b = [], []
    for e in range(n_experts):
        cw = s * jax.random.normal(keys[6 + 2 * e], (r, r, 3, 3), jnp.float32)  # NCHW
        cb = s * jax.random.normal(keys[7 + 2 * e], (r,), jnp.float32)
        # repack (c_out, c_in, kh, kw) -> im2col (9*r, r), matching [di, dj, c_in] patch
        # order, then zero-pad the output lanes to 128 (lane-dense expert stores).
        w_im2col = jnp.transpose(cw, (2, 3, 1, 0)).reshape(9 * r, r)
        conv_w.append(jnp.zeros((9 * r, RPAD), jnp.float32)
                      .at[:, :r].set(w_im2col).astype(jnp.bfloat16))
        conv_b.append(jnp.zeros((1, RPAD), jnp.float32).at[0, :r].set(cb))

    return dict(
        Wt=w.T.astype(jnp.bfloat16),          # (cin, cout) bf16 (MXU-native)
        b=bias.reshape(1, cout),              # f32, added post-accumulation
        At_pad=at_pad.astype(jnp.bfloat16),   # (cin, 128) bf16
        Bt_pad=bt_pad.astype(jnp.bfloat16),   # (128, cout) bf16, scaling folded in
        Wg=wg, bg=bg, conv_w=conv_w, conv_b=conv_b,
    )


# ----------------------------------------------------------------------------- main

if __name__ == "__main__":
    key = jax.random.PRNGKey(0)
    kx, ky, kp1, kp2 = jax.random.split(key, 4)

    B, H, W = 2, 8, 8
    embedding_dim, mlp_dim, lora_rank = 128, 256, 4

    x = jax.random.normal(kx, (B, H, W, embedding_dim), jnp.float32)
    y = jax.random.normal(ky, (B, H, W, embedding_dim), jnp.float32)

    params = {
        "lin1": init_conv_lora_linear(kp1, embedding_dim, mlp_dim, r=lora_rank, n_experts=4),
        "lin2": init_conv_lora_linear(kp2, mlp_dim, embedding_dim, r=lora_rank, n_experts=4),
    }

    fwd = jax.jit(mlp_block2)
    x3, y3 = fwd(x, y, params)
    jax.block_until_ready((x3, y3))
    assert x3.shape == (B, H, W, embedding_dim) and y3.shape == (B, H, W, embedding_dim)
    print("KERNEL_OK")
</pallas_src>

<mosaic_0001>
module attributes {stable_mosaic.version = 11 : i64} {
  func.func @_lora_down_kernel(%arg0: i32, %arg1: memref<128x128xbf16, #tpu.memory_space<vmem>>, %arg2: memref<128x128xbf16, #tpu.memory_space<vmem>>, %arg3: memref<128x128xbf16, #tpu.memory_space<vmem>>) attributes {dimension_semantics = [#tpu.dimension_semantics<parallel>], iteration_bounds = array<i64: 2>, scalar_prefetch = 0 : i64, scratch_operands = 0 : i64, tpu.core_type = #tpu.core_type<tc>, window_params = [{transform_indices = @transform_0, window_bounds = array<i64: 128, 128>}, {pipeline_mode = #tpu.pipeline_mode<synchronous>, transform_indices = @transform_1, window_bounds = array<i64: 128, 128>}, {transform_indices = @transform_2, window_bounds = array<i64: 128, 128>}]} {
    %c0 = arith.constant 0 : index
    %c0_0 = arith.constant 0 : index
    %0 = vector.load %arg1[%c0, %c0_0] : memref<128x128xbf16, #tpu.memory_space<vmem>>, vector<128x128xbf16>
    %c0_1 = arith.constant 0 : index
    %c0_2 = arith.constant 0 : index
    %1 = vector.load %arg2[%c0_1, %c0_2] : memref<128x128xbf16, #tpu.memory_space<vmem>>, vector<128x128xbf16>
    %cst = arith.constant dense<0.000000e+00> : vector<128x128xf32>
    %2 = tpu.matmul %0, %1, %cst {dimension_numbers = #tpu.dot_dimension_numbers<[1], [0], [0], [1], [0, 0, 1, 1], [], []>} : vector<128x128xbf16>, vector<128x128xbf16>, vector<128x128xf32> -> vector<128x128xf32>
    %3 = arith.truncf %2 : vector<128x128xf32> to vector<128x128xbf16>
    %c0_3 = arith.constant 0 : index
    %c0_4 = arith.constant 0 : index
    %4 = vector.load %arg3[%c0_3, %c0_4] : memref<128x128xbf16, #tpu.memory_space<vmem>>, vector<128x128xbf16>
    tpu.vector_store %arg3[%c0_3, %c0_4], %3 {strides = array<i32>} : memref<128x128xbf16, #tpu.memory_space<vmem>>, vector<128x128xbf16>,
    return
  }
  func.func @transform_0(%arg0: i32) -> (i32, i32) {
    %c0_i32 = arith.constant 0 : i32
    %c0_i32_0 = arith.constant 0 : i32
    return %arg0, %c0_i32 : i32, i32
  }
  func.func @transform_1(%arg0: i32) -> (i32, i32) {
    %c0_i32 = arith.constant 0 : i32
    %c0_i32_0 = arith.constant 0 : i32
    %c0_i32_1 = arith.constant 0 : i32
    return %c0_i32, %c0_i32_0 : i32, i32
  }
  func.func @transform_2(%arg0: i32) -> (i32, i32) {
    %c0_i32 = arith.constant 0 : i32
    %c0_i32_0 = arith.constant 0 : i32
    return %arg0, %c0_i32 : i32, i32
  }
}

module attributes {stable_mosaic.version = 11 : i64} {
  func.func @_mm_bias_gelu_kernel(%arg0: i32, %arg1: memref<512x36xbf16, #tpu.memory_space<vmem>>, %arg2: memref<36x128xbf16, #tpu.memory_space<vmem>>, %arg3: memref<1x128xf32, #tpu.memory_space<vmem>>, %arg4: memref<512x128xf32, #tpu.memory_space<vmem>>) attributes {dimension_semantics = [#tpu.dimension_semantics<parallel>], iteration_bounds = array<i64: 2>, scalar_prefetch = 0 : i64, scratch_operands = 0 : i64, tpu.core_type = #tpu.core_type<tc>, window_params = [{transform_indices = @transform_0, window_bounds = array<i64: 512, 36>}, {pipeline_mode = #tpu.pipeline_mode<synchronous>, transform_indices = @transform_1, window_bounds = array<i64: 36, 128>}, {pipeline_mode = #tpu.pipeline_mode<synchronous>, transform_indices = @transform_2, window_bounds = array<i64: 1, 128>}, {transform_indices = @transform_3, window_bounds = array<i64: 512, 128>}]} {
    %c0 = arith.constant 0 : index
    %c0_0 = arith.constant 0 : index
    %0 = vector.load %arg1[%c0, %c0_0] : memref<512x36xbf16, #tpu.memory_space<vmem>>, vector<512x36xbf16>
    %c0_1 = arith.constant 0 : index
    %c0_2 = arith.constant 0 : index
    %1 = vector.load %arg2[%c0_1, %c0_2] : memref<36x128xbf16, #tpu.memory_space<vmem>>, vector<36x128xbf16>
    %cst = arith.constant dense<0.000000e+00> : vector<512x128xf32>
    %2 = tpu.matmul %0, %1, %cst {dimension_numbers = #tpu.dot_dimension_numbers<[1], [0], [0], [1], [0, 0, 1, 1], [], []>} : vector<512x36xbf16>, vector<36x128xbf16>, vector<512x128xf32> -> vector<512x128xf32>
    %c0_3 = arith.constant 0 : index
    %c0_4 = arith.constant 0 : index
    %3 = vector.load %arg3[%c0_3, %c0_4] : memref<1x128xf32, #tpu.memory_space<vmem>>, vector<1x128xf32>
    %4 = vector.broadcast %3 : vector<1x128xf32> to vector<512x128xf32>
    %5 = arith.addf %2, %4 : vector<512x128xf32>
    %cst_5 = arith.constant 5.000000e-01 : f32
    %6 = vector.broadcast %cst_5 : f32 to vector<512x128xf32>
    %7 = arith.mulf %6, %5 : vector<512x128xf32>
    %cst_6 = arith.constant 0.707106769 : f32
    %8 = vector.broadcast %cst_6 : f32 to vector<512x128xf32>
    %9 = arith.mulf %5, %8 : vector<512x128xf32>
    %10 = math.erf %9 : vector<512x128xf32>
    %cst_7 = arith.constant 1.000000e+00 : f32
    %11 = vector.broadcast %cst_7 : f32 to vector<512x128xf32>
    %12 = arith.addf %11, %10 : vector<512x128xf32>
    %13 = arith.mulf %7, %12 : vector<512x128xf32>
    %c0_8 = arith.constant 0 : index
    %c0_9 = arith.constant 0 : index
    %14 = vector.load %arg4[%c0_8, %c0_9] : memref<512x128xf32, #tpu.memory_space<vmem>>, vector<512x128xf32>
    tpu.vector_store %arg4[%c0_8, %c0_9], %13 {strides = array<i32>} : memref<512x128xf32, #tpu.memory_space<vmem>>, vector<512x128xf32>,
    return
  }
  func.func @transform_0(%arg0: i32) -> (i32, i32) {
    %c0_i32 = arith.constant 0 : i32
    %c0_i32_0 = arith.constant 0 : i32
    return %arg0, %c0_i32 : i32, i32
  }
  func.func @transform_1(%arg0: i32) -> (i32, i32) {
    %c0_i32 = arith.constant 0 : i32
    %c0_i32_0 = arith.constant 0 : i32
    %c0_i32_1 = arith.constant 0 : i32
    return %c0_i32, %c0_i32_0 : i32, i32
  }
  func.func @transform_2(%arg0: i32) -> (i32, i32) {
    %c0_i32 = arith.constant 0 : i32
    %c0_i32_0 = arith.constant 0 : i32
    %c0_i32_1 = arith.constant 0 : i32
    return %c0_i32, %c0_i32_0 : i32, i32
  }
  func.func @transform_3(%arg0: i32) -> (i32, i32) {
    %c0_i32 = arith.constant 0 : i32
    %c0_i32_0 = arith.constant 0 : i32
    return %arg0, %c0_i32 : i32, i32
  }
}

module attributes {stable_mosaic.version = 11 : i64} {
  func.func @_mm_bias_gelu_kernel(%arg0: i32, %arg1: memref<128x36xbf16, #tpu.memory_space<vmem>>, %arg2: memref<36x128xbf16, #tpu.memory_space<vmem>>, %arg3: memref<1x128xf32, #tpu.memory_space<vmem>>, %arg4: memref<128x128xf32, #tpu.memory_space<vmem>>) attributes {dimension_semantics = [#tpu.dimension_semantics<parallel>], iteration_bounds = array<i64: 2>, scalar_prefetch = 0 : i64, scratch_operands = 0 : i64, tpu.core_type = #tpu.core_type<tc>, window_params = [{transform_indices = @transform_0, window_bounds = array<i64: 128, 36>}, {pipeline_mode = #tpu.pipeline_mode<synchronous>, transform_indices = @transform_1, window_bounds = array<i64: 36, 128>}, {pipeline_mode = #tpu.pipeline_mode<synchronous>, transform_indices = @transform_2, window_bounds = array<i64: 1, 128>}, {transform_indices = @transform_3, window_bounds = array<i64: 128, 128>}]} {
    %c0 = arith.constant 0 : index
    %c0_0 = arith.constant 0 : index
    %0 = vector.load %arg1[%c0, %c0_0] : memref<128x36xbf16, #tpu.memory_space<vmem>>, vector<128x36xbf16>
    %c0_1 = arith.constant 0 : index
    %c0_2 = arith.constant 0 : index
    %1 = vector.load %arg2[%c0_1, %c0_2] : memref<36x128xbf16, #tpu.memory_space<vmem>>, vector<36x128xbf16>
    %cst = arith.constant dense<0.000000e+00> : vector<128x128xf32>
    %2 = tpu.matmul %0, %1, %cst {dimension_numbers = #tpu.dot_dimension_numbers<[1], [0], [0], [1], [0, 0, 1, 1], [], []>} : vector<128x36xbf16>, vector<36x128xbf16>, vector<128x128xf32> -> vector<128x128xf32>
    %c0_3 = arith.constant 0 : index
    %c0_4 = arith.constant 0 : index
    %3 = vector.load %arg3[%c0_3, %c0_4] : memref<1x128xf32, #tpu.memory_space<vmem>>, vector<1x128xf32>
    %4 = vector.broadcast %3 : vector<1x128xf32> to vector<128x128xf32>
    %5 = arith.addf %2, %4 : vector<128x128xf32>
    %cst_5 = arith.constant 5.000000e-01 : f32
    %6 = vector.broadcast %cst_5 : f32 to vector<128x128xf32>
    %7 = arith.mulf %6, %5 : vector<128x128xf32>
    %cst_6 = arith.constant 0.707106769 : f32
    %8 = vector.broadcast %cst_6 : f32 to vector<128x128xf32>
    %9 = arith.mulf %5, %8 : vector<128x128xf32>
    %10 = math.erf %9 : vector<128x128xf32>
    %cst_7 = arith.constant 1.000000e+00 : f32
    %11 = vector.broadcast %cst_7 : f32 to vector<128x128xf32>
    %12 = arith.addf %11, %10 : vector<128x128xf32>
    %13 = arith.mulf %7, %12 : vector<128x128xf32>
    %c0_8 = arith.constant 0 : index
    %c0_9 = arith.constant 0 : index
    %14 = vector.load %arg4[%c0_8, %c0_9] : memref<128x128xf32, #tpu.memory_space<vmem>>, vector<128x128xf32>
    tpu.vector_store %arg4[%c0_8, %c0_9], %13 {strides = array<i32>} : memref<128x128xf32, #tpu.memory_space<vmem>>, vector<128x128xf32>,
    return
  }
  func.func @transform_0(%arg0: i32) -> (i32, i32) {
    %c0_i32 = arith.constant 0 : i32
    %c0_i32_0 = arith.constant 0 : i32
    return %arg0, %c0_i32 : i32, i32
  }
  func.func @transform_1(%arg0: i32) -> (i32, i32) {
    %c0_i32 = arith.constant 0 : i32
    %c0_i32_0 = arith.constant 0 : i32
    %c0_i32_1 = arith.constant 0 : i32
    return %c0_i32, %c0_i32_0 : i32, i32
  }
  func.func @transform_2(%arg0: i32) -> (i32, i32) {
    %c0_i32 = arith.constant 0 : i32
    %c0_i32_0 = arith.constant 0 : i32
    %c0_i32_1 = arith.constant 0 : i32
    return %c0_i32, %c0_i32_0 : i32, i32
  }
  func.func @transform_3(%arg0: i32) -> (i32, i32) {
    %c0_i32 = arith.constant 0 : i32
    %c0_i32_0 = arith.constant 0 : i32
    return %arg0, %c0_i32 : i32, i32
  }
}

module attributes {stable_mosaic.version = 11 : i64} {
  func.func @_mm_bias_gelu_kernel(%arg0: i32, %arg1: memref<256x36xbf16, #tpu.memory_space<vmem>>, %arg2: memref<36x128xbf16, #tpu.memory_space<vmem>>, %arg3: memref<1x128xf32, #tpu.memory_space<vmem>>, %arg4: memref<256x128xf32, #tpu.memory_space<vmem>>) attributes {dimension_semantics = [#tpu.dimension_semantics<parallel>], iteration_bounds = array<i64: 9>, scalar_prefetch = 0 : i64, scratch_operands = 0 : i64, tpu.core_type = #tpu.core_type<tc>, window_params = [{transform_indices = @transform_0, window_bounds = array<i64: 256, 36>}, {pipeline_mode = #tpu.pipeline_mode<synchronous>, transform_indices = @transform_1, window_bounds = array<i64: 36, 128>}, {pipeline_mode = #tpu.pipeline_mode<synchronous>, transform_indices = @transform_2, window_bounds = array<i64: 1, 128>}, {transform_indices = @transform_3, window_bounds = array<i64: 256, 128>}]} {
    %c0 = arith.constant 0 : index
    %c0_0 = arith.constant 0 : index
    %0 = vector.load %arg1[%c0, %c0_0] : memref<256x36xbf16, #tpu.memory_space<vmem>>, vector<256x36xbf16>
    %c0_1 = arith.constant 0 : index
    %c0_2 = arith.constant 0 : index
    %1 = vector.load %arg2[%c0_1, %c0_2] : memref<36x128xbf16, #tpu.memory_space<vmem>>, vector<36x128xbf16>
    %cst = arith.constant dense<0.000000e+00> : vector<256x128xf32>
    %2 = tpu.matmul %0, %1, %cst {dimension_numbers = #tpu.dot_dimension_numbers<[1], [0], [0], [1], [0, 0, 1, 1], [], []>} : vector<256x36xbf16>, vector<36x128xbf16>, vector<256x128xf32> -> vector<256x128xf32>
    %c0_3 = arith.constant 0 : index
    %c0_4 = arith.constant 0 : index
    %3 = vector.load %arg3[%c0_3, %c0_4] : memref<1x128xf32, #tpu.memory_space<vmem>>, vector<1x128xf32>
    %4 = vector.broadcast %3 : vector<1x128xf32> to vector<256x128xf32>
    %5 = arith.addf %2, %4 : vector<256x128xf32>
    %cst_5 = arith.constant 5.000000e-01 : f32
    %6 = vector.broadcast %cst_5 : f32 to vector<256x128xf32>
    %7 = arith.mulf %6, %5 : vector<256x128xf32>
    %cst_6 = arith.constant 0.707106769 : f32
    %8 = vector.broadcast %cst_6 : f32 to vector<256x128xf32>
    %9 = arith.mulf %5, %8 : vector<256x128xf32>
    %10 = math.erf %9 : vector<256x128xf32>
    %cst_7 = arith.constant 1.000000e+00 : f32
    %11 = vector.broadcast %cst_7 : f32 to vector<256x128xf32>
    %12 = arith.addf %11, %10 : vector<256x128xf32>
    %13 = arith.mulf %7, %12 : vector<256x128xf32>
    %c0_8 = arith.constant 0 : index
    %c0_9 = arith.constant 0 : index
    %14 = vector.load %arg4[%c0_8, %c0_9] : memref<256x128xf32, #tpu.memory_space<vmem>>, vector<256x128xf32>
    tpu.vector_store %arg4[%c0_8, %c0_9], %13 {strides = array<i32>} : memref<256x128xf32, #tpu.memory_space<vmem>>, vector<256x128xf32>,
    return
  }
  func.func @transform_0(%arg0: i32) -> (i32, i32) {
    %c0_i32 = arith.constant 0 : i32
    %c0_i32_0 = arith.constant 0 : i32
    return %arg0, %c0_i32 : i32, i32
  }
  func.func @transform_1(%arg0: i32) -> (i32, i32) {
    %c0_i32 = arith.constant 0 : i32
    %c0_i32_0 = arith.constant 0 : i32
    %c0_i32_1 = arith.constant 0 : i32
    return %c0_i32, %c0_i32_0 : i32, i32
  }
  func.func @transform_2(%arg0: i32) -> (i32, i32) {
    %c0_i32 = arith.constant 0 : i32
    %c0_i32_0 = arith.constant 0 : i32
    %c0_i32_1 = arith.constant 0 : i32
    return %c0_i32, %c0_i32_0 : i32, i32
  }
  func.func @transform_3(%arg0: i32) -> (i32, i32) {
    %c0_i32 = arith.constant 0 : i32
    %c0_i32_0 = arith.constant 0 : i32
    return %arg0, %c0_i32 : i32, i32
  }
}

module attributes {stable_mosaic.version = 11 : i64} {
  func.func @_mm_bias_gelu_kernel(%arg0: i32, %arg1: memref<512x36xbf16, #tpu.memory_space<vmem>>, %arg2: memref<36x128xbf16, #tpu.memory_space<vmem>>, %arg3: memref<1x128xf32, #tpu.memory_space<vmem>>, %arg4: memref<512x128xf32, #tpu.memory_space<vmem>>) attributes {dimension_semantics = [#tpu.dimension_semantics<parallel>], iteration_bounds = array<i64: 8>, scalar_prefetch = 0 : i64, scratch_operands = 0 : i64, tpu.core_type = #tpu.core_type<tc>, window_params = [{transform_indices = @transform_0, window_bounds = array<i64: 512, 36>}, {pipeline_mode = #tpu.pipeline_mode<synchronous>, transform_indices = @transform_1, window_bounds = array<i64: 36, 128>}, {pipeline_mode = #tpu.pipeline_mode<synchronous>, transform_indices = @transform_2, window_bounds = array<i64: 1, 128>}, {transform_indices = @transform_3, window_bounds = array<i64: 512, 128>}]} {
    %c0 = arith.constant 0 : index
    %c0_0 = arith.constant 0 : index
    %0 = vector.load %arg1[%c0, %c0_0] : memref<512x36xbf16, #tpu.memory_space<vmem>>, vector<512x36xbf16>
    %c0_1 = arith.constant 0 : index
    %c0_2 = arith.constant 0 : index
    %1 = vector.load %arg2[%c0_1, %c0_2] : memref<36x128xbf16, #tpu.memory_space<vmem>>, vector<36x128xbf16>
    %cst = arith.constant dense<0.000000e+00> : vector<512x128xf32>
    %2 = tpu.matmul %0, %1, %cst {dimension_numbers = #tpu.dot_dimension_numbers<[1], [0], [0], [1], [0, 0, 1, 1], [], []>} : vector<512x36xbf16>, vector<36x128xbf16>, vector<512x128xf32> -> vector<512x128xf32>
    %c0_3 = arith.constant 0 : index
    %c0_4 = arith.constant 0 : index
    %3 = vector.load %arg3[%c0_3, %c0_4] : memref<1x128xf32, #tpu.memory_space<vmem>>, vector<1x128xf32>
    %4 = vector.broadcast %3 : vector<1x128xf32> to vector<512x128xf32>
    %5 = arith.addf %2, %4 : vector<512x128xf32>
    %cst_5 = arith.constant 5.000000e-01 : f32
    %6 = vector.broadcast %cst_5 : f32 to vector<512x128xf32>
    %7 = arith.mulf %6, %5 : vector<512x128xf32>
    %cst_6 = arith.constant 0.707106769 : f32
    %8 = vector.broadcast %cst_6 : f32 to vector<512x128xf32>
    %9 = arith.mulf %5, %8 : vector<512x128xf32>
    %10 = math.erf %9 : vector<512x128xf32>
    %cst_7 = arith.constant 1.000000e+00 : f32
    %11 = vector.broadcast %cst_7 : f32 to vector<512x128xf32>
    %12 = arith.addf %11, %10 : vector<512x128xf32>
    %13 = arith.mulf %7, %12 : vector<512x128xf32>
    %c0_8 = arith.constant 0 : index
    %c0_9 = arith.constant 0 : index
    %14 = vector.load %arg4[%c0_8, %c0_9] : memref<512x128xf32, #tpu.memory_space<vmem>>, vector<512x128xf32>
    tpu.vector_store %arg4[%c0_8, %c0_9], %13 {strides = array<i32>} : memref<512x128xf32, #tpu.memory_space<vmem>>, vector<512x128xf32>,
    return
  }
  func.func @transform_0(%arg0: i32) -> (i32, i32) {
    %c0_i32 = arith.constant 0 : i32
    %c0_i32_0 = arith.constant 0 : i32
    return %arg0, %c0_i32 : i32, i32
  }
  func.func @transform_1(%arg0: i32) -> (i32, i32) {
    %c0_i32 = arith.constant 0 : i32
    %c0_i32_0 = arith.constant 0 : i32
    %c0_i32_1 = arith.constant 0 : i32
    return %c0_i32, %c0_i32_0 : i32, i32
  }
  func.func @transform_2(%arg0: i32) -> (i32, i32) {
    %c0_i32 = arith.constant 0 : i32
    %c0_i32_0 = arith.constant 0 : i32
    %c0_i32_1 = arith.constant 0 : i32
    return %c0_i32, %c0_i32_0 : i32, i32
  }
  func.func @transform_3(%arg0: i32) -> (i32, i32) {
    %c0_i32 = arith.constant 0 : i32
    %c0_i32_0 = arith.constant 0 : i32
    return %arg0, %c0_i32 : i32, i32
  }
}

module attributes {stable_mosaic.version = 11 : i64} {
  func.func @_fused_linear_kernel(%arg0: i32, %arg1: i32, %arg2: i32, %arg3: memref<128x128xbf16, #tpu.memory_space<vmem>>, %arg4: memref<128x256xbf16, #tpu.memory_space<vmem>>, %arg5: memref<1x256xf32, #tpu.memory_space<vmem>>, %arg6: memref<128x128xbf16, #tpu.memory_space<vmem>>, %arg7: memref<128x256xbf16, #tpu.memory_space<vmem>>, %arg8: memref<128x256xbf16, #tpu.memory_space<vmem>>, %arg9: memref<128x256xf32, #tpu.memory_space<vmem>>) attributes {dimension_semantics = [#tpu.dimension_semantics<parallel>, #tpu.dimension_semantics<parallel>, #tpu.dimension_semantics<arbitrary>], iteration_bounds = array<i64: 2, 1, 1>, scalar_prefetch = 0 : i64, scratch_operands = 1 : i64, tpu.core_type = #tpu.core_type<tc>, window_params = [{transform_indices = @transform_0, window_bounds = array<i64: 128, 128>}, {transform_indices = @transform_1, window_bounds = array<i64: 128, 256>}, {transform_indices = @transform_2, window_bounds = array<i64: 1, 256>}, {transform_indices = @transform_3, window_bounds = array<i64: 128, 128>}, {transform_indices = @transform_4, window_bounds = array<i64: 128, 256>}, {transform_indices = @transform_5, window_bounds = array<i64: 128, 256>}]} {
    %c0_i32 = arith.constant 0 : i32
    %0 = arith.cmpi eq, %arg2, %c0_i32 : i32
    %1 = arith.extui %0 : i1 to i32
    %c0_i32_0 = arith.constant 0 : i32
    %2 = arith.cmpi ne, %1, %c0_i32_0 : i32
    scf.if %2 {
      %cst_10 = arith.constant 0.000000e+00 : f32
      %12 = vector.broadcast %cst_10 : f32 to vector<128x256xf32>
      %c0_11 = arith.constant 0 : index
      %c0_12 = arith.constant 0 : index
      %13 = vector.load %arg9[%c0_11, %c0_12] : memref<128x256xf32, #tpu.memory_space<vmem>>, vector<128x256xf32>
      tpu.vector_store %arg9[%c0_11, %c0_12], %12 {strides = array<i32>} : memref<128x256xf32, #tpu.memory_space<vmem>>, vector<128x256xf32>,
    } else {
    }
    %c0 = arith.constant 0 : index
    %c0_1 = arith.constant 0 : index
    %3 = vector.load %arg9[%c0, %c0_1] : memref<128x256xf32, #tpu.memory_space<vmem>>, vector<128x256xf32>
    %c0_2 = arith.constant 0 : index
    %c0_3 = arith.constant 0 : index
    %4 = vector.load %arg3[%c0_2, %c0_3] : memref<128x128xbf16, #tpu.memory_space<vmem>>, vector<128x128xbf16>
    %c0_4 = arith.constant 0 : index
    %c0_5 = arith.constant 0 : index
    %5 = vector.load %arg4[%c0_4, %c0_5] : memref<128x256xbf16, #tpu.memory_space<vmem>>, vector<128x256xbf16>
    %cst = arith.constant dense<0.000000e+00> : vector<128x256xf32>
    %6 = tpu.matmul %4, %5, %cst {dimension_numbers = #tpu.dot_dimension_numbers<[1], [0], [0], [1], [0, 0, 1, 1], [], []>} : vector<128x128xbf16>, vector<128x256xbf16>, vector<128x256xf32> -> vector<128x256xf32>
    %7 = arith.addf %3, %6 : vector<128x256xf32>
    %c0_6 = arith.constant 0 : index
    %c0_7 = arith.constant 0 : index
    %8 = vector.load %arg9[%c0_6, %c0_7] : memref<128x256xf32, #tpu.memory_space<vmem>>, vector<128x256xf32>
    tpu.vector_store %arg9[%c0_6, %c0_7], %7 {strides = array<i32>} : memref<128x256xf32, #tpu.memory_space<vmem>>, vector<128x256xf32>,
    %c0_i32_8 = arith.constant 0 : i32
    %9 = arith.cmpi eq, %arg2, %c0_i32_8 : i32
    %10 = arith.extui %9 : i1 to i32
    %c0_i32_9 = arith.constant 0 : i32
    %11 = arith.cmpi ne, %10, %c0_i32_9 : i32
    scf.if %11 {
      %c0_10 = arith.constant 0 : index
      %c0_11 = arith.constant 0 : index
      %12 = vector.load %arg9[%c0_10, %c0_11] : memref<128x256xf32, #tpu.memory_space<vmem>>, vector<128x256xf32>
      %c0_12 = arith.constant 0 : index
      %c0_13 = arith.constant 0 : index
      %13 = vector.load %arg6[%c0_12, %c0_13] : memref<128x128xbf16, #tpu.memory_space<vmem>>, vector<128x128xbf16>
      %c0_14 = arith.constant 0 : index
      %c0_15 = arith.constant 0 : index
      %14 = vector.load %arg7[%c0_14, %c0_15] : memref<128x256xbf16, #tpu.memory_space<vmem>>, vector<128x256xbf16>
      %cst_16 = arith.constant dense<0.000000e+00> : vector<128x256xf32>
      %15 = tpu.matmul %13, %14, %cst_16 {dimension_numbers = #tpu.dot_dimension_numbers<[1], [0], [0], [1], [0, 0, 1, 1], [], []>} : vector<128x128xbf16>, vector<128x256xbf16>, vector<128x256xf32> -> vector<128x256xf32>
      %16 = arith.addf %12, %15 : vector<128x256xf32>
      %c0_17 = arith.constant 0 : index
      %c0_18 = arith.constant 0 : index
      %17 = vector.load %arg5[%c0_17, %c0_18] : memref<1x256xf32, #tpu.memory_space<vmem>>, vector<1x256xf32>
      %18 = vector.broadcast %17 : vector<1x256xf32> to vector<128x256xf32>
      %19 = arith.addf %16, %18 : vector<128x256xf32>
      %cst_19 = arith.constant 5.000000e-01 : f32
      %20 = vector.broadcast %cst_19 : f32 to vector<128x256xf32>
      %21 = arith.mulf %20, %19 : vector<128x256xf32>
      %cst_20 = arith.constant 0.707106769 : f32
      %22 = vector.broadcast %cst_20 : f32 to vector<128x256xf32>
      %23 = arith.mulf %19, %22 : vector<128x256xf32>
      %24 = math.erf %23 : vector<128x256xf32>
      %cst_21 = arith.constant 1.000000e+00 : f32
      %25 = vector.broadcast %cst_21 : f32 to vector<128x256xf32>
      %26 = arith.addf %25, %24 : vector<128x256xf32>
      %27 = arith.mulf %21, %26 : vector<128x256xf32>
      %28 = arith.truncf %27 : vector<128x256xf32> to vector<128x256xbf16>
      %c0_22 = arith.constant 0 : index
      %c0_23 = arith.constant 0 : index
      %29 = vector.load %arg8[%c0_22, %c0_23] : memref<128x256xbf16, #tpu.memory_space<vmem>>, vector<128x256xbf16>
      tpu.vector_store %arg8[%c0_22, %c0_23], %28 {strides = array<i32>} : memref<128x256xbf16, #tpu.memory_space<vmem>>, vector<128x256xbf16>,
    } else {
    }
    return
  }
  func.func @transform_0(%arg0: i32, %arg1: i32, %arg2: i32) -> (i32, i32) {
    %c0_i32 = arith.constant 0 : i32
    return %arg0, %arg2 : i32, i32
  }
  func.func @transform_1(%arg0: i32, %arg1: i32, %arg2: i32) -> (i32, i32) {
    %c0_i32 = arith.constant 0 : i32
    return %arg2, %arg1 : i32, i32
  }
  func.func @transform_2(%arg0: i32, %arg1: i32, %arg2: i32) -> (i32, i32) {
    %c0_i32 = arith.constant 0 : i32
    %c0_i32_0 = arith.constant 0 : i32
    return %c0_i32, %arg1 : i32, i32
  }
  func.func @transform_3(%arg0: i32, %arg1: i32, %arg2: i32) -> (i32, i32) {
    %c0_i32 = arith.constant 0 : i32
    %c0_i32_0 = arith.constant 0 : i32
    return %arg0, %c0_i32 : i32, i32
  }
  func.func @transform_4(%arg0: i32, %arg1: i32, %arg2: i32) -> (i32, i32) {
    %c0_i32 = arith.constant 0 : i32
    %c0_i32_0 = arith.constant 0 : i32
    return %c0_i32, %arg1 : i32, i32
  }
  func.func @transform_5(%arg0: i32, %arg1: i32, %arg2: i32) -> (i32, i32) {
    %c0_i32 = arith.constant 0 : i32
    return %arg0, %arg1 : i32, i32
  }
}

module attributes {stable_mosaic.version = 11 : i64} {
  func.func @_lora_down_kernel(%arg0: i32, %arg1: memref<128x256xbf16, #tpu.memory_space<vmem>>, %arg2: memref<256x128xbf16, #tpu.memory_space<vmem>>, %arg3: memref<128x128xbf16, #tpu.memory_space<vmem>>) attributes {dimension_semantics = [#tpu.dimension_semantics<parallel>], iteration_bounds = array<i64: 2>, scalar_prefetch = 0 : i64, scratch_operands = 0 : i64, tpu.core_type = #tpu.core_type<tc>, window_params = [{transform_indices = @transform_0, window_bounds = array<i64: 128, 256>}, {pipeline_mode = #tpu.pipeline_mode<synchronous>, transform_indices = @transform_1, window_bounds = array<i64: 256, 128>}, {transform_indices = @transform_2, window_bounds = array<i64: 128, 128>}]} {
    %c0 = arith.constant 0 : index
    %c0_0 = arith.constant 0 : index
    %0 = vector.load %arg1[%c0, %c0_0] : memref<128x256xbf16, #tpu.memory_space<vmem>>, vector<128x256xbf16>
    %c0_1 = arith.constant 0 : index
    %c0_2 = arith.constant 0 : index
    %1 = vector.load %arg2[%c0_1, %c0_2] : memref<256x128xbf16, #tpu.memory_space<vmem>>, vector<256x128xbf16>
    %cst = arith.constant dense<0.000000e+00> : vector<128x128xf32>
    %2 = tpu.matmul %0, %1, %cst {dimension_numbers = #tpu.dot_dimension_numbers<[1], [0], [0], [1], [0, 0, 1, 1], [], []>} : vector<128x256xbf16>, vector<256x128xbf16>, vector<128x128xf32> -> vector<128x128xf32>
    %3 = arith.truncf %2 : vector<128x128xf32> to vector<128x128xbf16>
    %c0_3 = arith.constant 0 : index
    %c0_4 = arith.constant 0 : index
    %4 = vector.load %arg3[%c0_3, %c0_4] : memref<128x128xbf16, #tpu.memory_space<vmem>>, vector<128x128xbf16>
    tpu.vector_store %arg3[%c0_3, %c0_4], %3 {strides = array<i32>} : memref<128x128xbf16, #tpu.memory_space<vmem>>, vector<128x128xbf16>,
    return
  }
  func.func @transform_0(%arg0: i32) -> (i32, i32) {
    %c0_i32 = arith.constant 0 : i32
    %c0_i32_0 = arith.constant 0 : i32
    return %arg0, %c0_i32 : i32, i32
  }
  func.func @transform_1(%arg0: i32) -> (i32, i32) {
    %c0_i32 = arith.constant 0 : i32
    %c0_i32_0 = arith.constant 0 : i32
    %c0_i32_1 = arith.constant 0 : i32
    return %c0_i32, %c0_i32_0 : i32, i32
  }
  func.func @transform_2(%arg0: i32) -> (i32, i32) {
    %c0_i32 = arith.constant 0 : i32
    %c0_i32_0 = arith.constant 0 : i32
    return %arg0, %c0_i32 : i32, i32
  }
}

module attributes {stable_mosaic.version = 11 : i64} {
  func.func @_fused_linear_kernel(%arg0: i32, %arg1: i32, %arg2: i32, %arg3: memref<128x256xbf16, #tpu.memory_space<vmem>>, %arg4: memref<256x128xbf16, #tpu.memory_space<vmem>>, %arg5: memref<1x128xf32, #tpu.memory_space<vmem>>, %arg6: memref<128x128xbf16, #tpu.memory_space<vmem>>, %arg7: memref<128x128xbf16, #tpu.memory_space<vmem>>, %arg8: memref<128x128xf32, #tpu.memory_space<vmem>>, %arg9: memref<128x128xf32, #tpu.memory_space<vmem>>) attributes {dimension_semantics = [#tpu.dimension_semantics<parallel>, #tpu.dimension_semantics<parallel>, #tpu.dimension_semantics<arbitrary>], iteration_bounds = array<i64: 2, 1, 1>, scalar_prefetch = 0 : i64, scratch_operands = 1 : i64, tpu.core_type = #tpu.core_type<tc>, window_params = [{transform_indices = @transform_0, window_bounds = array<i64: 128, 256>}, {transform_indices = @transform_1, window_bounds = array<i64: 256, 128>}, {transform_indices = @transform_2, window_bounds = array<i64: 1, 128>}, {transform_indices = @transform_3, window_bounds = array<i64: 128, 128>}, {transform_indices = @transform_4, window_bounds = array<i64: 128, 128>}, {transform_indices = @transform_5, window_bounds = array<i64: 128, 128>}]} {
    %c0_i32 = arith.constant 0 : i32
    %0 = arith.cmpi eq, %arg2, %c0_i32 : i32
    %1 = arith.extui %0 : i1 to i32
    %c0_i32_0 = arith.constant 0 : i32
    %2 = arith.cmpi ne, %1, %c0_i32_0 : i32
    scf.if %2 {
      %cst_10 = arith.constant 0.000000e+00 : f32
      %12 = vector.broadcast %cst_10 : f32 to vector<128x128xf32>
      %c0_11 = arith.constant 0 : index
      %c0_12 = arith.constant 0 : index
      %13 = vector.load %arg9[%c0_11, %c0_12] : memref<128x128xf32, #tpu.memory_space<vmem>>, vector<128x128xf32>
      tpu.vector_store %arg9[%c0_11, %c0_12], %12 {strides = array<i32>} : memref<128x128xf32, #tpu.memory_space<vmem>>, vector<128x128xf32>,
    } else {
    }
    %c0 = arith.constant 0 : index
    %c0_1 = arith.constant 0 : index
    %3 = vector.load %arg9[%c0, %c0_1] : memref<128x128xf32, #tpu.memory_space<vmem>>, vector<128x128xf32>
    %c0_2 = arith.constant 0 : index
    %c0_3 = arith.constant 0 : index
    %4 = vector.load %arg3[%c0_2, %c0_3] : memref<128x256xbf16, #tpu.memory_space<vmem>>, vector<128x256xbf16>
    %c0_4 = arith.constant 0 : index
    %c0_5 = arith.constant 0 : index
    %5 = vector.load %arg4[%c0_4, %c0_5] : memref<256x128xbf16, #tpu.memory_space<vmem>>, vector<256x128xbf16>
    %cst = arith.constant dense<0.000000e+00> : vector<128x128xf32>
    %6 = tpu.matmul %4, %5, %cst {dimension_numbers = #tpu.dot_dimension_numbers<[1], [0], [0], [1], [0, 0, 1, 1], [], []>} : vector<128x256xbf16>, vector<256x128xbf16>, vector<128x128xf32> -> vector<128x128xf32>
    %7 = arith.addf %3, %6 : vector<128x128xf32>
    %c0_6 = arith.constant 0 : index
    %c0_7 = arith.constant 0 : index
    %8 = vector.load %arg9[%c0_6, %c0_7] : memref<128x128xf32, #tpu.memory_space<vmem>>, vector<128x128xf32>
    tpu.vector_store %arg9[%c0_6, %c0_7], %7 {strides = array<i32>} : memref<128x128xf32, #tpu.memory_space<vmem>>, vector<128x128xf32>,
    %c0_i32_8 = arith.constant 0 : i32
    %9 = arith.cmpi eq, %arg2, %c0_i32_8 : i32
    %10 = arith.extui %9 : i1 to i32
    %c0_i32_9 = arith.constant 0 : i32
    %11 = arith.cmpi ne, %10, %c0_i32_9 : i32
    scf.if %11 {
      %c0_10 = arith.constant 0 : index
      %c0_11 = arith.constant 0 : index
      %12 = vector.load %arg9[%c0_10, %c0_11] : memref<128x128xf32, #tpu.memory_space<vmem>>, vector<128x128xf32>
      %c0_12 = arith.constant 0 : index
      %c0_13 = arith.constant 0 : index
      %13 = vector.load %arg6[%c0_12, %c0_13] : memref<128x128xbf16, #tpu.memory_space<vmem>>, vector<128x128xbf16>
      %c0_14 = arith.constant 0 : index
      %c0_15 = arith.constant 0 : index
      %14 = vector.load %arg7[%c0_14, %c0_15] : memref<128x128xbf16, #tpu.memory_space<vmem>>, vector<128x128xbf16>
      %cst_16 = arith.constant dense<0.000000e+00> : vector<128x128xf32>
      %15 = tpu.matmul %13, %14, %cst_16 {dimension_numbers = #tpu.dot_dimension_numbers<[1], [0], [0], [1], [0, 0, 1, 1], [], []>} : vector<128x128xbf16>, vector<128x128xbf16>, vector<128x128xf32> -> vector<128x128xf32>
      %16 = arith.addf %12, %15 : vector<128x128xf32>
      %c0_17 = arith.constant 0 : index
      %c0_18 = arith.constant 0 : index
      %17 = vector.load %arg5[%c0_17, %c0_18] : memref<1x128xf32, #tpu.memory_space<vmem>>, vector<1x128xf32>
      %18 = vector.broadcast %17 : vector<1x128xf32> to vector<128x128xf32>
      %19 = arith.addf %16, %18 : vector<128x128xf32>
      %c0_19 = arith.constant 0 : index
      %c0_20 = arith.constant 0 : index
      %20 = vector.load %arg8[%c0_19, %c0_20] : memref<128x128xf32, #tpu.memory_space<vmem>>, vector<128x128xf32>
      tpu.vector_store %arg8[%c0_19, %c0_20], %19 {strides = array<i32>} : memref<128x128xf32, #tpu.memory_space<vmem>>, vector<128x128xf32>,
    } else {
    }
    return
  }
  func.func @transform_0(%arg0: i32, %arg1: i32, %arg2: i32) -> (i32, i32) {
    %c0_i32 = arith.constant 0 : i32
    return %arg0, %arg2 : i32, i32
  }
  func.func @transform_1(%arg0: i32, %arg1: i32, %arg2: i32) -> (i32, i32) {
    %c0_i32 = arith.constant 0 : i32
    return %arg2, %arg1 : i32, i32
  }
  func.func @transform_2(%arg0: i32, %arg1: i32, %arg2: i32) -> (i32, i32) {
    %c0_i32 = arith.constant 0 : i32
    %c0_i32_0 = arith.constant 0 : i32
    return %c0_i32, %arg1 : i32, i32
  }
  func.func @transform_3(%arg0: i32, %arg1: i32, %arg2: i32) -> (i32, i32) {
    %c0_i32 = arith.constant 0 : i32
    %c0_i32_0 = arith.constant 0 : i32
    return %arg0, %c0_i32 : i32, i32
  }
  func.func @transform_4(%arg0: i32, %arg1: i32, %arg2: i32) -> (i32, i32) {
    %c0_i32 = arith.constant 0 : i32
    %c0_i32_0 = arith.constant 0 : i32
    return %c0_i32, %arg1 : i32, i32
  }
  func.func @transform_5(%arg0: i32, %arg1: i32, %arg2: i32) -> (i32, i32) {
    %c0_i32 = arith.constant 0 : i32
    return %arg0, %arg1 : i32, i32
  }
}

</mosaic_0001>

<bundles_post_ra>
// kernel: mlp_block2.12
= control target key start
LH: loop header
LB: loop body
LE: loop exit
PB: predicated region body
PF: predicated region fallthrough
CT: control target
= control target key end

     0   :  { %7 = vsyncpa [#allocation3], 0  ;;  %s803_s9 = smov 0   ;;  %s879_s0 = inlined_call_operand.vmem [shape: bf16[256,128], index: 0, kind: input, shape index: {}]   ;;  %s880_s1 = inlined_call_operand.hbm [shape: bf16[128,128], index: 1, kind: input, shape index: {}]   ;;  %s881_s2 = inlined_call_operand.vmem [shape: bf16[256,128], index: 2, kind: output, shape index: {}]  }
   0x1 LB: > { %s536_s10 = sadd.s32 4294967295, %s783_s9   ;;  %p538_p0 = scmp.ge.s32.totalorder %s783_s9, 1  ;;  %s783_s9 = sphi %s803_s9, %s13_s9  }
   0x2   : > { %p91_p1 = scmp.lt.s32.totalorder %s783_s9, 3  ;;  %s785_s11 = smov [#allocation2]  }
   0x3   : > { %s103_s12 = sshll.u32 %s785_s11, 4  ;;  %p817_p3 = scmp.eq.s32.totalorder %s536_s10, 0  ;;  %s104_s12 = int_to_ptr.vmem [resolvable:$true] %s103_s12 }
   0x4   : > { %p811_p2 = pnand %p538_p0, %p91_p1  ;;  %s745_s18 = scalar_lea.hbm %s880_s1, 1024 }
   0x5   : > { %s886_s14 = scalar_select %p817_p3, 1, 0 }
   0x6   : > { %s885_s13 = scalar_select %p811_p2, 1, 0 }
   0x7   : > { %p712_p4 = pneg %p811_p2  ;;  %p746_p6 = scmp.ne.s32.totalorder %s880_s1, %s745_s18 }
   0x8   : > { %p752_p10 = scmp.lt.u32.totalorder %s745_s18, %s880_s1 }
   0x9   : > { %p825_p5 = pnand %p817_p3, %p712_p4 }
   0xb   : > { %p747_p7 = pneg %p825_p5 }
   0xd   : > { %p748_p8 = pnand %p747_p7, %p746_p6 }
   0xf   : > { %p749_p9 = pneg %p748_p8 }
  0x11   : > { %p754_p11 = pnand %p752_p10, %p749_p9 }
  0x13   : > { %757 = shalt.err (!%p754_p11)
}
  0x14   : > { %s758_s23 = scalar_lea.vmem %s104_s12, 1024  ;;  %p766_p1 = scmp.lt.s32.totalorder %s104_s12, %s104_s12 }
  0x15   : > { %p759_p12 = scmp.ne.s32.totalorder %s104_s12, %s758_s23  ;;  %p767_p4 = scmp.lt.s32.totalorder %s758_s23, %s758_s23 }
  0x17   : > { %p761_p13 = pnand %p759_p12, %p747_p7  ;;  %p768_p3 = por %p767_p4, %p766_p1 }
  0x19   : > { %p762_p0 = pneg %p761_p13 }
  0x1b   : > { %p769_p2 = pnand %p768_p3, %p762_p0 }
  0x1d   : > { %772 = shalt.err (!%p769_p2)
}
  0x1e   : > { %s786_s24 = smov 64   ;;  %s787_s25 = smov 4  }
  0x1f   : > { %715 = dma.hbm_to_vmem [thread:$0]  (!%p825_p5), %s880_s1, 1024, %s104_s12, [#allocation3], %s786_s24, %s786_s24, %s787_s25  }
  0x20   : > { %p888_p6 = scmp.ne.s32.totalorder %s885_s13, 0 }
  0x21   : > { %p889_p8 = scmp.ne.s32.totalorder (!%p888_p6), %s886_s14, 0 }
  0x22   : > { %128 = sbr.rel (%p888_p6) target bundleno = 301 (0x12d), region = 28 }
  0x29   : > { %778 = dma.done.wait (%p889_p8), [#allocation3], 1024  }
  0x2a   : > { %780 = vsyncadd (%p889_p8), [#allocation3], 4294966272  ;;  %s543_s28 = sshll.u32 %s536_s10, 4  ;;  %v729_v0 = vld [vmem:[#allocation2] sm:$0xff]   ;;  %v730_v1 = vld [vmem:[#allocation2 + $0x8] sm:$0xff]  }
  0x2b   : > { %p151_p2 = scmp.lt.s32.totalorder %s543_s28, 31  ;;  %660 = vmatprep.subr.bf16.mxu0 %v729_v0  ;;  %692 = vmatprep.subr.bf16.mxu1 %v729_v0  ;;  %v731_v2 = vld [vmem:[#allocation2 + $0x10] sm:$0xff]   ;;  %v732_v3 = vld [vmem:[#allocation2 + $0x18] sm:$0xff]   ;;  %v733_v6 = vld [vmem:[#allocation2 + $0x20] sm:$0xff]  }
  0x2c   : > { %661 = vmatpush3.bf16.msra.mxu0 %v729_v0  ;;  %700 = vmatpush3.bf16.msra.mxu1 %v729_v0  ;;  %v734_v7 = vld [vmem:[#allocation2 + $0x28] sm:$0xff]   ;;  %v735_v8 = vld [vmem:[#allocation2 + $0x30] sm:$0xff]   ;;  %v736_v9 = vld [vmem:[#allocation2 + $0x38] sm:$0xff]  }
  0x2d   : > { %s891_s28 = smov (!%p151_p2, %s543_s28), 31  ;;  %662 = vmatprep.subr.bf16.mxu0 %v730_v1  ;;  %693 = vmatprep.subr.bf16.mxu1 %v730_v1 }
  0x2e   : > { %s544_s29 = sshll.u32 %s891_s28, 2 }
  0x2f   : > { %s861_s4 = scalar_lea.vmem %s879_s0, %s544_s29  ;;  %s160_s7 = scalar_lea.vmem %s881_s2, %s544_s29 }
  0x30   : > { %663 = vmatpush3.bf16.msra.mxu0 %v730_v1  ;;  %701 = vmatpush3.bf16.msra.mxu1 %v730_v1  ;;  %v737_v4 = vld [vmem:[%s861_s4] sm:$0xff]   ;;  %v739_v10 = vld [vmem:[%s861_s4 + $0x8] sm:$0xff]   ;;  %v741_v12 = vld [vmem:[%s861_s4 + $0x10] sm:$0xff]  }
  0x31   : > { %664 = vmatprep.subr.bf16.mxu0 %v731_v2  ;;  %694 = vmatprep.subr.bf16.mxu1 %v731_v2  ;;  %v738_v5 = vld [vmem:[%s861_s4 + $0x20] sm:$0xff]   ;;  %v740_v11 = vld [vmem:[%s861_s4 + $0x28] sm:$0xff]   ;;  %v742_v13 = vld [vmem:[%s861_s4 + $0x30] sm:$0xff]  }
  0x32   : > { %676 = vmatprep.mubr.bf16.mxu0 %v737_v4  ;;  %684 = vmatprep.mubr.bf16.mxu1 %v738_v5  ;;  %v743_v14 = vld [vmem:[%s861_s4 + $0x18] sm:$0xff]  }
  0x33   : > { %v744_v15 = vld [vmem:[%s861_s4 + $0x38] sm:$0xff]  }
  0x34   : > { %665 = vmatpush3.bf16.msra.mxu0 %v731_v2  ;;  %702 = vmatpush3.bf16.msra.mxu1 %v731_v2 }
  0x35   : > { %666 = vmatprep.subr.bf16.mxu0 %v732_v3  ;;  %695 = vmatprep.subr.bf16.mxu1 %v732_v3 }
  0x38   : > { %667 = vmatpush3.bf16.msra.mxu0 %v732_v3  ;;  %703 = vmatpush3.bf16.msra.mxu1 %v732_v3 }
  0x39   : > { %668 = vmatprep.subr.bf16.mxu0 %v733_v6  ;;  %696 = vmatprep.subr.bf16.mxu1 %v733_v6 }
  0x3c   : > { %669 = vmatpush3.bf16.msra.mxu0 %v733_v6  ;;  %704 = vmatpush3.bf16.msra.mxu1 %v733_v6 }
  0x3d   : > { %670 = vmatprep.subr.bf16.mxu0 %v734_v7  ;;  %697 = vmatprep.subr.bf16.mxu1 %v734_v7 }
  0x40   : > { %671 = vmatpush3.bf16.msra.mxu0 %v734_v7  ;;  %705 = vmatpush3.bf16.msra.mxu1 %v734_v7 }
  0x41   : > { %672 = vmatprep.subr.bf16.mxu0 %v735_v8  ;;  %698 = vmatprep.subr.bf16.mxu1 %v735_v8 }
  0x44   : > { %673 = vmatpush3.bf16.msra.mxu0 %v735_v8  ;;  %706 = vmatpush3.bf16.msra.mxu1 %v735_v8 }
  0x45   : > { %674 = vmatprep.subr.bf16.mxu0 %v736_v9  ;;  %699 = vmatprep.subr.bf16.mxu1 %v736_v9 }
  0x48   : > { %675 = vmatpush3.bf16.msra.mxu0 %v736_v9  ;;  %707 = vmatpush3.bf16.msra.mxu1 %v736_v9 }
  0x4b   : > { %677 = vmatmul.mubr.bf16.vlgmr.msra.gmra.mrb[0].mxu0 %v739_v10  ;;  %685 = vmatmul.mubr.bf16.vlgmr.msra.gmra.mrb[0].mxu1 %v740_v11 }
  0x4c   : > { %680 = vmatprep.mubr.bf16.mxu0 %v741_v12  ;;  %688 = vmatprep.mubr.bf16.mxu1 %v742_v13 }
  0x53   : > { %681 = vmatmul.mubr.bf16.gmra.mrb[4].mxu0 %v743_v14  ;;  %689 = vmatmul.mubr.bf16.gmra.mrb[4].mxu1 %v744_v15 }
 0x11e   : > { %v678_v16 = vpop.f32.mrb[0].mxu0  ;;  %v686_v17 = vpop.f32.mrb[0].mxu1 }
 0x11f   : > { %v325_v18 = vpop.f32.mrb[1].mxu0  ;;  %v357_v19 = vpop.f32.mrb[1].mxu1 }
 0x120   : > { %v679_v20 = vpop.f32.mrb[2].mxu0  ;;  %v687_v21 = vpop.f32.mrb[2].mxu1 }
 0x121   : > { %v605_v22 = vpack.c.bf16 %v679_v20, %v678_v16  ;;  %v625_v23 = vpack.c.bf16 %v687_v21, %v686_v17  ;;  %v328_v24 = vpop.f32.mrb[3].mxu0  ;;  %v360_v25 = vpop.f32.mrb[3].mxu1 }
 0x122   : > { %v600_v26 = vpack.c.bf16 %v328_v24, %v325_v18  ;;  %v620_v27 = vpack.c.bf16 %v360_v25, %v357_v19 }
 0x123   : > { %637 = vst [vmem:[%s160_s7 + $0x8] sm:$0xff] %v605_v22   ;;  %641 = vst [vmem:[%s160_s7 + $0x28] sm:$0xff] %v625_v23  }
 0x124   : > { %601 = vst [vmem:[%s160_s7] sm:$0xff] %v600_v26   ;;  %640 = vst [vmem:[%s160_s7 + $0x20] sm:$0xff] %v620_v27  }
 0x126   : > { %v682_v28 = vpop.f32.mrb[4].mxu0  ;;  %v690_v29 = vpop.f32.mrb[4].mxu1 }
 0x127   : > { %v341_v30 = vpop.f32.mrb[5].mxu0  ;;  %v373_v31 = vpop.f32.mrb[5].mxu1 }
 0x128   : > { %v683_v32 = vpop.f32.mrb[6].mxu0  ;;  %v691_v33 = vpop.f32.mrb[6].mxu1 }
 0x129   : > { %v615_v34 = vpack.c.bf16 %v683_v32, %v682_v28  ;;  %v635_v35 = vpack.c.bf16 %v691_v33, %v690_v29  ;;  %v344_v36 = vpop.f32.mrb[7].mxu0  ;;  %v376_v37 = vpop.f32.mrb[7].mxu1 }
 0x12a   : > { %v610_v38 = vpack.c.bf16 %v344_v36, %v341_v30  ;;  %v630_v39 = vpack.c.bf16 %v376_v37, %v373_v31 }
 0x12b   : > { %639 = vst [vmem:[%s160_s7 + $0x18] sm:$0xff] %v615_v34   ;;  %643 = vst [vmem:[%s160_s7 + $0x38] sm:$0xff] %v635_v35  }
 0x12c   : > { %638 = vst [vmem:[%s160_s7 + $0x10] sm:$0xff] %v610_v38   ;;  %642 = vst [vmem:[%s160_s7 + $0x30] sm:$0xff] %v630_v39  }
 0x12d PF: > { %s13_s9 = sadd.s32 1, %s783_s9  }
 0x12e   : > { %p10_p3 = scmp.ge.s32.totalorder %s13_s9, 4  }
 0x130   :  { %12 = sbr.rel (!%p10_p3) target bundleno = 1 (0x1), region = 63 }
 0x137   :  { %490 = vsyncpa [#allocation3], 1 }
 0x138   :  { %492 = vsyncpa [#allocation3 + $0x1], 1 }

// kernel: mlp_block2.14
= control target key start
LH: loop header
LB: loop body
LE: loop exit
PB: predicated region body
PF: predicated region fallthrough
CT: control target
= control target key end

     0   :  { %s1648_s12 = smov 0   ;;  %s2214_s0 = inlined_call_operand.vmem [shape: bf16[1024,36], index: 0, kind: input, shape index: {}]   ;;  %s2215_s1 = inlined_call_operand.vmem [shape: bf16[36,128], index: 1, kind: input, shape index: {}]   ;;  %s2216_s2 = inlined_call_operand.vmem [shape: f32[1,128], index: 2, kind: input, shape index: {}]   ;;  %s2217_s3 = inlined_call_operand.vmem [shape: f32[1024,128], index: 3, kind: output, shape index: {}]  }
   0x1 LB: > { %s1256_s13 = sadd.s32 4294967295, %s1626_s12   ;;  %p1260_p0 = scmp.ge.s32.totalorder %s1626_s12, 1  ;;  %s1626_s12 = sphi %s1648_s12, %s13_s12  }
   0x2   : > { %p138_p1 = scmp.lt.s32.totalorder %s1626_s12, 3 }
   0x4   : > { %p139_p2 = pnand %p1260_p0, %p138_p1 }
   0x5   : > { %v1456_v0 = vld [vmem:[%s2215_s1] sm:$0xff] (!%p139_p2)   ;;  %v1457_v1 = vld [vmem:[%s2215_s1 + $0x8] sm:$0xff] (!%p139_p2)   ;;  %s1261_s18 = sshll.u32 (!%p139_p2), %s1256_s13, 6  ;;  %v1458_v2 = vld [vmem:[%s2215_s1 + $0x10] ss:$0 sps:$4 sm:$0x33] (!%p139_p2)  }
   0x6   : > { %142 = sbr.rel (%p139_p2) target bundleno = 339 (0x153), region = 32  ;;  %1370 = vmatprep.subr.bf16.mxu0 (!%p139_p2), %v1456_v0  ;;  %1440 = vmatprep.subr.bf16.mxu1 (!%p139_p2), %v1456_v0  ;;  %p163_p3 = scmp.lt.s32.totalorder (!%p139_p2), %s1261_s18, 127  ;;  %vm523_vm0 = vcmask (!%p139_p2), 1041408   ;;  %vm426_vm1 = vcmask (!%p139_p2), 293888   ;;  %v1740_v36 = vld [vmem:[%s2216_s2] ss:$0 sm:$0xff] (!%p139_p2) }
   0x7   : > { %1371 = vmatpush3.bf16.msra.mxu0 (!%p139_p2), %v1456_v0  ;;  %1443 = vmatpush3.bf16.msra.mxu1 (!%p139_p2), %v1456_v0  ;;  %v525_v3 = vsel (!%p139_p2), %vm523_vm0, %v1458_v2, 0 }
   0x8   : > { %1372 = vmatprep.subr.bf16.mxu0 (!%p139_p2), %v1457_v1  ;;  %1441 = vmatprep.subr.bf16.mxu1 (!%p139_p2), %v1457_v1 }
   0xb   : > { %1373 = vmatpush3.bf16.msra.mxu0 (!%p139_p2), %v1457_v1  ;;  %1444 = vmatpush3.bf16.msra.mxu1 (!%p139_p2), %v1457_v1 }
   0xc   : > { %1446 = vmatprep.subr.msk.bf16.mxu0 (!%p139_p2), %vm523_vm0, %v1458_v2  ;;  %1447 = vmatprep.subr.msk.bf16.mxu1 (!%p139_p2), %vm523_vm0, %v1458_v2 }
   0xd   : > { %s2219_s18 = smov (!%p163_p3, %s1261_s18), 127 }
   0xe   : > { %s1262_s21 = sshll.u32 %s2219_s18, 2  ;;  %s1264_s27 = sshll.u32 %s2219_s18, 3 }
   0xf   : > { %s1671_s24 = scalar_lea.vmem %s2214_s0, %s1262_s21  ;;  %1375 = vmatpush3.bf16.msra.mxu0 %v525_v3  ;;  %1445 = vmatpush3.bf16.msra.mxu1 %v525_v3  ;;  %s1780_s30 = scalar_lea.vmem %s2217_s3, %s1264_s27 }
  0x10   : > { %v1459_v4 = vld [vmem:[%s1671_s24] sm:$0xff]   ;;  %v1461_v6 = vld [vmem:[%s1671_s24 + $0x8] sm:$0xff]   ;;  %v1463_v8 = vld [vmem:[%s1671_s24 + $0x10] sm:$0xff]  }
  0x11   : > { %v1460_v5 = vld [vmem:[%s1671_s24 + $0x80] sm:$0xff]   ;;  %1376 = vmatprep.mubr.msk.bf16.mxu0 %vm426_vm1, %v1459_v4  ;;  %v1462_v7 = vld [vmem:[%s1671_s24 + $0x88] sm:$0xff]   ;;  %v1464_v9 = vld [vmem:[%s1671_s24 + $0x90] sm:$0xff]  }
  0x12   : > { %1408 = vmatprep.mubr.msk.bf16.mxu1 %vm426_vm1, %v1460_v5  ;;  %1377 = vmatmul.mubr.msk.bf16.vlgmr.msra.gmra.mrb[0].mxu0 %vm426_vm1, %v1461_v6  ;;  %v1465_v10 = vld [vmem:[%s1671_s24 + $0x18] sm:$0xff]   ;;  %v1467_v12 = vld [vmem:[%s1671_s24 + $0x20] sm:$0xff]   ;;  %v1469_v14 = vld [vmem:[%s1671_s24 + $0x28] sm:$0xff]  }
  0x13   : > { %1409 = vmatmul.mubr.msk.bf16.vlgmr.msra.gmra.mrb[0].mxu1 %vm426_vm1, %v1462_v7  ;;  %1380 = vmatprep.mubr.msk.bf16.mxu0 %vm426_vm1, %v1463_v8  ;;  %v1466_v11 = vld [vmem:[%s1671_s24 + $0x98] sm:$0xff]   ;;  %v1468_v13 = vld [vmem:[%s1671_s24 + $0xa0] sm:$0xff]   ;;  %v1470_v15 = vld [vmem:[%s1671_s24 + $0xa8] sm:$0xff]  }
  0x14   : > { %1412 = vmatprep.mubr.msk.bf16.mxu1 %vm426_vm1, %v1464_v9  ;;  %v1471_v16 = vld [vmem:[%s1671_s24 + $0x30] sm:$0xff]   ;;  %v1473_v18 = vld [vmem:[%s1671_s24 + $0x38] sm:$0xff]   ;;  %v1475_v20 = vld [vmem:[%s1671_s24 + $0x40] sm:$0xff]  }
  0x15   : > { %v1472_v17 = vld [vmem:[%s1671_s24 + $0xb0] sm:$0xff]   ;;  %v1474_v19 = vld [vmem:[%s1671_s24 + $0xb8] sm:$0xff]   ;;  %v1476_v21 = vld [vmem:[%s1671_s24 + $0xc0] sm:$0xff]  }
  0x16   : > { %v1477_v22 = vld [vmem:[%s1671_s24 + $0x48] sm:$0xff]   ;;  %v1479_v24 = vld [vmem:[%s1671_s24 + $0x50] sm:$0xff]   ;;  %v1481_v26 = vld [vmem:[%s1671_s24 + $0x58] sm:$0xff]  }
  0x17   : > { %v1478_v23 = vld [vmem:[%s1671_s24 + $0xc8] sm:$0xff]   ;;  %v1480_v25 = vld [vmem:[%s1671_s24 + $0xd0] sm:$0xff]   ;;  %v1482_v27 = vld [vmem:[%s1671_s24 + $0xd8] sm:$0xff]  }
  0x18   : > { %v1483_v28 = vld [vmem:[%s1671_s24 + $0x60] sm:$0xff]   ;;  %v1485_v30 = vld [vmem:[%s1671_s24 + $0x68] sm:$0xff]   ;;  %v1487_v32 = vld [vmem:[%s1671_s24 + $0x70] sm:$0xff]  }
  0x19   : > { %v1484_v29 = vld [vmem:[%s1671_s24 + $0xe0] sm:$0xff]   ;;  %v1486_v31 = vld [vmem:[%s1671_s24 + $0xe8] sm:$0xff]   ;;  %v1488_v33 = vld [vmem:[%s1671_s24 + $0xf0] sm:$0xff]  }
  0x1a   : > { %1381 = vmatmul.mubr.msk.bf16.gmra.mrb[4].mxu0 %vm426_vm1, %v1465_v10  ;;  %v1489_v34 = vld [vmem:[%s1671_s24 + $0x78] sm:$0xff]  }
  0x1b   : > { %1413 = vmatmul.mubr.msk.bf16.gmra.mrb[4].mxu1 %vm426_vm1, %v1466_v11  ;;  %1384 = vmatprep.mubr.msk.bf16.mxu0 %vm426_vm1, %v1467_v12  ;;  %v1490_v35 = vld [vmem:[%s1671_s24 + $0xf8] sm:$0xff]  }
  0x1c   : > { %1416 = vmatprep.mubr.msk.bf16.mxu1 %vm426_vm1, %v1468_v13 }
  0x22   : > { %1385 = vmatmul.mubr.msk.bf16.gmra.mrb[8].mxu0 %vm426_vm1, %v1469_v14 }
  0x23   : > { %1417 = vmatmul.mubr.msk.bf16.gmra.mrb[8].mxu1 %vm426_vm1, %v1470_v15  ;;  %1388 = vmatprep.mubr.msk.bf16.mxu0 %vm426_vm1, %v1471_v16 }
  0x24   : > { %1420 = vmatprep.mubr.msk.bf16.mxu1 %vm426_vm1, %v1472_v17 }
  0x2a   : > { %1389 = vmatmul.mubr.msk.bf16.gmra.mrb[12].mxu0 %vm426_vm1, %v1473_v18 }
  0x2b   : > { %1421 = vmatmul.mubr.msk.bf16.gmra.mrb[12].mxu1 %vm426_vm1, %v1474_v19  ;;  %1392 = vmatprep.mubr.msk.bf16.mxu0 %vm426_vm1, %v1475_v20 }
  0x2c   : > { %1424 = vmatprep.mubr.msk.bf16.mxu1 %vm426_vm1, %v1476_v21 }
  0x32   : > { %1393 = vmatmul.mubr.msk.bf16.gmra.mrb[16].mxu0 %vm426_vm1, %v1477_v22 }
  0x33   : > { %1425 = vmatmul.mubr.msk.bf16.gmra.mrb[16].mxu1 %vm426_vm1, %v1478_v23  ;;  %1396 = vmatprep.mubr.msk.bf16.mxu0 %vm426_vm1, %v1479_v24 }
  0x34   : > { %1428 = vmatprep.mubr.msk.bf16.mxu1 %vm426_vm1, %v1480_v25 }
  0x3a   : > { %1397 = vmatmul.mubr.msk.bf16.gmra.mrb[20].mxu0 %vm426_vm1, %v1481_v26 }
  0x3b   : > { %1429 = vmatmul.mubr.msk.bf16.gmra.mrb[20].mxu1 %vm426_vm1, %v1482_v27  ;;  %1400 = vmatprep.mubr.msk.bf16.mxu0 %vm426_vm1, %v1483_v28 }
  0x3c   : > { %1432 = vmatprep.mubr.msk.bf16.mxu1 %vm426_vm1, %v1484_v29 }
  0x42   : > { %1401 = vmatmul.mubr.msk.bf16.gmra.mrb[24].mxu0 %vm426_vm1, %v1485_v30 }
  0x43   : > { %1433 = vmatmul.mubr.msk.bf16.gmra.mrb[24].mxu1 %vm426_vm1, %v1486_v31  ;;  %1404 = vmatprep.mubr.msk.bf16.mxu0 %vm426_vm1, %v1487_v32 }
  0x44   : > { %1436 = vmatprep.mubr.msk.bf16.mxu1 %vm426_vm1, %v1488_v33 }
  0x4a   : > { %1405 = vmatmul.mubr.msk.bf16.gmra.mrb[28].mxu0 %vm426_vm1, %v1489_v34 }
  0x4b   : > { %1437 = vmatmul.mubr.msk.bf16.gmra.mrb[28].mxu1 %vm426_vm1, %v1490_v35 }
  0xe5   : > { %v1378_v37 = vpop.f32.mrb[0].mxu0 }
  0xe6   : > { %v1410_v38 = vpop.f32.mrb[0].mxu1  ;;  %v570_v39 = vadd.f32 %v1378_v37, %v1740_v36  ;;  %v561_v41 = vpop.f32.mrb[1].mxu0 }
  0xe7   : > { %v698_v40 = vadd.f32 %v1410_v38, %v1740_v36  ;;  %v689_v42 = vpop.f32.mrb[1].mxu1  ;;  %v562_v43 = vadd.f32 %v1740_v36, %v561_v41  ;;  %v1379_v45 = vpop.f32.mrb[2].mxu0 }
  0xe8   : > { %v690_v44 = vadd.f32 %v1740_v36, %v689_v42  ;;  %v1411_v46 = vpop.f32.mrb[2].mxu1  ;;  %v882_v47 = vmul.f32 0.70710677, %v570_v39  ;;  %v573_v51 = vadd.f32 %v1379_v45, %v1740_v36  ;;  %v564_v53 = vpop.f32.mrb[3].mxu0  ;;  %v818_v9 = vmul.f32 0.5, %v570_v39 }
  0xe9   : > { %v914_v48 = vmul.f32 0.70710677, %v698_v40  ;;  %v880_v49 = vmul.f32 0.70710677, %v562_v43  ;;  %v701_v52 = vadd.f32 %v1411_v46, %v1740_v36  ;;  %v692_v54 = vpop.f32.mrb[3].mxu1  ;;  %v565_v55 = vadd.f32 %v1740_v36, %v564_v53 }
  0xea   : > { %v912_v50 = vmul.f32 0.70710677, %v690_v44  ;;  %1491 = verf.f32 %v882_v47  ;;  %v693_v56 = vadd.f32 %v1740_v36, %v692_v54  ;;  %v883_v57 = vmul.f32 0.70710677, %v573_v51 }
  0xeb   : > { %1493 = verf.f32 %v914_v48  ;;  %v915_v58 = vmul.f32 0.70710677, %v701_v52  ;;  %v881_v59 = vmul.f32 0.70710677, %v565_v55  ;;  %v850_v10 = vmul.f32 0.5, %v698_v40 }
  0xec   : > { %1495 = verf.f32 %v880_v49  ;;  %v913_v61 = vmul.f32 0.70710677, %v693_v56  ;;  %v816_v13 = vmul.f32 0.5, %v562_v43  ;;  %v848_v20 = vmul.f32 0.5, %v690_v44 }
  0xed   : > { %1497 = verf.f32 %v912_v50  ;;  %v1382_v60 = vpop.f32.mrb[4].mxu0  ;;  %v819_v21 = vmul.f32 0.5, %v573_v51  ;;  %v851_v22 = vmul.f32 0.5, %v701_v52  ;;  %v817_v31 = vmul.f32 0.5, %v565_v55 }
  0xee   : > { %1499 = verf.f32 %v883_v57  ;;  %v586_v62 = vadd.f32 %v1382_v60, %v1740_v36  ;;  %v1414_v63 = vpop.f32.mrb[4].mxu1  ;;  %v577_v0 = vpop.f32.mrb[5].mxu0  ;;  %v849_v32 = vmul.f32 0.5, %v693_v56 }
  0xef   : > { %1501 = verf.f32 %v915_v58  ;;  %v1752_v1 = vadd.f32 %v1414_v63, %v1740_v36  ;;  %v1755_v2 = vadd.f32 %v1740_v36, %v577_v0  ;;  %v705_v3 = vpop.f32.mrb[5].mxu1  ;;  %v1383_v4 = vpop.f32.mrb[6].mxu0 }
  0xf0   : > { %1503 = verf.f32 %v881_v59  ;;  %v886_v5 = vmul.f32 0.70710677, %v586_v62  ;;  %v1758_v6 = vadd.f32 %v1740_v36, %v705_v3  ;;  %v1415_v7 = vpop.f32.mrb[6].mxu1  ;;  %v580_v8 = vpop.f32.mrb[7].mxu0  ;;  %v1765_v16 = vadd.f32 %v1383_v4, %v1740_v36 }
  0xf1   : > { %1505 = verf.f32 %v913_v61  ;;  %v918_v11 = vmul.f32 0.70710677, %v1752_v1  ;;  %v708_v12 = vpop.f32.mrb[7].mxu1  ;;  %v884_v14 = vmul.f32 0.70710677, %v1755_v2  ;;  %v1768_v17 = vadd.f32 %v1415_v7, %v1740_v36 }
  0xf2   : > { %1507 = verf.f32 %v886_v5  ;;  %v916_v15 = vmul.f32 0.70710677, %v1758_v6  ;;  %v1771_v18 = vadd.f32 %v1740_v36, %v580_v8  ;;  %v887_v25 = vmul.f32 0.70710677, %v1765_v16 }
  0xf3   : > { %1509 = verf.f32 %v918_v11  ;;  %v1775_v26 = vadd.f32 %v1740_v36, %v708_v12  ;;  %v919_v33 = vmul.f32 0.70710677, %v1768_v17  ;;  %v822_v45 = vmul.f32 0.5, %v586_v62 }
  0xf4   : > { %v1492_v19 = vpop.eup %1491  ;;  %1511 = verf.f32 %v884_v14  ;;  %v885_v39 = vmul.f32 0.70710677, %v1771_v18  ;;  %v854_v3 = vmul.f32 0.5, %v1752_v1 }
  0xf5   : > { %v1494_v23 = vpop.eup %1493  ;;  %v1010_v24 = vadd.f32 1.0, %v1492_v19  ;;  %1513 = verf.f32 %v916_v15  ;;  %v1386_v27 = vpop.f32.mrb[8].mxu0  ;;  %v917_v51 = vmul.f32 0.70710677, %v1775_v26  ;;  %v852_v15 = vmul.f32 0.5, %v1758_v6 }
  0xf6   : > { %v1418_v28 = vpop.f32.mrb[8].mxu1  ;;  %v1496_v29 = vpop.eup %1495  ;;  %v1042_v30 = vadd.f32 1.0, %v1494_v23  ;;  %1515 = verf.f32 %v887_v25  ;;  %v1790_v56 = vadd.f32 %v1386_v27, %v1740_v36 }
  0xf7   : > { %v593_v34 = vpop.f32.mrb[9].mxu0  ;;  %v1498_v35 = vpop.eup %1497  ;;  %v1074_v37 = vmul.f32 %v1010_v24, %v818_v9  ;;  %v1008_v38 = vadd.f32 1.0, %v1496_v29  ;;  %1517 = verf.f32 %v919_v33  ;;  %v1793_v57 = vadd.f32 %v1418_v28, %v1740_v36 }
  0xf8   : > { %v721_v40 = vpop.f32.mrb[9].mxu1  ;;  %v1387_v41 = vpop.f32.mrb[10].mxu0  ;;  %v1106_v43 = vmul.f32 %v1042_v30, %v850_v10  ;;  %v1040_v44 = vadd.f32 1.0, %v1498_v35  ;;  %1519 = verf.f32 %v885_v39  ;;  %v1797_v61 = vadd.f32 %v1740_v36, %v593_v34 }
  0xf9   : > { %v1500_v42 = vpop.eup %1499  ;;  %v1419_v46 = vpop.f32.mrb[10].mxu1  ;;  %1138 = vst [vmem:[%s1780_s30 + $0x10] sm:$0xff] %v1074_v37  ;;  %v1072_v49 = vmul.f32 %v1008_v38, %v816_v13  ;;  %1521 = verf.f32 %v917_v51  ;;  %v890_v4 = vmul.f32 0.70710677, %v1790_v56  ;;  %v820_v9 = vmul.f32 0.5, %v1755_v2 }
  0xfa   : > { %v596_v47 = vpop.f32.mrb[11].mxu0  ;;  %v1502_v48 = vpop.eup %1501  ;;  %v1011_v50 = vadd.f32 1.0, %v1500_v42  ;;  %1170 = vst [vmem:[%s1780_s30 + $0x110] sm:$0xff] %v1106_v43  ;;  %v1104_v54 = vmul.f32 %v1040_v44, %v848_v20  ;;  %v922_v10 = vmul.f32 0.70710677, %v1793_v57  ;;  %v1821_v28 = vadd.f32 %v1740_v36, %v721_v40 }
  0xfb   : > { %v1786_v52 = vpop.f32.mrb[11].mxu1  ;;  %v1504_v53 = vpop.eup %1503  ;;  %v1043_v55 = vadd.f32 1.0, %v1502_v48  ;;  %1136 = vst [vmem:[%s1780_s30] sm:$0xff] %v1072_v49  ;;  %1523 = verf.f32 %v890_v4  ;;  %v888_v23 = vmul.f32 0.70710677, %v1797_v61  ;;  %v1824_v29 = vadd.f32 %v1387_v41, %v1740_v36 }
  0xfc   : > { %v1506_v58 = vpop.eup %1505  ;;  %v1075_v59 = vmul.f32 %v1011_v50, %v819_v21  ;;  %v1009_v60 = vadd.f32 1.0, %v1504_v53  ;;  %1168 = vst [vmem:[%s1780_s30 + $0x100] sm:$0xff] %v1104_v54  ;;  %1525 = verf.f32 %v922_v10  ;;  %v1832_v34 = vadd.f32 %v1419_v46, %v1740_v36 }
  0xfd   : > { %v1508_v62 = vpop.eup %1507  ;;  %v1107_v63 = vmul.f32 %v1043_v55, %v851_v22  ;;  %v1041_v0 = vadd.f32 1.0, %v1506_v58  ;;  %v1805_v11 = vpop.f32.mrb[12].mxu0  ;;  %1527 = verf.f32 %v888_v23  ;;  %v1835_v35 = vadd.f32 %v1740_v36, %v596_v47 }
  0xfe   : > { %v1510_v5 = vpop.eup %1509  ;;  %1139 = vst [vmem:[%s1780_s30 + $0x18] sm:$0xff] %v1075_v59  ;;  %v1073_v7 = vmul.f32 %v1009_v60, %v817_v31  ;;  %v1014_v8 = vadd.f32 1.0, %v1508_v62  ;;  %v1807_v12 = vpop.f32.mrb[12].mxu1  ;;  %v823_v39 = vmul.f32 0.5, %v1765_v16  ;;  %v920_v41 = vmul.f32 0.70710677, %v1821_v28 }
  0xff   : > { %v1512_v13 = vpop.eup %1511  ;;  %1171 = vst [vmem:[%s1780_s30 + $0x118] sm:$0xff] %v1107_v63  ;;  %v1105_v14 = vmul.f32 %v1041_v0, %v849_v32  ;;  %v1046_v1 = vadd.f32 1.0, %v1510_v5  ;;  %v609_v19 = vpop.f32.mrb[13].mxu0  ;;  %v855_v43 = vmul.f32 0.5, %v1768_v17  ;;  %v891_v46 = vmul.f32 0.70710677, %v1824_v29 }
 0x100   : > { %v1811_v20 = vpop.f32.mrb[13].mxu1  ;;  %v1514_v21 = vpop.eup %1513  ;;  %1137 = vst [vmem:[%s1780_s30 + $0x8] sm:$0xff] %v1073_v7  ;;  %v1078_v2 = vmul.f32 %v1014_v8, %v822_v45  ;;  %v1012_v22 = vadd.f32 1.0, %v1512_v13  ;;  %v821_v45 = vmul.f32 0.5, %v1771_v18  ;;  %1529 = verf.f32 %v920_v41 }
 0x101   : > { %v1815_v24 = vpop.f32.mrb[14].mxu0  ;;  %v1817_v25 = vpop.f32.mrb[14].mxu1  ;;  %1169 = vst [vmem:[%s1780_s30 + $0x108] sm:$0xff] %v1105_v14  ;;  %v1110_v27 = vmul.f32 %v1046_v1, %v854_v3  ;;  %v1044_v6 = vadd.f32 1.0, %v1514_v21  ;;  %v923_v16 = vmul.f32 0.70710677, %v1832_v34  ;;  %1531 = verf.f32 %v891_v46 }
 0x102   : > { %v1826_v30 = vpop.f32.mrb[15].mxu0  ;;  %v1828_v31 = vpop.f32.mrb[15].mxu1  ;;  %1142 = vst [vmem:[%s1780_s30 + $0x30] sm:$0xff] %v1078_v2  ;;  %v1076_v33 = vmul.f32 %v1012_v22, %v820_v9  ;;  %v853_v51 = vmul.f32 0.5, %v1775_v26  ;;  %v889_v17 = vmul.f32 0.70710677, %v1835_v35  ;;  %v1853_v58 = vadd.f32 %v1740_v36, %v1786_v52 }
 0x103   : > { %v1516_v32 = vpop.eup %1515  ;;  %1174 = vst [vmem:[%s1780_s30 + $0x130] sm:$0xff] %v1110_v27  ;;  %v1108_v38 = vmul.f32 %v1044_v6, %v852_v15  ;;  %1533 = verf.f32 %v923_v16  ;;  %v1862_v26 = vadd.f32 %v1805_v11, %v1740_v36  ;;  %v1866_v62 = vadd.f32 %v1807_v12, %v1740_v36 }
 0x104   : > { %v1518_v37 = vpop.eup %1517  ;;  %v1015_v40 = vadd.f32 1.0, %v1516_v32  ;;  %1140 = vst [vmem:[%s1780_s30 + $0x20] sm:$0xff] %v1076_v33  ;;  %1535 = verf.f32 %v889_v17  ;;  %v1869_v63 = vadd.f32 %v1740_v36, %v609_v19  ;;  %v921_v5 = vmul.f32 0.70710677, %v1853_v58 }
 0x105   : > { %v1520_v42 = vpop.eup %1519  ;;  %v1047_v44 = vadd.f32 1.0, %v1518_v37  ;;  %1172 = vst [vmem:[%s1780_s30 + $0x120] sm:$0xff] %v1108_v38  ;;  %v1394_v53 = vpop.f32.mrb[16].mxu0  ;;  %v1879_v7 = vadd.f32 %v1740_v36, %v1811_v20  ;;  %v826_v11 = vmul.f32 0.5, %v1790_v56  ;;  %v858_v13 = vmul.f32 0.5, %v1793_v57 }
 0x106   : > { %v1079_v47 = vmul.f32 %v1015_v40, %v823_v39  ;;  %v1013_v48 = vadd.f32 1.0, %v1520_v42  ;;  %v1522_v49 = vpop.eup %1521  ;;  %v1848_v54 = vpop.f32.mrb[16].mxu1  ;;  %v894_v14 = vmul.f32 0.70710677, %v1862_v26  ;;  %v824_v15 = vmul.f32 0.5, %v1797_v61 }
 0x107   : > { %v1111_v50 = vmul.f32 %v1047_v44, %v855_v43  ;;  %v1045_v55 = vadd.f32 1.0, %v1522_v49  ;;  %v1855_v59 = vpop.f32.mrb[17].mxu0  ;;  %v1857_v60 = vpop.f32.mrb[17].mxu1  ;;  %1537 = verf.f32 %v921_v5  ;;  %v926_v19 = vmul.f32 0.70710677, %v1866_v62 }
 0x108   : > { %1143 = vst [vmem:[%s1780_s30 + $0x38] sm:$0xff] %v1079_v47  ;;  %v1077_v18 = vmul.f32 %v1013_v48, %v821_v45  ;;  %v1871_v52 = vpop.f32.mrb[18].mxu0  ;;  %v1873_v0 = vpop.f32.mrb[18].mxu1  ;;  %v856_v2 = vmul.f32 0.5, %v1821_v28  ;;  %1539 = verf.f32 %v894_v14  ;;  %v892_v56 = vmul.f32 0.70710677, %v1869_v63 }
 0x109   : > { %1175 = vst [vmem:[%s1780_s30 + $0x138] sm:$0xff] %v1111_v50  ;;  %v1524_v3 = vpop.eup %1523  ;;  %v1109_v4 = vmul.f32 %v1045_v55, %v853_v51  ;;  %v1881_v8 = vpop.f32.mrb[19].mxu0  ;;  %1541 = verf.f32 %v926_v19  ;;  %v924_v23 = vmul.f32 0.70710677, %v1879_v7  ;;  %v1897_v61 = vadd.f32 %v1815_v24, %v1740_v36 }
 0x10a   : > { %1141 = vst [vmem:[%s1780_s30 + $0x28] sm:$0xff] %v1077_v18  ;;  %v1883_v9 = vpop.f32.mrb[19].mxu1  ;;  %v1526_v10 = vpop.eup %1525  ;;  %v1018_v12 = vadd.f32 1.0, %v1524_v3  ;;  %1543 = verf.f32 %v892_v56  ;;  %v1901_v27 = vadd.f32 %v1817_v25, %v1740_v36  ;;  %v1905_v6 = vadd.f32 %v1740_v36, %v1826_v30 }
 0x10b   : > { %1173 = vst [vmem:[%s1780_s30 + $0x128] sm:$0xff] %v1109_v4  ;;  %v1050_v1 = vadd.f32 1.0, %v1526_v10  ;;  %v1528_v20 = vpop.eup %1527  ;;  %v827_v38 = vmul.f32 0.5, %v1824_v29  ;;  %1545 = verf.f32 %v924_v23  ;;  %v1915_v24 = vadd.f32 %v1740_v36, %v1828_v31 }
 0x10c   : > { %v1082_v21 = vmul.f32 %v1018_v12, %v826_v11  ;;  %v1016_v57 = vadd.f32 1.0, %v1528_v20  ;;  %v1530_v33 = vpop.eup %1529  ;;  %v859_v41 = vmul.f32 0.5, %v1832_v34  ;;  %v895_v42 = vmul.f32 0.70710677, %v1897_v61 }
 0x10d   : > { %v1114_v22 = vmul.f32 %v1050_v1, %v858_v13  ;;  %v1907_v28 = vpop.f32.mrb[20].mxu0  ;;  %v1532_v30 = vpop.eup %1531  ;;  %v1048_v40 = vadd.f32 1.0, %v1530_v33  ;;  %v1924_v43 = vadd.f32 %v1394_v53, %v1740_v36  ;;  %v825_v31 = vmul.f32 0.5, %v1835_v35 }
 0x10e   : > { %1146 = vst [vmem:[%s1780_s30 + $0x50] sm:$0xff] %v1082_v21  ;;  %v1909_v32 = vpop.f32.mrb[20].mxu1  ;;  %v1080_v37 = vmul.f32 %v1016_v57, %v824_v15  ;;  %v1917_v25 = vpop.f32.mrb[21].mxu0  ;;  %v1019_v45 = vadd.f32 1.0, %v1532_v30  ;;  %v927_v46 = vmul.f32 0.70710677, %v1901_v27  ;;  %1547 = verf.f32 %v895_v42 }
 0x10f   : > { %1178 = vst [vmem:[%s1780_s30 + $0x150] sm:$0xff] %v1114_v22  ;;  %v1919_v39 = vpop.f32.mrb[21].mxu1  ;;  %v1926_v44 = vpop.f32.mrb[22].mxu0  ;;  %v893_v47 = vmul.f32 0.70710677, %v1905_v6  ;;  %v1112_v16 = vmul.f32 %v1048_v40, %v856_v2  ;;  %v857_v49 = vmul.f32 0.5, %v1853_v58  ;;  %v1946_v10 = vadd.f32 %v1848_v54, %v1740_v36 }
 0x110   : > { %v1534_v29 = vpop.eup %1533  ;;  %1144 = vst [vmem:[%s1780_s30 + $0x40] sm:$0xff] %v1080_v37  ;;  %v1933_v50 = vpop.f32.mrb[22].mxu1  ;;  %v1083_v17 = vmul.f32 %v1019_v45, %v827_v38  ;;  %1549 = verf.f32 %v927_v46  ;;  %v925_v35 = vmul.f32 0.70710677, %v1915_v24  ;;  %v830_v3 = vmul.f32 0.5, %v1862_v26 }
 0x111   : > { %v1536_v48 = vpop.eup %1535  ;;  %v1051_v34 = vadd.f32 1.0, %v1534_v29  ;;  %v1935_v51 = vpop.f32.mrb[23].mxu0  ;;  %1176 = vst [vmem:[%s1780_s30 + $0x140] sm:$0xff] %v1112_v16  ;;  %1551 = verf.f32 %v893_v47  ;;  %v898_v58 = vmul.f32 0.70710677, %v1924_v43  ;;  %v1950_v11 = vadd.f32 %v1740_v36, %v1855_v59 }
 0x112   : > { %v1017_v53 = vadd.f32 1.0, %v1536_v48  ;;  %v1938_v18 = vpop.f32.mrb[23].mxu1  ;;  %v1538_v4 = vpop.eup %1537  ;;  %1147 = vst [vmem:[%s1780_s30 + $0x58] sm:$0xff] %v1083_v17  ;;  %1553 = verf.f32 %v925_v35  ;;  %v862_v26 = vmul.f32 0.5, %v1866_v62  ;;  %v1956_v14 = vadd.f32 %v1740_v36, %v1857_v60 }
 0x113   : > { %v1115_v55 = vmul.f32 %v1051_v34, %v859_v41  ;;  %v1540_v12 = vpop.eup %1539  ;;  %v1049_v13 = vadd.f32 1.0, %v1538_v4  ;;  %1555 = verf.f32 %v898_v58  ;;  %v828_v59 = vmul.f32 0.5, %v1869_v63 }
 0x114   : > { %v1081_v5 = vmul.f32 %v1017_v53, %v825_v31  ;;  %v1542_v54 = vpop.eup %1541  ;;  %v1022_v19 = vadd.f32 1.0, %v1540_v12  ;;  %v930_v20 = vmul.f32 0.70710677, %v1946_v10  ;;  %v1967_v21 = vadd.f32 %v1871_v52, %v1740_v36 }
 0x115   : > { %1179 = vst [vmem:[%s1780_s30 + $0x158] sm:$0xff] %v1115_v55  ;;  %v1958_v1 = vpop.f32.mrb[24].mxu0  ;;  %v1544_v60 = vpop.eup %1543  ;;  %v1113_v2 = vmul.f32 %v1049_v13, %v857_v49  ;;  %v1054_v56 = vadd.f32 1.0, %v1542_v54  ;;  %v860_v22 = vmul.f32 0.5, %v1879_v7  ;;  %v896_v57 = vmul.f32 0.70710677, %v1950_v11 }
 0x116   : > { %v1960_v15 = vpop.f32.mrb[24].mxu1  ;;  %1145 = vst [vmem:[%s1780_s30 + $0x48] sm:$0xff] %v1081_v5  ;;  %v1969_v62 = vpop.f32.mrb[25].mxu0  ;;  %v1086_v37 = vmul.f32 %v1022_v19, %v830_v3  ;;  %v1020_v38 = vadd.f32 1.0, %v1544_v60  ;;  %1557 = verf.f32 %v930_v20  ;;  %v928_v52 = vmul.f32 0.70710677, %v1956_v14 }
 0x117   : > { %v1973_v23 = vpop.f32.mrb[25].mxu1  ;;  %v1975_v63 = vpop.f32.mrb[26].mxu0  ;;  %1177 = vst [vmem:[%s1780_s30 + $0x148] sm:$0xff] %v1113_v2  ;;  %v1118_v7 = vmul.f32 %v1054_v56, %v862_v26  ;;  %v831_v42 = vmul.f32 0.5, %v1897_v61  ;;  %1559 = verf.f32 %v896_v57  ;;  %v899_v31 = vmul.f32 0.70710677, %v1967_v21 }
 0x118   : > { %v1546_v33 = vpop.eup %1545  ;;  %v1978_v30 = vpop.f32.mrb[26].mxu1  ;;  %1150 = vst [vmem:[%s1780_s30 + $0x70] sm:$0xff] %v1086_v37  ;;  %v1084_v45 = vmul.f32 %v1020_v38, %v828_v59  ;;  %1561 = verf.f32 %v928_v52  ;;  %v1990_v46 = vadd.f32 %v1873_v0, %v1740_v36  ;;  %v863_v16 = vmul.f32 0.5, %v1901_v27 }
 0x119   : > { %v1980_v40 = vpop.f32.mrb[27].mxu0  ;;  %v1052_v41 = vadd.f32 1.0, %v1546_v33  ;;  %v1984_v29 = vpop.f32.mrb[27].mxu1  ;;  %1182 = vst [vmem:[%s1780_s30 + $0x170] sm:$0xff] %v1118_v7  ;;  %v1996_v61 = vadd.f32 %v1740_v36, %v1881_v8  ;;  %v2000_v34 = vadd.f32 %v1740_v36, %v1883_v9  ;;  %1563 = verf.f32 %v899_v31 }
 0x11a   : > { %v1548_v47 = vpop.eup %1547  ;;  %1148 = vst [vmem:[%s1780_s30 + $0x60] sm:$0xff] %v1084_v45  ;;  %v931_v0 = vmul.f32 0.70710677, %v1990_v46  ;;  %v2006_v53 = vadd.f32 %v1907_v28, %v1740_v36  ;;  %v829_v8 = vmul.f32 0.5, %v1905_v6  ;;  %v861_v55 = vmul.f32 0.5, %v1915_v24 }
 0x11b   : > { %v1116_v48 = vmul.f32 %v1052_v41, %v860_v22  ;;  %v1550_v49 = vpop.eup %1549  ;;  %v1023_v17 = vadd.f32 1.0, %v1548_v47  ;;  %v897_v9 = vmul.f32 0.70710677, %v1996_v61  ;;  %v929_v12 = vmul.f32 0.70710677, %v2000_v34 }
 0x11c   : > { %v1552_v35 = vpop.eup %1551  ;;  %v1055_v27 = vadd.f32 1.0, %v1550_v49  ;;  %1565 = verf.f32 %v931_v0  ;;  %v834_v24 = vmul.f32 0.5, %v1924_v43  ;;  %v902_v2 = vmul.f32 0.70710677, %v2006_v53 }
 0x11d   : > { %1180 = vst [vmem:[%s1780_s30 + $0x160] sm:$0xff] %v1116_v48  ;;  %v2012_v3 = vpop.f32.mrb[28].mxu0  ;;  %v1554_v58 = vpop.eup %1553  ;;  %v1087_v4 = vmul.f32 %v1023_v17, %v831_v42  ;;  %v1021_v5 = vadd.f32 1.0, %v1552_v35  ;;  %1567 = verf.f32 %v897_v9  ;;  %v2033_v43 = vadd.f32 %v1909_v32, %v1740_v36 }
 0x11e   : > { %v2015_v28 = vpop.f32.mrb[28].mxu1  ;;  %v2017_v13 = vpop.f32.mrb[29].mxu0  ;;  %v1119_v6 = vmul.f32 %v1055_v27, %v863_v16  ;;  %v1053_v54 = vadd.f32 1.0, %v1554_v58  ;;  %1569 = verf.f32 %v929_v12  ;;  %v2037_v33 = vadd.f32 %v1740_v36, %v1917_v25 }
 0x11f   : > { %v1556_v26 = vpop.eup %1555  ;;  %v2020_v19 = vpop.f32.mrb[29].mxu1  ;;  %1151 = vst [vmem:[%s1780_s30 + $0x78] sm:$0xff] %v1087_v4  ;;  %v1085_v20 = vmul.f32 %v1021_v5, %v829_v8  ;;  %v2041_v37 = vadd.f32 %v1740_v36, %v1919_v39  ;;  %v866_v41 = vmul.f32 0.5, %v1946_v10  ;;  %1571 = verf.f32 %v902_v2 }
 0x120   : > { %v2022_v59 = vpop.f32.mrb[30].mxu0  ;;  %v1026_v60 = vadd.f32 1.0, %v1556_v26  ;;  %v2026_v56 = vpop.f32.mrb[30].mxu1  ;;  %1183 = vst [vmem:[%s1780_s30 + $0x178] sm:$0xff] %v1119_v6  ;;  %v1117_v57 = vmul.f32 %v1053_v54, %v861_v55  ;;  %v2049_v32 = vadd.f32 %v1926_v44, %v1740_v36  ;;  %v832_v45 = vmul.f32 0.5, %v1950_v11 }
 0x121   : > { %v2028_v22 = vpop.f32.mrb[31].mxu0  ;;  %v2043_v38 = vpop.f32.mrb[31].mxu1  ;;  %1149 = vst [vmem:[%s1780_s30 + $0x68] sm:$0xff] %v1085_v20  ;;  %v934_v39 = vmul.f32 0.70710677, %v2033_v43  ;;  %v2056_v31 = vadd.f32 %v1933_v50, %v1740_v36  ;;  %v864_v48 = vmul.f32 0.5, %v1956_v14  ;;  %v2078_v58 = vadd.f32 %v1958_v1, %v1740_v36 }
 0x122   : > { %v1558_v52 = vpop.eup %1557  ;;  %v1090_v7 = vmul.f32 %v1026_v60, %v834_v24  ;;  %1181 = vst [vmem:[%s1780_s30 + $0x168] sm:$0xff] %v1117_v57  ;;  %v900_v44 = vmul.f32 0.70710677, %v2037_v33  ;;  %v932_v16 = vmul.f32 0.70710677, %v2041_v37  ;;  %v835_v11 = vmul.f32 0.5, %v1967_v21 }
 0x123   : > { %v1560_v42 = vpop.eup %1559  ;;  %v1058_v25 = vadd.f32 1.0, %v1558_v52  ;;  %1573 = verf.f32 %v934_v39  ;;  %v867_v50 = vmul.f32 0.5, %v1990_v46  ;;  %v903_v27 = vmul.f32 0.70710677, %v2049_v32 }
 0x124   : > { %v1562_v47 = vpop.eup %1561  ;;  %1154 = vst [vmem:[%s1780_s30 + $0x90] sm:$0xff] %v1090_v7  ;;  %v1024_v10 = vadd.f32 1.0, %v1560_v42  ;;  %1575 = verf.f32 %v900_v44  ;;  %v935_v55 = vmul.f32 0.70710677, %v2056_v31  ;;  %v2070_v21 = vadd.f32 %v1740_v36, %v1935_v51 }
 0x125   : > { %v1122_v49 = vmul.f32 %v1058_v25, %v866_v41  ;;  %v1056_v17 = vadd.f32 1.0, %v1562_v47  ;;  %v1564_v0 = vpop.eup %1563  ;;  %1577 = verf.f32 %v932_v16  ;;  %v2074_v46 = vadd.f32 %v1740_v36, %v1938_v18 }
 0x126   : > { %v1088_v35 = vmul.f32 %v1024_v10, %v832_v45  ;;  %v1027_v8 = vadd.f32 1.0, %v1564_v0  ;;  %v1566_v9 = vpop.eup %1565  ;;  %1579 = verf.f32 %v903_v27  ;;  %v2083_v26 = vadd.f32 %v1960_v15, %v1740_v36 }
 0x127   : > { %1186 = vst [vmem:[%s1780_s30 + $0x190] sm:$0xff] %v1122_v49  ;;  %v1120_v14 = vmul.f32 %v1056_v17, %v864_v48  ;;  %v1568_v4 = vpop.eup %1567  ;;  %v1059_v12 = vadd.f32 1.0, %v1566_v9  ;;  %1581 = verf.f32 %v935_v55  ;;  %v833_v6 = vmul.f32 0.5, %v1996_v61 }
 0x128   : > { %1152 = vst [vmem:[%s1780_s30 + $0x80] sm:$0xff] %v1088_v35  ;;  %v1091_v5 = vmul.f32 %v1027_v8, %v835_v11  ;;  %v1570_v51 = vpop.eup %1569  ;;  %v1025_v54 = vadd.f32 1.0, %v1568_v4  ;;  %v901_v18 = vmul.f32 0.70710677, %v2070_v21  ;;  %v865_v24 = vmul.f32 0.5, %v2000_v34 }
 0x129   : > { %1184 = vst [vmem:[%s1780_s30 + $0x180] sm:$0xff] %v1120_v14  ;;  %v1123_v1 = vmul.f32 %v1059_v12, %v867_v50  ;;  %v1057_v20 = vadd.f32 1.0, %v1570_v51  ;;  %v933_v60 = vmul.f32 0.70710677, %v2074_v46  ;;  %v1572_v2 = vpop.eup %1571  ;;  %v838_v15 = vmul.f32 0.5, %v2006_v53 }
 0x12a   : > { %1155 = vst [vmem:[%s1780_s30 + $0x98] sm:$0xff] %v1091_v5  ;;  %v1089_v57 = vmul.f32 %v1025_v54, %v833_v6  ;;  %1583 = verf.f32 %v901_v18  ;;  %v906_v52 = vmul.f32 0.70710677, %v2078_v58  ;;  %v1030_v7 = vadd.f32 1.0, %v1572_v2 }
 0x12b   : > { %1187 = vst [vmem:[%s1780_s30 + $0x198] sm:$0xff] %v1123_v1  ;;  %v1121_v61 = vmul.f32 %v1057_v20, %v865_v24  ;;  %1585 = verf.f32 %v933_v60  ;;  %v938_v41 = vmul.f32 0.70710677, %v2083_v26  ;;  %v2097_v34 = vadd.f32 %v1740_v36, %v1969_v62 }
 0x12c   : > { %1153 = vst [vmem:[%s1780_s30 + $0x88] sm:$0xff] %v1089_v57  ;;  %1587 = verf.f32 %v906_v52  ;;  %v2101_v42 = vadd.f32 %v1740_v36, %v1973_v23  ;;  %v2105_v53 = vadd.f32 %v1975_v63, %v1740_v36  ;;  %v1094_v45 = vmul.f32 %v1030_v7, %v838_v15 }
 0x12d   : > { %v1574_v25 = vpop.eup %1573  ;;  %1185 = vst [vmem:[%s1780_s30 + $0x188] sm:$0xff] %v1121_v61  ;;  %v870_v39 = vmul.f32 0.5, %v2033_v43  ;;  %1589 = verf.f32 %v938_v41  ;;  %v2111_v47 = vadd.f32 %v1978_v30, %v1740_v36  ;;  %v836_v48 = vmul.f32 0.5, %v2037_v33 }
 0x12e   : > { %v1576_v62 = vpop.eup %1575  ;;  %v1062_v10 = vadd.f32 1.0, %v1574_v25  ;;  %v868_v23 = vmul.f32 0.5, %v2041_v37  ;;  %v904_v44 = vmul.f32 0.70710677, %v2097_v34  ;;  %1158 = vst [vmem:[%s1780_s30 + $0xb0] sm:$0xff] %v1094_v45  ;;  %v2121_v30 = vadd.f32 %v1740_v36, %v1980_v40 }
 0x12f   : > { %v1578_v63 = vpop.eup %1577  ;;  %v1028_v16 = vadd.f32 1.0, %v1576_v62  ;;  %v936_v49 = vmul.f32 0.70710677, %v2101_v42  ;;  %v907_v43 = vmul.f32 0.70710677, %v2105_v53  ;;  %v839_v37 = vmul.f32 0.5, %v2049_v32 }
 0x130   : > { %v1580_v17 = vpop.eup %1579  ;;  %v1126_v11 = vmul.f32 %v1062_v10, %v870_v39  ;;  %v1060_v33 = vadd.f32 1.0, %v1578_v63  ;;  %1591 = verf.f32 %v904_v44  ;;  %v939_v27 = vmul.f32 0.70710677, %v2111_v47 }
 0x131   : > { %v1582_v0 = vpop.eup %1581  ;;  %v1092_v35 = vmul.f32 %v1028_v16, %v836_v48  ;;  %v1031_v50 = vadd.f32 1.0, %v1580_v17  ;;  %1593 = verf.f32 %v936_v49  ;;  %v871_v40 = vmul.f32 0.5, %v2056_v31 }
 0x132   : > { %1190 = vst [vmem:[%s1780_s30 + $0x1b0] sm:$0xff] %v1126_v11  ;;  %v1124_v14 = vmul.f32 %v1060_v33, %v868_v23  ;;  %v1063_v8 = vadd.f32 1.0, %v1582_v0  ;;  %1595 = verf.f32 %v907_v43  ;;  %v905_v32 = vmul.f32 0.70710677, %v2121_v30  ;;  %v1619_v11 = vld [vmem:[%s2216_s2] ss:$0 sm:$0xff] }
 0x133   : > { %1156 = vst [vmem:[%s1780_s30 + $0xa0] sm:$0xff] %v1092_v35  ;;  %v1095_v55 = vmul.f32 %v1031_v50, %v839_v37  ;;  %1597 = verf.f32 %v939_v27  ;;  %v2131_v9 = vadd.f32 %v1740_v36, %v1984_v29  ;;  %v837_v12 = vmul.f32 0.5, %v2070_v21 }
 0x134   : > { %v1584_v4 = vpop.eup %1583  ;;  %1188 = vst [vmem:[%s1780_s30 + $0x1a0] sm:$0xff] %v1124_v14  ;;  %v1127_v5 = vmul.f32 %v1063_v8, %v871_v40  ;;  %v2137_v31 = vadd.f32 %v2012_v3, %v1740_v36  ;;  %v2141_v51 = vadd.f32 %v2015_v28, %v1740_v36  ;;  %1599 = verf.f32 %v905_v32 }
 0x135   : > { %v1586_v6 = vpop.eup %1585  ;;  %1159 = vst [vmem:[%s1780_s30 + $0xb8] sm:$0xff] %v1095_v55  ;;  %v1029_v54 = vadd.f32 1.0, %v1584_v4  ;;  %v937_v29 = vmul.f32 0.70710677, %v2131_v9  ;;  %v2147_v18 = vadd.f32 %v1740_v36, %v2017_v13  ;;  %v869_v3 = vmul.f32 0.5, %v2074_v46 }
 0x136   : > { %v1588_v21 = vpop.eup %1587  ;;  %1191 = vst [vmem:[%s1780_s30 + $0x1b8] sm:$0xff] %v1127_v5  ;;  %v1061_v1 = vadd.f32 1.0, %v1586_v6  ;;  %v842_v24 = vmul.f32 0.5, %v2078_v58  ;;  %v910_v28 = vmul.f32 0.70710677, %v2137_v31  ;;  %v874_v13 = vmul.f32 0.5, %v2083_v26 }
 0x137   : > { %v1590_v20 = vpop.eup %1589  ;;  %v1093_v60 = vmul.f32 %v1029_v54, %v837_v12  ;;  %v1034_v2 = vadd.f32 1.0, %v1588_v21  ;;  %1601 = verf.f32 %v937_v29  ;;  %v942_v57 = vmul.f32 0.70710677, %v2141_v51 }
 0x138   : > { %v1125_v15 = vmul.f32 %v1061_v1, %v869_v3  ;;  %v1066_v52 = vadd.f32 1.0, %v1590_v20  ;;  %1603 = verf.f32 %v910_v28  ;;  %v908_v58 = vmul.f32 0.70710677, %v2147_v18 }
 0x139   : > { %1157 = vst [vmem:[%s1780_s30 + $0xa8] sm:$0xff] %v1093_v60  ;;  %v1098_v46 = vmul.f32 %v1034_v2, %v842_v24  ;;  %1605 = verf.f32 %v942_v57  ;;  %v2159_v61 = vadd.f32 %v1740_v36, %v2020_v19  ;;  %v840_v25 = vmul.f32 0.5, %v2097_v34 }
 0x13a   : > { %v1592_v7 = vpop.eup %1591  ;;  %1189 = vst [vmem:[%s1780_s30 + $0x1a8] sm:$0xff] %v1125_v15  ;;  %v1130_v41 = vmul.f32 %v1066_v52, %v874_v13  ;;  %v2165_v26 = vadd.f32 %v2022_v59, %v1740_v36  ;;  %v2169_v45 = vadd.f32 %v2026_v56, %v1740_v36  ;;  %1607 = verf.f32 %v908_v58 }
 0x13b   : > { %v1594_v39 = vpop.eup %1593  ;;  %1162 = vst [vmem:[%s1780_s30 + $0xd0] sm:$0xff] %v1098_v46  ;;  %v1032_v62 = vadd.f32 1.0, %v1592_v7  ;;  %v940_v19 = vmul.f32 0.70710677, %v2159_v61  ;;  %v2175_v10 = vadd.f32 %v1740_v36, %v2028_v22  ;;  %v872_v59 = vmul.f32 0.5, %v2101_v42 }
 0x13c   : > { %v1596_v48 = vpop.eup %1595  ;;  %1194 = vst [vmem:[%s1780_s30 + $0x1d0] sm:$0xff] %v1130_v41  ;;  %v1064_v34 = vadd.f32 1.0, %v1594_v39  ;;  %v843_v23 = vmul.f32 0.5, %v2105_v53  ;;  %v911_v56 = vmul.f32 0.70710677, %v2165_v26  ;;  %v875_v36 = vmul.f32 0.5, %v2111_v47 }
 0x13d   : > { %v1598_v44 = vpop.eup %1597  ;;  %v1096_v63 = vmul.f32 %v1032_v62, %v840_v25  ;;  %v1035_v16 = vadd.f32 1.0, %v1596_v48  ;;  %1609 = verf.f32 %v940_v19  ;;  %v943_v49 = vmul.f32 0.70710677, %v2169_v45 }
 0x13e   : > { %v1128_v43 = vmul.f32 %v1064_v34, %v872_v59  ;;  %v1067_v22 = vadd.f32 1.0, %v1598_v44  ;;  %1611 = verf.f32 %v911_v56  ;;  %v1600_v17 = vpop.eup %1599  ;;  %v909_v53 = vmul.f32 0.70710677, %v2175_v10 }
 0x13f   : > { %1160 = vst [vmem:[%s1780_s30 + $0xc0] sm:$0xff] %v1096_v63  ;;  %v1099_v42 = vmul.f32 %v1035_v16, %v843_v23  ;;  %1613 = verf.f32 %v943_v49  ;;  %v805_v33 = vadd.f32 %v1619_v11, %v2043_v38  ;;  %v841_v47 = vmul.f32 0.5, %v2121_v30 }
 0x140   : > { %1192 = vst [vmem:[%s1780_s30 + $0x1c0] sm:$0xff] %v1128_v43  ;;  %v1131_v37 = vmul.f32 %v1067_v22, %v875_v36  ;;  %v1033_v0 = vadd.f32 1.0, %v1600_v17  ;;  %1615 = verf.f32 %v909_v53  ;;  %v873_v40 = vmul.f32 0.5, %v2131_v9 }
 0x141   : > { %v1602_v35 = vpop.eup %1601  ;;  %1163 = vst [vmem:[%s1780_s30 + $0xd8] sm:$0xff] %v1099_v42  ;;  %v941_v50 = vmul.f32 0.70710677, %v805_v33  ;;  %v846_v38 = vmul.f32 0.5, %v2137_v31  ;;  %v878_v4 = vmul.f32 0.5, %v2141_v51  ;;  %v844_v9 = vmul.f32 0.5, %v2147_v18 }
 0x142   : > { %v1604_v27 = vpop.eup %1603  ;;  %1195 = vst [vmem:[%s1780_s30 + $0x1d8] sm:$0xff] %v1131_v37  ;;  %v1097_v14 = vmul.f32 %v1033_v0, %v841_v47  ;;  %v1065_v8 = vadd.f32 1.0, %v1602_v35  ;;  %v876_v1 = vmul.f32 0.5, %v2159_v61  ;;  %v847_v28 = vmul.f32 0.5, %v2165_v26 }
 0x143   : > { %v1606_v55 = vpop.eup %1605  ;;  %v1038_v32 = vadd.f32 1.0, %v1604_v27  ;;  %1617 = verf.f32 %v941_v50  ;;  %v879_v18 = vmul.f32 0.5, %v2169_v45  ;;  %v845_v52 = vmul.f32 0.5, %v2175_v10 }
 0x144   : > { %1161 = vst [vmem:[%s1780_s30 + $0xc8] sm:$0xff] %v1097_v14  ;;  %v1129_v30 = vmul.f32 %v1065_v8, %v873_v40  ;;  %v1070_v5 = vadd.f32 1.0, %v1606_v55  ;;  %v1608_v12 = vpop.eup %1607  ;;  %v877_v7 = vmul.f32 0.5, %v805_v33 }
 0x145   : > { %v1102_v6 = vmul.f32 %v1038_v32, %v846_v38  ;;  %v1036_v29 = vadd.f32 1.0, %v1608_v12 }
 0x146   : > { %1193 = vst [vmem:[%s1780_s30 + $0x1c8] sm:$0xff] %v1129_v30  ;;  %v1134_v54 = vmul.f32 %v1070_v5, %v878_v4 }
 0x147   : > { %v1610_v21 = vpop.eup %1609  ;;  %1166 = vst [vmem:[%s1780_s30 + $0xf0] sm:$0xff] %v1102_v6  ;;  %v1100_v3 = vmul.f32 %v1036_v29, %v844_v9 }
 0x148   : > { %v1612_v31 = vpop.eup %1611  ;;  %1198 = vst [vmem:[%s1780_s30 + $0x1f0] sm:$0xff] %v1134_v54  ;;  %v1068_v24 = vadd.f32 1.0, %v1610_v21 }
 0x149   : > { %v1614_v51 = vpop.eup %1613  ;;  %v1039_v20 = vadd.f32 1.0, %v1612_v31  ;;  %1164 = vst [vmem:[%s1780_s30 + $0xe0] sm:$0xff] %v1100_v3 }
 0x14a   : > { %v1132_v60 = vmul.f32 %v1068_v24, %v876_v1  ;;  %v1071_v2 = vadd.f32 1.0, %v1614_v51  ;;  %v1616_v57 = vpop.eup %1615 }
 0x14b   : > { %v1103_v15 = vmul.f32 %v1039_v20, %v847_v28  ;;  %v1037_v46 = vadd.f32 1.0, %v1616_v57 }
 0x14c   : > { %1196 = vst [vmem:[%s1780_s30 + $0x1e0] sm:$0xff] %v1132_v60  ;;  %v1135_v13 = vmul.f32 %v1071_v2, %v879_v18 }
 0x14d   : > { %v1618_v58 = vpop.eup %1617  ;;  %1167 = vst [vmem:[%s1780_s30 + $0xf8] sm:$0xff] %v1103_v15  ;;  %v1101_v61 = vmul.f32 %v1037_v46, %v845_v52 }
 0x14e   : > { %1199 = vst [vmem:[%s1780_s30 + $0x1f8] sm:$0xff] %v1135_v13  ;;  %v1069_v41 = vadd.f32 1.0, %v1618_v58 }
 0x14f   : > { %1165 = vst [vmem:[%s1780_s30 + $0xe8] sm:$0xff] %v1101_v61 }
 0x150   : > { %v1133_v25 = vmul.f32 %v1069_v41, %v877_v7 }
 0x152   : > { %1197 = vst [vmem:[%s1780_s30 + $0x1e8] sm:$0xff] %v1133_v25 }
 0x153 PF: > { %s13_s12 = sadd.s32 1, %s1626_s12  }
 0x154   : > { %p10_p4 = scmp.ge.s32.totalorder %s13_s12, 4  }
 0x156   :  { %12 = sbr.rel (!%p10_p4) target bundleno = 1 (0x1), region = 62 }

// kernel: mlp_block2.13
= control target key start
LH: loop header
LB: loop body
LE: loop exit
PB: predicated region body
PF: predicated region fallthrough
CT: control target
= control target key end

     0   :  { %s687_s12 = smov 0   ;;  %s808_s0 = inlined_call_operand.vmem [shape: bf16[256,36], index: 0, kind: input, shape index: {}]   ;;  %s809_s1 = inlined_call_operand.vmem [shape: bf16[36,128], index: 1, kind: input, shape index: {}]   ;;  %s810_s2 = inlined_call_operand.vmem [shape: f32[1,128], index: 2, kind: input, shape index: {}]   ;;  %s811_s3 = inlined_call_operand.vmem [shape: f32[256,128], index: 3, kind: output, shape index: {}]  }
   0x1 LB: > { %s536_s13 = sadd.s32 4294967295, %s665_s12   ;;  %p540_p0 = scmp.ge.s32.totalorder %s665_s12, 1  ;;  %s665_s12 = sphi %s687_s12, %s13_s12  }
   0x2   : > { %p138_p1 = scmp.lt.s32.totalorder %s665_s12, 3 }
   0x4   : > { %p139_p2 = pnand %p540_p0, %p138_p1 }
   0x5   : > { %v616_v0 = vld [vmem:[%s809_s1] sm:$0xff] (!%p139_p2)   ;;  %v617_v1 = vld [vmem:[%s809_s1 + $0x8] sm:$0xff] (!%p139_p2)   ;;  %s541_s18 = sshll.u32 (!%p139_p2), %s536_s13, 4  ;;  %v618_v2 = vld [vmem:[%s809_s1 + $0x10] ss:$0 sps:$4 sm:$0x33] (!%p139_p2)  }
   0x6   : > { %142 = sbr.rel (%p139_p2) target bundleno = 265 (0x109), region = 32  ;;  %578 = vmatprep.subr.bf16.mxu0 (!%p139_p2), %v616_v0  ;;  %600 = vmatprep.subr.bf16.mxu1 (!%p139_p2), %v616_v0  ;;  %p163_p3 = scmp.lt.s32.totalorder (!%p139_p2), %s541_s18, 31  ;;  %vm283_vm0 = vcmask (!%p139_p2), 1041408   ;;  %vm258_vm1 = vcmask (!%p139_p2), 293888   ;;  %v721_v12 = vld [vmem:[%s810_s2] ss:$0 sm:$0xff] (!%p139_p2) }
   0x7   : > { %579 = vmatpush3.bf16.msra.mxu0 (!%p139_p2), %v616_v0  ;;  %603 = vmatpush3.bf16.msra.mxu1 (!%p139_p2), %v616_v0  ;;  %v285_v3 = vsel (!%p139_p2), %vm283_vm0, %v618_v2, 0 }
   0x8   : > { %580 = vmatprep.subr.bf16.mxu0 (!%p139_p2), %v617_v1  ;;  %601 = vmatprep.subr.bf16.mxu1 (!%p139_p2), %v617_v1 }
   0xb   : > { %581 = vmatpush3.bf16.msra.mxu0 (!%p139_p2), %v617_v1  ;;  %604 = vmatpush3.bf16.msra.mxu1 (!%p139_p2), %v617_v1 }
   0xc   : > { %606 = vmatprep.subr.msk.bf16.mxu0 (!%p139_p2), %vm283_vm0, %v618_v2  ;;  %607 = vmatprep.subr.msk.bf16.mxu1 (!%p139_p2), %vm283_vm0, %v618_v2 }
   0xd   : > { %s813_s18 = smov (!%p163_p3, %s541_s18), 31 }
   0xe   : > { %s542_s21 = sshll.u32 %s813_s18, 2  ;;  %s544_s27 = sshll.u32 %s813_s18, 3 }
   0xf   : > { %s166_s24 = scalar_lea.vmem %s808_s0, %s542_s21  ;;  %583 = vmatpush3.bf16.msra.mxu0 %v285_v3  ;;  %605 = vmatpush3.bf16.msra.mxu1 %v285_v3  ;;  %s773_s30 = scalar_lea.vmem %s811_s3, %s544_s27 }
  0x10   : > { %v619_v4 = vld [vmem:[%s166_s24] sm:$0xff]   ;;  %v621_v6 = vld [vmem:[%s166_s24 + $0x8] sm:$0xff]   ;;  %v623_v8 = vld [vmem:[%s166_s24 + $0x10] sm:$0xff]  }
  0x11   : > { %v620_v5 = vld [vmem:[%s166_s24 + $0x20] sm:$0xff]   ;;  %584 = vmatprep.mubr.msk.bf16.mxu0 %vm258_vm1, %v619_v4  ;;  %v622_v7 = vld [vmem:[%s166_s24 + $0x28] sm:$0xff]   ;;  %v624_v9 = vld [vmem:[%s166_s24 + $0x30] sm:$0xff]  }
  0x12   : > { %592 = vmatprep.mubr.msk.bf16.mxu1 %vm258_vm1, %v620_v5  ;;  %585 = vmatmul.mubr.msk.bf16.vlgmr.msra.gmra.mrb[0].mxu0 %vm258_vm1, %v621_v6  ;;  %v625_v10 = vld [vmem:[%s166_s24 + $0x18] sm:$0xff]  }
  0x13   : > { %593 = vmatmul.mubr.msk.bf16.vlgmr.msra.gmra.mrb[0].mxu1 %vm258_vm1, %v622_v7  ;;  %588 = vmatprep.mubr.msk.bf16.mxu0 %vm258_vm1, %v623_v8  ;;  %v626_v11 = vld [vmem:[%s166_s24 + $0x38] sm:$0xff]  }
  0x14   : > { %596 = vmatprep.mubr.msk.bf16.mxu1 %vm258_vm1, %v624_v9 }
  0x1a   : > { %589 = vmatmul.mubr.msk.bf16.gmra.mrb[4].mxu0 %vm258_vm1, %v625_v10 }
  0x1b   : > { %597 = vmatmul.mubr.msk.bf16.gmra.mrb[4].mxu1 %vm258_vm1, %v626_v11 }
  0xe5   : > { %v586_v13 = vpop.f32.mrb[0].mxu0 }
  0xe6   : > { %v594_v14 = vpop.f32.mrb[0].mxu1  ;;  %v330_v15 = vadd.f32 %v586_v13, %v721_v12  ;;  %v321_v17 = vpop.f32.mrb[1].mxu0 }
  0xe7   : > { %v362_v16 = vadd.f32 %v594_v14, %v721_v12  ;;  %v353_v18 = vpop.f32.mrb[1].mxu1  ;;  %v322_v19 = vadd.f32 %v721_v12, %v321_v17  ;;  %v587_v21 = vpop.f32.mrb[2].mxu0 }
  0xe8   : > { %v354_v20 = vadd.f32 %v721_v12, %v353_v18  ;;  %v595_v22 = vpop.f32.mrb[2].mxu1  ;;  %v402_v23 = vmul.f32 0.70710677, %v330_v15  ;;  %v333_v27 = vadd.f32 %v587_v21, %v721_v12  ;;  %v324_v29 = vpop.f32.mrb[3].mxu0  ;;  %v386_v57 = vmul.f32 0.5, %v330_v15 }
  0xe9   : > { %v410_v24 = vmul.f32 0.70710677, %v362_v16  ;;  %v400_v25 = vmul.f32 0.70710677, %v322_v19  ;;  %v729_v28 = vadd.f32 %v595_v22, %v721_v12  ;;  %v356_v30 = vpop.f32.mrb[3].mxu1  ;;  %v732_v31 = vadd.f32 %v721_v12, %v324_v29 }
  0xea   : > { %v408_v26 = vmul.f32 0.70710677, %v354_v20  ;;  %627 = verf.f32 %v402_v23  ;;  %v735_v32 = vadd.f32 %v721_v12, %v356_v30  ;;  %v403_v33 = vmul.f32 0.70710677, %v333_v27 }
  0xeb   : > { %629 = verf.f32 %v410_v24  ;;  %v411_v34 = vmul.f32 0.70710677, %v729_v28  ;;  %v401_v35 = vmul.f32 0.70710677, %v732_v31  ;;  %v394_v58 = vmul.f32 0.5, %v362_v16 }
  0xec   : > { %631 = verf.f32 %v400_v25  ;;  %v409_v37 = vmul.f32 0.70710677, %v735_v32  ;;  %v384_v1 = vmul.f32 0.5, %v322_v19  ;;  %v392_v2 = vmul.f32 0.5, %v354_v20 }
  0xed   : > { %633 = verf.f32 %v408_v26  ;;  %v590_v36 = vpop.f32.mrb[4].mxu0  ;;  %v387_v11 = vmul.f32 0.5, %v333_v27  ;;  %v395_v18 = vmul.f32 0.5, %v729_v28  ;;  %v385_v22 = vmul.f32 0.5, %v732_v31 }
  0xee   : > { %635 = verf.f32 %v403_v33  ;;  %v741_v38 = vadd.f32 %v590_v36, %v721_v12  ;;  %v598_v39 = vpop.f32.mrb[4].mxu1  ;;  %v337_v40 = vpop.f32.mrb[5].mxu0  ;;  %v393_v26 = vmul.f32 0.5, %v735_v32 }
  0xef   : > { %637 = verf.f32 %v411_v34  ;;  %v744_v41 = vadd.f32 %v598_v39, %v721_v12  ;;  %v747_v42 = vadd.f32 %v721_v12, %v337_v40  ;;  %v369_v43 = vpop.f32.mrb[5].mxu1  ;;  %v591_v44 = vpop.f32.mrb[6].mxu0 }
  0xf0   : > { %639 = verf.f32 %v401_v35  ;;  %v406_v45 = vmul.f32 0.70710677, %v741_v38  ;;  %v751_v46 = vadd.f32 %v721_v12, %v369_v43  ;;  %v599_v47 = vpop.f32.mrb[6].mxu1  ;;  %v340_v48 = vpop.f32.mrb[7].mxu0  ;;  %v758_v53 = vadd.f32 %v591_v44, %v721_v12 }
  0xf1   : > { %641 = verf.f32 %v409_v37  ;;  %v414_v49 = vmul.f32 0.70710677, %v744_v41  ;;  %v372_v50 = vpop.f32.mrb[7].mxu1  ;;  %v404_v51 = vmul.f32 0.70710677, %v747_v42  ;;  %v761_v54 = vadd.f32 %v599_v47, %v721_v12 }
  0xf2   : > { %643 = verf.f32 %v406_v45  ;;  %v412_v52 = vmul.f32 0.70710677, %v751_v46  ;;  %v764_v55 = vadd.f32 %v721_v12, %v340_v48  ;;  %v407_v61 = vmul.f32 0.70710677, %v758_v53 }
  0xf3   : > { %645 = verf.f32 %v414_v49  ;;  %v768_v62 = vadd.f32 %v721_v12, %v372_v50  ;;  %v415_v3 = vmul.f32 0.70710677, %v761_v54  ;;  %v390_v30 = vmul.f32 0.5, %v741_v38 }
  0xf4   : > { %v628_v56 = vpop.eup %627  ;;  %647 = verf.f32 %v404_v51  ;;  %v405_v7 = vmul.f32 0.70710677, %v764_v55  ;;  %v398_v35 = vmul.f32 0.5, %v744_v41  ;;  %v388_v32 = vmul.f32 0.5, %v747_v42 }
  0xf5   : > { %v630_v59 = vpop.eup %629  ;;  %v434_v60 = vadd.f32 1.0, %v628_v56  ;;  %649 = verf.f32 %v412_v52  ;;  %v413_v15 = vmul.f32 0.70710677, %v768_v62  ;;  %v396_v38 = vmul.f32 0.5, %v751_v46 }
  0xf6   : > { %v632_v63 = vpop.eup %631  ;;  %v442_v0 = vadd.f32 1.0, %v630_v59  ;;  %651 = verf.f32 %v407_v61  ;;  %v391_v49 = vmul.f32 0.5, %v758_v53  ;;  %v399_v51 = vmul.f32 0.5, %v761_v54 }
  0xf7   : > { %v634_v4 = vpop.eup %633  ;;  %v450_v5 = vmul.f32 %v434_v60, %v386_v57  ;;  %v432_v6 = vadd.f32 1.0, %v632_v63  ;;  %653 = verf.f32 %v415_v3  ;;  %v389_v56 = vmul.f32 0.5, %v764_v55 }
  0xf8   : > { %v636_v8 = vpop.eup %635  ;;  %v458_v9 = vmul.f32 %v442_v0, %v394_v58  ;;  %v440_v10 = vadd.f32 1.0, %v634_v4  ;;  %655 = verf.f32 %v405_v7  ;;  %v397_v53 = vmul.f32 0.5, %v768_v62 }
  0xf9   : > { %v638_v12 = vpop.eup %637  ;;  %466 = vst [vmem:[%s773_s30 + $0x10] sm:$0xff] %v450_v5  ;;  %v448_v13 = vmul.f32 %v432_v6, %v384_v1  ;;  %v435_v14 = vadd.f32 1.0, %v636_v8  ;;  %657 = verf.f32 %v413_v15 }
  0xfa   : > { %v640_v16 = vpop.eup %639  ;;  %474 = vst [vmem:[%s773_s30 + $0x50] sm:$0xff] %v458_v9  ;;  %v456_v17 = vmul.f32 %v440_v10, %v392_v2  ;;  %v443_v19 = vadd.f32 1.0, %v638_v12 }
  0xfb   : > { %v642_v20 = vpop.eup %641  ;;  %464 = vst [vmem:[%s773_s30] sm:$0xff] %v448_v13  ;;  %v451_v21 = vmul.f32 %v435_v14, %v387_v11  ;;  %v433_v23 = vadd.f32 1.0, %v640_v16 }
  0xfc   : > { %v644_v24 = vpop.eup %643  ;;  %472 = vst [vmem:[%s773_s30 + $0x40] sm:$0xff] %v456_v17  ;;  %v459_v25 = vmul.f32 %v443_v19, %v395_v18  ;;  %v441_v27 = vadd.f32 1.0, %v642_v20 }
  0xfd   : > { %v646_v29 = vpop.eup %645  ;;  %467 = vst [vmem:[%s773_s30 + $0x18] sm:$0xff] %v451_v21  ;;  %v449_v28 = vmul.f32 %v433_v23, %v385_v22  ;;  %v438_v33 = vadd.f32 1.0, %v644_v24 }
  0xfe   : > { %v648_v34 = vpop.eup %647  ;;  %475 = vst [vmem:[%s773_s30 + $0x58] sm:$0xff] %v459_v25  ;;  %v457_v31 = vmul.f32 %v441_v27, %v393_v26  ;;  %v446_v36 = vadd.f32 1.0, %v646_v29 }
  0xff   : > { %v650_v37 = vpop.eup %649  ;;  %465 = vst [vmem:[%s773_s30 + $0x8] sm:$0xff] %v449_v28  ;;  %v454_v39 = vmul.f32 %v438_v33, %v390_v30  ;;  %v436_v40 = vadd.f32 1.0, %v648_v34 }
 0x100   : > { %473 = vst [vmem:[%s773_s30 + $0x48] sm:$0xff] %v457_v31  ;;  %v462_v43 = vmul.f32 %v446_v36, %v398_v35  ;;  %v444_v44 = vadd.f32 1.0, %v650_v37  ;;  %v652_v45 = vpop.eup %651 }
 0x101   : > { %470 = vst [vmem:[%s773_s30 + $0x30] sm:$0xff] %v454_v39  ;;  %v452_v47 = vmul.f32 %v436_v40, %v388_v32  ;;  %v654_v48 = vpop.eup %653  ;;  %v439_v50 = vadd.f32 1.0, %v652_v45 }
 0x102   : > { %478 = vst [vmem:[%s773_s30 + $0x70] sm:$0xff] %v462_v43  ;;  %v460_v41 = vmul.f32 %v444_v44, %v396_v38  ;;  %v656_v42 = vpop.eup %655  ;;  %v447_v52 = vadd.f32 1.0, %v654_v48 }
 0x103   : > { %468 = vst [vmem:[%s773_s30 + $0x20] sm:$0xff] %v452_v47  ;;  %v455_v46 = vmul.f32 %v439_v50, %v391_v49  ;;  %v437_v57 = vadd.f32 1.0, %v656_v42  ;;  %v658_v58 = vpop.eup %657 }
 0x104   : > { %476 = vst [vmem:[%s773_s30 + $0x60] sm:$0xff] %v460_v41  ;;  %v463_v59 = vmul.f32 %v447_v52, %v399_v51  ;;  %v445_v61 = vadd.f32 1.0, %v658_v58 }
 0x105   : > { %471 = vst [vmem:[%s773_s30 + $0x38] sm:$0xff] %v455_v46  ;;  %v453_v60 = vmul.f32 %v437_v57, %v389_v56 }
 0x106   : > { %479 = vst [vmem:[%s773_s30 + $0x78] sm:$0xff] %v463_v59  ;;  %v461_v63 = vmul.f32 %v445_v61, %v397_v53 }
 0x107   : > { %469 = vst [vmem:[%s773_s30 + $0x28] sm:$0xff] %v453_v60 }
 0x108   : > { %477 = vst [vmem:[%s773_s30 + $0x68] sm:$0xff] %v461_v63 }
 0x109 PF: > { %s13_s12 = sadd.s32 1, %s665_s12  }
 0x10a   : > { %p10_p4 = scmp.ge.s32.totalorder %s13_s12, 4  }
 0x10c   :  { %12 = sbr.rel (!%p10_p4) target bundleno = 1 (0x1), region = 62 }

// kernel: mlp_block2.15
= control target key start
LH: loop header
LB: loop body
LE: loop exit
PB: predicated region body
PF: predicated region fallthrough
CT: control target
= control target key end

     0   :  { %s1007_s12 = smov 0   ;;  %s1245_s0 = inlined_call_operand.vmem [shape: bf16[2304,36], index: 0, kind: input, shape index: {}]   ;;  %s1246_s1 = inlined_call_operand.vmem [shape: bf16[36,128], index: 1, kind: input, shape index: {}]   ;;  %s1247_s2 = inlined_call_operand.vmem [shape: f32[1,128], index: 2, kind: input, shape index: {}]   ;;  %s1248_s3 = inlined_call_operand.vmem [shape: f32[2304,128], index: 3, kind: output, shape index: {}]  }
   0x1 LB: > { %s776_s13 = sadd.s32 4294967295, %s985_s12   ;;  %p780_p0 = scmp.ge.s32.totalorder %s985_s12, 1  ;;  %s985_s12 = sphi %s1007_s12, %s13_s12  }
   0x2   : > { %p138_p1 = scmp.lt.s32.totalorder %s985_s12, 10 }
   0x4   : > { %p139_p2 = pnand %p780_p0, %p138_p1 }
   0x5   : > { %v896_v0 = vld [vmem:[%s1246_s1] sm:$0xff] (!%p139_p2)   ;;  %v897_v1 = vld [vmem:[%s1246_s1 + $0x8] sm:$0xff] (!%p139_p2)   ;;  %s781_s18 = sshll.u32 (!%p139_p2), %s776_s13, 5  ;;  %v898_v2 = vld [vmem:[%s1246_s1 + $0x10] ss:$0 sps:$4 sm:$0x33] (!%p139_p2)  }
   0x6   : > { %142 = sbr.rel (%p139_p2) target bundleno = 290 (0x122), region = 32  ;;  %842 = vmatprep.subr.bf16.mxu0 (!%p139_p2), %v896_v0  ;;  %880 = vmatprep.subr.bf16.mxu1 (!%p139_p2), %v896_v0  ;;  %p163_p3 = scmp.lt.s32.totalorder (!%p139_p2), %s781_s18, 287  ;;  %vm363_vm0 = vcmask (!%p139_p2), 1041408   ;;  %vm314_vm1 = vcmask (!%p139_p2), 293888   ;;  %v1067_v20 = vld [vmem:[%s1247_s2] ss:$0 sm:$0xff] (!%p139_p2) }
   0x7   : > { %843 = vmatpush3.bf16.msra.mxu0 (!%p139_p2), %v896_v0  ;;  %883 = vmatpush3.bf16.msra.mxu1 (!%p139_p2), %v896_v0  ;;  %v365_v3 = vsel (!%p139_p2), %vm363_vm0, %v898_v2, 0 }
   0x8   : > { %844 = vmatprep.subr.bf16.mxu0 (!%p139_p2), %v897_v1  ;;  %881 = vmatprep.subr.bf16.mxu1 (!%p139_p2), %v897_v1 }
   0xb   : > { %845 = vmatpush3.bf16.msra.mxu0 (!%p139_p2), %v897_v1  ;;  %884 = vmatpush3.bf16.msra.mxu1 (!%p139_p2), %v897_v1 }
   0xc   : > { %886 = vmatprep.subr.msk.bf16.mxu0 (!%p139_p2), %vm363_vm0, %v898_v2  ;;  %887 = vmatprep.subr.msk.bf16.mxu1 (!%p139_p2), %vm363_vm0, %v898_v2 }
   0xd   : > { %s1250_s18 = smov (!%p163_p3, %s781_s18), 287 }
   0xe   : > { %s782_s21 = sshll.u32 %s1250_s18, 2  ;;  %s784_s27 = sshll.u32 %s1250_s18, 3 }
   0xf   : > { %s1030_s24 = scalar_lea.vmem %s1245_s0, %s782_s21  ;;  %847 = vmatpush3.bf16.msra.mxu0 %v365_v3  ;;  %885 = vmatpush3.bf16.msra.mxu1 %v365_v3  ;;  %s1107_s30 = scalar_lea.vmem %s1248_s3, %s784_s27 }
  0x10   : > { %v899_v4 = vld [vmem:[%s1030_s24] sm:$0xff]   ;;  %v901_v6 = vld [vmem:[%s1030_s24 + $0x8] sm:$0xff]   ;;  %v903_v8 = vld [vmem:[%s1030_s24 + $0x10] sm:$0xff]  }
  0x11   : > { %v900_v5 = vld [vmem:[%s1030_s24 + $0x40] sm:$0xff]   ;;  %848 = vmatprep.mubr.msk.bf16.mxu0 %vm314_vm1, %v899_v4  ;;  %v902_v7 = vld [vmem:[%s1030_s24 + $0x48] sm:$0xff]   ;;  %v904_v9 = vld [vmem:[%s1030_s24 + $0x50] sm:$0xff]  }
  0x12   : > { %864 = vmatprep.mubr.msk.bf16.mxu1 %vm314_vm1, %v900_v5  ;;  %849 = vmatmul.mubr.msk.bf16.vlgmr.msra.gmra.mrb[0].mxu0 %vm314_vm1, %v901_v6  ;;  %v905_v10 = vld [vmem:[%s1030_s24 + $0x18] sm:$0xff]   ;;  %v907_v12 = vld [vmem:[%s1030_s24 + $0x20] sm:$0xff]   ;;  %v909_v14 = vld [vmem:[%s1030_s24 + $0x28] sm:$0xff]  }
  0x13   : > { %865 = vmatmul.mubr.msk.bf16.vlgmr.msra.gmra.mrb[0].mxu1 %vm314_vm1, %v902_v7  ;;  %852 = vmatprep.mubr.msk.bf16.mxu0 %vm314_vm1, %v903_v8  ;;  %v906_v11 = vld [vmem:[%s1030_s24 + $0x58] sm:$0xff]   ;;  %v908_v13 = vld [vmem:[%s1030_s24 + $0x60] sm:$0xff]   ;;  %v910_v15 = vld [vmem:[%s1030_s24 + $0x68] sm:$0xff]  }
  0x14   : > { %868 = vmatprep.mubr.msk.bf16.mxu1 %vm314_vm1, %v904_v9  ;;  %v911_v16 = vld [vmem:[%s1030_s24 + $0x30] sm:$0xff]   ;;  %v913_v18 = vld [vmem:[%s1030_s24 + $0x38] sm:$0xff]  }
  0x15   : > { %v912_v17 = vld [vmem:[%s1030_s24 + $0x70] sm:$0xff]   ;;  %v914_v19 = vld [vmem:[%s1030_s24 + $0x78] sm:$0xff]  }
  0x1a   : > { %853 = vmatmul.mubr.msk.bf16.gmra.mrb[4].mxu0 %vm314_vm1, %v905_v10 }
  0x1b   : > { %869 = vmatmul.mubr.msk.bf16.gmra.mrb[4].mxu1 %vm314_vm1, %v906_v11  ;;  %856 = vmatprep.mubr.msk.bf16.mxu0 %vm314_vm1, %v907_v12 }
  0x1c   : > { %872 = vmatprep.mubr.msk.bf16.mxu1 %vm314_vm1, %v908_v13 }
  0x22   : > { %857 = vmatmul.mubr.msk.bf16.gmra.mrb[8].mxu0 %vm314_vm1, %v909_v14 }
  0x23   : > { %873 = vmatmul.mubr.msk.bf16.gmra.mrb[8].mxu1 %vm314_vm1, %v910_v15  ;;  %860 = vmatprep.mubr.msk.bf16.mxu0 %vm314_vm1, %v911_v16 }
  0x24   : > { %876 = vmatprep.mubr.msk.bf16.mxu1 %vm314_vm1, %v912_v17 }
  0x2a   : > { %861 = vmatmul.mubr.msk.bf16.gmra.mrb[12].mxu0 %vm314_vm1, %v913_v18 }
  0x2b   : > { %877 = vmatmul.mubr.msk.bf16.gmra.mrb[12].mxu1 %vm314_vm1, %v914_v19 }
  0xe5   : > { %v850_v21 = vpop.f32.mrb[0].mxu0 }
  0xe6   : > { %v866_v22 = vpop.f32.mrb[0].mxu1  ;;  %v410_v23 = vadd.f32 %v850_v21, %v1067_v20  ;;  %v401_v25 = vpop.f32.mrb[1].mxu0 }
  0xe7   : > { %v474_v24 = vadd.f32 %v866_v22, %v1067_v20  ;;  %v465_v26 = vpop.f32.mrb[1].mxu1  ;;  %v402_v27 = vadd.f32 %v1067_v20, %v401_v25  ;;  %v851_v29 = vpop.f32.mrb[2].mxu0 }
  0xe8   : > { %v466_v28 = vadd.f32 %v1067_v20, %v465_v26  ;;  %v867_v30 = vpop.f32.mrb[2].mxu1  ;;  %v562_v31 = vmul.f32 0.70710677, %v410_v23  ;;  %v413_v35 = vadd.f32 %v851_v29, %v1067_v20  ;;  %v404_v37 = vpop.f32.mrb[3].mxu0  ;;  %v530_v57 = vmul.f32 0.5, %v410_v23 }
  0xe9   : > { %v578_v32 = vmul.f32 0.70710677, %v474_v24  ;;  %v560_v33 = vmul.f32 0.70710677, %v402_v27  ;;  %v477_v36 = vadd.f32 %v867_v30, %v1067_v20  ;;  %v468_v38 = vpop.f32.mrb[3].mxu1  ;;  %v405_v39 = vadd.f32 %v1067_v20, %v404_v37 }
  0xea   : > { %v576_v34 = vmul.f32 0.70710677, %v466_v28  ;;  %915 = verf.f32 %v562_v31  ;;  %v469_v40 = vadd.f32 %v1067_v20, %v468_v38  ;;  %v563_v41 = vmul.f32 0.70710677, %v413_v35 }
  0xeb   : > { %917 = verf.f32 %v578_v32  ;;  %v579_v42 = vmul.f32 0.70710677, %v477_v36  ;;  %v561_v43 = vmul.f32 0.70710677, %v405_v39  ;;  %v546_v58 = vmul.f32 0.5, %v474_v24 }
  0xec   : > { %919 = verf.f32 %v560_v33  ;;  %v577_v45 = vmul.f32 0.70710677, %v469_v40  ;;  %v528_v61 = vmul.f32 0.5, %v402_v27  ;;  %v544_v4 = vmul.f32 0.5, %v466_v28 }
  0xed   : > { %921 = verf.f32 %v576_v34  ;;  %v854_v44 = vpop.f32.mrb[4].mxu0  ;;  %v531_v5 = vmul.f32 0.5, %v413_v35  ;;  %v547_v6 = vmul.f32 0.5, %v477_v36  ;;  %v529_v15 = vmul.f32 0.5, %v405_v39 }
  0xee   : > { %923 = verf.f32 %v563_v41  ;;  %v426_v46 = vadd.f32 %v854_v44, %v1067_v20  ;;  %v870_v47 = vpop.f32.mrb[4].mxu1  ;;  %v417_v48 = vpop.f32.mrb[5].mxu0  ;;  %v545_v16 = vmul.f32 0.5, %v469_v40 }
  0xef   : > { %925 = verf.f32 %v579_v42  ;;  %v1079_v49 = vadd.f32 %v870_v47, %v1067_v20  ;;  %v1082_v50 = vadd.f32 %v1067_v20, %v417_v48  ;;  %v481_v51 = vpop.f32.mrb[5].mxu1  ;;  %v855_v52 = vpop.f32.mrb[6].mxu0 }
  0xf0   : > { %927 = verf.f32 %v561_v43  ;;  %v566_v53 = vmul.f32 0.70710677, %v426_v46  ;;  %v1085_v54 = vadd.f32 %v1067_v20, %v481_v51  ;;  %v871_v55 = vpop.f32.mrb[6].mxu1  ;;  %v420_v56 = vpop.f32.mrb[7].mxu0  ;;  %v1092_v0 = vadd.f32 %v855_v52, %v1067_v20 }
  0xf1   : > { %929 = verf.f32 %v577_v45  ;;  %v582_v59 = vmul.f32 0.70710677, %v1079_v49  ;;  %v484_v60 = vpop.f32.mrb[7].mxu1  ;;  %v564_v62 = vmul.f32 0.70710677, %v1082_v50  ;;  %v1095_v1 = vadd.f32 %v871_v55, %v1067_v20 }
  0xf2   : > { %931 = verf.f32 %v566_v53  ;;  %v580_v63 = vmul.f32 0.70710677, %v1085_v54  ;;  %v1098_v2 = vadd.f32 %v1067_v20, %v420_v56  ;;  %v567_v9 = vmul.f32 0.70710677, %v1092_v0 }
  0xf3   : > { %933 = verf.f32 %v582_v59  ;;  %v1102_v10 = vadd.f32 %v1067_v20, %v484_v60  ;;  %v583_v17 = vmul.f32 0.70710677, %v1095_v1  ;;  %v534_v29 = vmul.f32 0.5, %v426_v46 }
  0xf4   : > { %v916_v3 = vpop.eup %915  ;;  %935 = verf.f32 %v564_v62  ;;  %v565_v23 = vmul.f32 0.70710677, %v1098_v2  ;;  %v550_v51 = vmul.f32 0.5, %v1079_v49  ;;  %v548_v49 = vmul.f32 0.5, %v1085_v54 }
  0xf5   : > { %v918_v7 = vpop.eup %917  ;;  %v626_v8 = vadd.f32 1.0, %v916_v3  ;;  %937 = verf.f32 %v580_v63  ;;  %v858_v11 = vpop.f32.mrb[8].mxu0  ;;  %v581_v35 = vmul.f32 0.70710677, %v1102_v10 }
  0xf6   : > { %v874_v12 = vpop.f32.mrb[8].mxu1  ;;  %v920_v13 = vpop.eup %919  ;;  %v642_v14 = vadd.f32 1.0, %v918_v7  ;;  %939 = verf.f32 %v567_v9  ;;  %v1117_v40 = vadd.f32 %v858_v11, %v1067_v20 }
  0xf7   : > { %v433_v18 = vpop.f32.mrb[9].mxu0  ;;  %v922_v19 = vpop.eup %921  ;;  %v658_v21 = vmul.f32 %v626_v8, %v530_v57  ;;  %v624_v22 = vadd.f32 1.0, %v920_v13  ;;  %941 = verf.f32 %v583_v17  ;;  %v1120_v41 = vadd.f32 %v874_v12, %v1067_v20 }
  0xf8   : > { %v497_v24 = vpop.f32.mrb[9].mxu1  ;;  %v859_v25 = vpop.f32.mrb[10].mxu0  ;;  %v674_v27 = vmul.f32 %v642_v14, %v546_v58  ;;  %v640_v28 = vadd.f32 1.0, %v922_v19  ;;  %943 = verf.f32 %v565_v23  ;;  %v1124_v45 = vadd.f32 %v1067_v20, %v433_v18 }
  0xf9   : > { %v924_v26 = vpop.eup %923  ;;  %v875_v30 = vpop.f32.mrb[10].mxu1  ;;  %690 = vst [vmem:[%s1107_s30 + $0x10] sm:$0xff] %v658_v21  ;;  %v656_v33 = vmul.f32 %v624_v22, %v528_v61  ;;  %945 = verf.f32 %v581_v35  ;;  %v570_v52 = vmul.f32 0.70710677, %v1117_v40  ;;  %v532_v57 = vmul.f32 0.5, %v1082_v50 }
  0xfa   : > { %v436_v31 = vpop.f32.mrb[11].mxu0  ;;  %v926_v32 = vpop.eup %925  ;;  %v627_v34 = vadd.f32 1.0, %v924_v26  ;;  %706 = vst [vmem:[%s1107_s30 + $0x90] sm:$0xff] %v674_v27  ;;  %v672_v38 = vmul.f32 %v640_v28, %v544_v4  ;;  %v586_v58 = vmul.f32 0.70710677, %v1120_v41  ;;  %v1142_v54 = vadd.f32 %v1067_v20, %v497_v24 }
  0xfb   : > { %v1113_v36 = vpop.f32.mrb[11].mxu1  ;;  %v928_v37 = vpop.eup %927  ;;  %v643_v39 = vadd.f32 1.0, %v926_v32  ;;  %688 = vst [vmem:[%s1107_s30] sm:$0xff] %v656_v33  ;;  %947 = verf.f32 %v570_v52  ;;  %v568_v50 = vmul.f32 0.70710677, %v1124_v45  ;;  %v1145_v13 = vadd.f32 %v859_v25, %v1067_v20 }
  0xfc   : > { %v930_v42 = vpop.eup %929  ;;  %v659_v43 = vmul.f32 %v627_v34, %v531_v5  ;;  %v625_v44 = vadd.f32 1.0, %v928_v37  ;;  %704 = vst [vmem:[%s1107_s30 + $0x80] sm:$0xff] %v672_v38  ;;  %949 = verf.f32 %v586_v58  ;;  %v1153_v18 = vadd.f32 %v875_v30, %v1067_v20 }
  0xfd   : > { %v932_v46 = vpop.eup %931  ;;  %v675_v47 = vmul.f32 %v643_v39, %v547_v6  ;;  %v641_v48 = vadd.f32 1.0, %v930_v42  ;;  %v862_v59 = vpop.f32.mrb[12].mxu0  ;;  %951 = verf.f32 %v568_v50  ;;  %v1156_v19 = vadd.f32 %v1067_v20, %v436_v31 }
  0xfe   : > { %v934_v53 = vpop.eup %933  ;;  %691 = vst [vmem:[%s1107_s30 + $0x18] sm:$0xff] %v659_v43  ;;  %v657_v55 = vmul.f32 %v625_v44, %v529_v15  ;;  %v630_v56 = vadd.f32 1.0, %v932_v46  ;;  %v878_v60 = vpop.f32.mrb[12].mxu1  ;;  %v535_v23 = vmul.f32 0.5, %v1092_v0  ;;  %v584_v25 = vmul.f32 0.70710677, %v1142_v54 }
  0xff   : > { %v936_v61 = vpop.eup %935  ;;  %707 = vst [vmem:[%s1107_s30 + $0x98] sm:$0xff] %v675_v47  ;;  %v673_v62 = vmul.f32 %v641_v48, %v545_v16  ;;  %v646_v63 = vadd.f32 1.0, %v934_v53  ;;  %v449_v3 = vpop.f32.mrb[13].mxu0  ;;  %v551_v27 = vmul.f32 0.5, %v1095_v1  ;;  %v571_v30 = vmul.f32 0.70710677, %v1145_v13 }
 0x100   : > { %v513_v4 = vpop.f32.mrb[13].mxu1  ;;  %v938_v5 = vpop.eup %937  ;;  %689 = vst [vmem:[%s1107_s30 + $0x8] sm:$0xff] %v657_v55  ;;  %v662_v6 = vmul.f32 %v630_v56, %v534_v29  ;;  %v628_v7 = vadd.f32 1.0, %v936_v61  ;;  %v533_v29 = vmul.f32 0.5, %v1098_v2  ;;  %953 = verf.f32 %v584_v25 }
 0x101   : > { %v1136_v8 = vpop.f32.mrb[14].mxu0  ;;  %v1138_v9 = vpop.f32.mrb[14].mxu1  ;;  %705 = vst [vmem:[%s1107_s30 + $0x88] sm:$0xff] %v673_v62  ;;  %v678_v11 = vmul.f32 %v646_v63, %v550_v51  ;;  %v644_v12 = vadd.f32 1.0, %v938_v5  ;;  %v587_v0 = vmul.f32 0.70710677, %v1153_v18  ;;  %955 = verf.f32 %v571_v30 }
 0x102   : > { %v1147_v14 = vpop.f32.mrb[15].mxu0  ;;  %v1149_v15 = vpop.f32.mrb[15].mxu1  ;;  %694 = vst [vmem:[%s1107_s30 + $0x30] sm:$0xff] %v662_v6  ;;  %v660_v17 = vmul.f32 %v628_v7, %v532_v57  ;;  %v549_v35 = vmul.f32 0.5, %v1102_v10  ;;  %v569_v1 = vmul.f32 0.70710677, %v1156_v19  ;;  %v1172_v38 = vadd.f32 %v1067_v20, %v1113_v36 }
 0x103   : > { %v940_v16 = vpop.eup %939  ;;  %710 = vst [vmem:[%s1107_s30 + $0xb0] sm:$0xff] %v678_v11  ;;  %v676_v22 = vmul.f32 %v644_v12, %v548_v49  ;;  %957 = verf.f32 %v587_v0  ;;  %v1176_v39 = vadd.f32 %v862_v59, %v1067_v20  ;;  %v1179_v42 = vadd.f32 %v878_v60, %v1067_v20 }
 0x104   : > { %v942_v21 = vpop.eup %941  ;;  %v631_v24 = vadd.f32 1.0, %v940_v16  ;;  %692 = vst [vmem:[%s1107_s30 + $0x20] sm:$0xff] %v660_v17  ;;  %959 = verf.f32 %v569_v1  ;;  %v1182_v10 = vadd.f32 %v1067_v20, %v449_v3  ;;  %v585_v46 = vmul.f32 0.70710677, %v1172_v38 }
 0x105   : > { %v944_v26 = vpop.eup %943  ;;  %v647_v28 = vadd.f32 1.0, %v942_v21  ;;  %708 = vst [vmem:[%s1107_s30 + $0xa0] sm:$0xff] %v676_v22  ;;  %v1187_v47 = vadd.f32 %v1067_v20, %v513_v4  ;;  %v538_v48 = vmul.f32 0.5, %v1117_v40  ;;  %v574_v52 = vmul.f32 0.70710677, %v1176_v39 }
 0x106   : > { %v663_v31 = vmul.f32 %v631_v24, %v535_v23  ;;  %v629_v32 = vadd.f32 1.0, %v944_v26  ;;  %v946_v33 = vpop.eup %945  ;;  %v554_v53 = vmul.f32 0.5, %v1120_v41  ;;  %961 = verf.f32 %v585_v46 }
 0x107   : > { %v679_v34 = vmul.f32 %v647_v28, %v551_v27  ;;  %v645_v2 = vadd.f32 1.0, %v946_v33  ;;  %v948_v43 = vpop.eup %947  ;;  %v590_v56 = vmul.f32 0.70710677, %v1179_v42  ;;  %v536_v59 = vmul.f32 0.5, %v1124_v45 }
 0x108   : > { %695 = vst [vmem:[%s1107_s30 + $0x38] sm:$0xff] %v663_v31  ;;  %v661_v37 = vmul.f32 %v629_v32, %v533_v29  ;;  %v950_v36 = vpop.eup %949  ;;  %v634_v51 = vadd.f32 1.0, %v948_v43  ;;  %963 = verf.f32 %v574_v52  ;;  %v572_v60 = vmul.f32 0.70710677, %v1182_v10 }
 0x109   : > { %711 = vst [vmem:[%s1107_s30 + $0xb8] sm:$0xff] %v679_v34  ;;  %v677_v44 = vmul.f32 %v645_v2, %v549_v35  ;;  %v650_v55 = vadd.f32 1.0, %v950_v36  ;;  %v952_v57 = vpop.eup %951  ;;  %965 = verf.f32 %v590_v56  ;;  %v588_v62 = vmul.f32 0.70710677, %v1187_v47 }
 0x10a   : > { %693 = vst [vmem:[%s1107_s30 + $0x28] sm:$0xff] %v661_v37  ;;  %v666_v58 = vmul.f32 %v634_v51, %v538_v48  ;;  %v632_v61 = vadd.f32 1.0, %v952_v57  ;;  %967 = verf.f32 %v572_v60  ;;  %v461_v41 = vadd.f32 %v1136_v8, %v1067_v20  ;;  %v954_v49 = vpop.eup %953 }
 0x10b   : > { %709 = vst [vmem:[%s1107_s30 + $0xa8] sm:$0xff] %v677_v44  ;;  %v682_v40 = vmul.f32 %v650_v55, %v554_v53  ;;  %v1202_v63 = vadd.f32 %v1138_v9, %v1067_v20  ;;  %v1206_v45 = vadd.f32 %v1067_v20, %v1147_v14  ;;  %969 = verf.f32 %v588_v62  ;;  %v956_v5 = vpop.eup %955 }
 0x10c   : > { %698 = vst [vmem:[%s1107_s30 + $0x50] sm:$0xff] %v666_v58  ;;  %v664_v3 = vmul.f32 %v632_v61, %v536_v59  ;;  %v1211_v4 = vadd.f32 %v1067_v20, %v1149_v15  ;;  %v552_v6 = vmul.f32 0.5, %v1142_v54  ;;  %v648_v7 = vadd.f32 1.0, %v954_v49 }
 0x10d   : > { %714 = vst [vmem:[%s1107_s30 + $0xd0] sm:$0xff] %v682_v40  ;;  %v539_v50 = vmul.f32 0.5, %v1145_v13  ;;  %v575_v8 = vmul.f32 0.70710677, %v461_v41  ;;  %v958_v9 = vpop.eup %957  ;;  %v635_v11 = vadd.f32 1.0, %v956_v5  ;;  %v555_v12 = vmul.f32 0.5, %v1153_v18 }
 0x10e   : > { %696 = vst [vmem:[%s1107_s30 + $0x40] sm:$0xff] %v664_v3  ;;  %v591_v14 = vmul.f32 0.70710677, %v1202_v63  ;;  %v573_v16 = vmul.f32 0.70710677, %v1206_v45  ;;  %v960_v20 = vpop.eup %959  ;;  %v680_v15 = vmul.f32 %v648_v7, %v552_v6  ;;  %v651_v17 = vadd.f32 1.0, %v958_v9 }
 0x10f   : > { %v537_v54 = vmul.f32 0.5, %v1156_v19  ;;  %971 = verf.f32 %v575_v8  ;;  %v667_v13 = vmul.f32 %v635_v11, %v539_v50  ;;  %v633_v21 = vadd.f32 1.0, %v960_v20 }
 0x110   : > { %973 = verf.f32 %v591_v14  ;;  %v589_v22 = vmul.f32 0.70710677, %v1211_v4  ;;  %712 = vst [vmem:[%s1107_s30 + $0xc0] sm:$0xff] %v680_v15  ;;  %v683_v18 = vmul.f32 %v651_v17, %v555_v12  ;;  %v962_v23 = vpop.eup %961  ;;  %v553_v26 = vmul.f32 0.5, %v1172_v38 }
 0x111   : > { %975 = verf.f32 %v573_v16  ;;  %699 = vst [vmem:[%s1107_s30 + $0x58] sm:$0xff] %v667_v13  ;;  %v665_v24 = vmul.f32 %v633_v21, %v537_v54  ;;  %v649_v19 = vadd.f32 1.0, %v962_v23  ;;  %v542_v28 = vmul.f32 0.5, %v1176_v39 }
 0x112   : > { %977 = verf.f32 %v589_v22  ;;  %v964_v25 = vpop.eup %963  ;;  %715 = vst [vmem:[%s1107_s30 + $0xd8] sm:$0xff] %v683_v18  ;;  %v558_v32 = vmul.f32 0.5, %v1179_v42  ;;  %v540_v35 = vmul.f32 0.5, %v1182_v10  ;;  %v556_v2 = vmul.f32 0.5, %v1187_v47 }
 0x113   : > { %v966_v27 = vpop.eup %965  ;;  %697 = vst [vmem:[%s1107_s30 + $0x48] sm:$0xff] %v665_v24  ;;  %v638_v29 = vadd.f32 1.0, %v964_v25  ;;  %v681_v31 = vmul.f32 %v649_v19, %v553_v26  ;;  %v543_v46 = vmul.f32 0.5, %v461_v41  ;;  %v559_v48 = vmul.f32 0.5, %v1202_v63 }
 0x114   : > { %v968_v30 = vpop.eup %967  ;;  %v654_v0 = vadd.f32 1.0, %v966_v27  ;;  %v541_v53 = vmul.f32 0.5, %v1206_v45  ;;  %v557_v57 = vmul.f32 0.5, %v1211_v4 }
 0x115   : > { %v970_v33 = vpop.eup %969  ;;  %v670_v34 = vmul.f32 %v638_v29, %v542_v28  ;;  %v636_v1 = vadd.f32 1.0, %v968_v30  ;;  %713 = vst [vmem:[%s1107_s30 + $0xc8] sm:$0xff] %v681_v31 }
 0x116   : > { %v686_v37 = vmul.f32 %v654_v0, %v558_v32  ;;  %v652_v38 = vadd.f32 1.0, %v970_v33 }
 0x117   : > { %702 = vst [vmem:[%s1107_s30 + $0x70] sm:$0xff] %v670_v34  ;;  %v668_v39 = vmul.f32 %v636_v1, %v540_v35 }
 0x118   : > { %718 = vst [vmem:[%s1107_s30 + $0xf0] sm:$0xff] %v686_v37  ;;  %v684_v44 = vmul.f32 %v652_v38, %v556_v2 }
 0x119   : > { %v972_v43 = vpop.eup %971  ;;  %700 = vst [vmem:[%s1107_s30 + $0x60] sm:$0xff] %v668_v39 }
 0x11a   : > { %v974_v42 = vpop.eup %973  ;;  %v639_v36 = vadd.f32 1.0, %v972_v43  ;;  %716 = vst [vmem:[%s1107_s30 + $0xe0] sm:$0xff] %v684_v44 }
 0x11b   : > { %v976_v10 = vpop.eup %975  ;;  %v655_v51 = vadd.f32 1.0, %v974_v42 }
 0x11c   : > { %v978_v47 = vpop.eup %977  ;;  %v671_v52 = vmul.f32 %v639_v36, %v543_v46  ;;  %v637_v55 = vadd.f32 1.0, %v976_v10 }
 0x11d   : > { %v687_v56 = vmul.f32 %v655_v51, %v559_v48  ;;  %v653_v58 = vadd.f32 1.0, %v978_v47 }
 0x11e   : > { %703 = vst [vmem:[%s1107_s30 + $0x78] sm:$0xff] %v671_v52  ;;  %v669_v59 = vmul.f32 %v637_v55, %v541_v53 }
 0x11f   : > { %719 = vst [vmem:[%s1107_s30 + $0xf8] sm:$0xff] %v687_v56  ;;  %v685_v60 = vmul.f32 %v653_v58, %v557_v57 }
 0x120   : > { %701 = vst [vmem:[%s1107_s30 + $0x68] sm:$0xff] %v669_v59 }
 0x121   : > { %717 = vst [vmem:[%s1107_s30 + $0xe8] sm:$0xff] %v685_v60 }
 0x122 PF: > { %s13_s12 = sadd.s32 1, %s985_s12  }
 0x123   : > { %p10_p4 = scmp.ge.s32.totalorder %s13_s12, 11  }
 0x125   :  { %12 = sbr.rel (!%p10_p4) target bundleno = 1 (0x1), region = 62 }

// kernel: mlp_block2.16
= control target key start
LH: loop header
LB: loop body
LE: loop exit
PB: predicated region body
PF: predicated region fallthrough
CT: control target
= control target key end

     0   :  { %s1648_s12 = smov 0   ;;  %s2214_s0 = inlined_call_operand.vmem [shape: bf16[4096,36], index: 0, kind: input, shape index: {}]   ;;  %s2215_s1 = inlined_call_operand.vmem [shape: bf16[36,128], index: 1, kind: input, shape index: {}]   ;;  %s2216_s2 = inlined_call_operand.vmem [shape: f32[1,128], index: 2, kind: input, shape index: {}]   ;;  %s2217_s3 = inlined_call_operand.vmem [shape: f32[4096,128], index: 3, kind: output, shape index: {}]  }
   0x1 LB: > { %s1256_s13 = sadd.s32 4294967295, %s1626_s12   ;;  %p1260_p0 = scmp.ge.s32.totalorder %s1626_s12, 1  ;;  %s1626_s12 = sphi %s1648_s12, %s13_s12  }
   0x2   : > { %p138_p1 = scmp.lt.s32.totalorder %s1626_s12, 9 }
   0x4   : > { %p139_p2 = pnand %p1260_p0, %p138_p1 }
   0x5   : > { %v1456_v0 = vld [vmem:[%s2215_s1] sm:$0xff] (!%p139_p2)   ;;  %v1457_v1 = vld [vmem:[%s2215_s1 + $0x8] sm:$0xff] (!%p139_p2)   ;;  %s1261_s18 = sshll.u32 (!%p139_p2), %s1256_s13, 6  ;;  %v1458_v2 = vld [vmem:[%s2215_s1 + $0x10] ss:$0 sps:$4 sm:$0x33] (!%p139_p2)  }
   0x6   : > { %142 = sbr.rel (%p139_p2) target bundleno = 339 (0x153), region = 32  ;;  %1370 = vmatprep.subr.bf16.mxu0 (!%p139_p2), %v1456_v0  ;;  %1440 = vmatprep.subr.bf16.mxu1 (!%p139_p2), %v1456_v0  ;;  %p163_p3 = scmp.lt.s32.totalorder (!%p139_p2), %s1261_s18, 511  ;;  %vm523_vm0 = vcmask (!%p139_p2), 1041408   ;;  %vm426_vm1 = vcmask (!%p139_p2), 293888   ;;  %v1740_v36 = vld [vmem:[%s2216_s2] ss:$0 sm:$0xff] (!%p139_p2) }
   0x7   : > { %1371 = vmatpush3.bf16.msra.mxu0 (!%p139_p2), %v1456_v0  ;;  %1443 = vmatpush3.bf16.msra.mxu1 (!%p139_p2), %v1456_v0  ;;  %v525_v3 = vsel (!%p139_p2), %vm523_vm0, %v1458_v2, 0 }
   0x8   : > { %1372 = vmatprep.subr.bf16.mxu0 (!%p139_p2), %v1457_v1  ;;  %1441 = vmatprep.subr.bf16.mxu1 (!%p139_p2), %v1457_v1 }
   0xb   : > { %1373 = vmatpush3.bf16.msra.mxu0 (!%p139_p2), %v1457_v1  ;;  %1444 = vmatpush3.bf16.msra.mxu1 (!%p139_p2), %v1457_v1 }
   0xc   : > { %1446 = vmatprep.subr.msk.bf16.mxu0 (!%p139_p2), %vm523_vm0, %v1458_v2  ;;  %1447 = vmatprep.subr.msk.bf16.mxu1 (!%p139_p2), %vm523_vm0, %v1458_v2 }
   0xd   : > { %s2219_s18 = smov (!%p163_p3, %s1261_s18), 511 }
   0xe   : > { %s1262_s21 = sshll.u32 %s2219_s18, 2  ;;  %s1264_s27 = sshll.u32 %s2219_s18, 3 }
   0xf   : > { %s1671_s24 = scalar_lea.vmem %s2214_s0, %s1262_s21  ;;  %1375 = vmatpush3.bf16.msra.mxu0 %v525_v3  ;;  %1445 = vmatpush3.bf16.msra.mxu1 %v525_v3  ;;  %s1780_s30 = scalar_lea.vmem %s2217_s3, %s1264_s27 }
  0x10   : > { %v1459_v4 = vld [vmem:[%s1671_s24] sm:$0xff]   ;;  %v1461_v6 = vld [vmem:[%s1671_s24 + $0x8] sm:$0xff]   ;;  %v1463_v8 = vld [vmem:[%s1671_s24 + $0x10] sm:$0xff]  }
  0x11   : > { %v1460_v5 = vld [vmem:[%s1671_s24 + $0x80] sm:$0xff]   ;;  %1376 = vmatprep.mubr.msk.bf16.mxu0 %vm426_vm1, %v1459_v4  ;;  %v1462_v7 = vld [vmem:[%s1671_s24 + $0x88] sm:$0xff]   ;;  %v1464_v9 = vld [vmem:[%s1671_s24 + $0x90] sm:$0xff]  }
  0x12   : > { %1408 = vmatprep.mubr.msk.bf16.mxu1 %vm426_vm1, %v1460_v5  ;;  %1377 = vmatmul.mubr.msk.bf16.vlgmr.msra.gmra.mrb[0].mxu0 %vm426_vm1, %v1461_v6  ;;  %v1465_v10 = vld [vmem:[%s1671_s24 + $0x18] sm:$0xff]   ;;  %v1467_v12 = vld [vmem:[%s1671_s24 + $0x20] sm:$0xff]   ;;  %v1469_v14 = vld [vmem:[%s1671_s24 + $0x28] sm:$0xff]  }
  0x13   : > { %1409 = vmatmul.mubr.msk.bf16.vlgmr.msra.gmra.mrb[0].mxu1 %vm426_vm1, %v1462_v7  ;;  %1380 = vmatprep.mubr.msk.bf16.mxu0 %vm426_vm1, %v1463_v8  ;;  %v1466_v11 = vld [vmem:[%s1671_s24 + $0x98] sm:$0xff]   ;;  %v1468_v13 = vld [vmem:[%s1671_s24 + $0xa0] sm:$0xff]   ;;  %v1470_v15 = vld [vmem:[%s1671_s24 + $0xa8] sm:$0xff]  }
  0x14   : > { %1412 = vmatprep.mubr.msk.bf16.mxu1 %vm426_vm1, %v1464_v9  ;;  %v1471_v16 = vld [vmem:[%s1671_s24 + $0x30] sm:$0xff]   ;;  %v1473_v18 = vld [vmem:[%s1671_s24 + $0x38] sm:$0xff]   ;;  %v1475_v20 = vld [vmem:[%s1671_s24 + $0x40] sm:$0xff]  }
  0x15   : > { %v1472_v17 = vld [vmem:[%s1671_s24 + $0xb0] sm:$0xff]   ;;  %v1474_v19 = vld [vmem:[%s1671_s24 + $0xb8] sm:$0xff]   ;;  %v1476_v21 = vld [vmem:[%s1671_s24 + $0xc0] sm:$0xff]  }
  0x16   : > { %v1477_v22 = vld [vmem:[%s1671_s24 + $0x48] sm:$0xff]   ;;  %v1479_v24 = vld [vmem:[%s1671_s24 + $0x50] sm:$0xff]   ;;  %v1481_v26 = vld [vmem:[%s1671_s24 + $0x58] sm:$0xff]  }
  0x17   : > { %v1478_v23 = vld [vmem:[%s1671_s24 + $0xc8] sm:$0xff]   ;;  %v1480_v25 = vld [vmem:[%s1671_s24 + $0xd0] sm:$0xff]   ;;  %v1482_v27 = vld [vmem:[%s1671_s24 + $0xd8] sm:$0xff]  }
  0x18   : > { %v1483_v28 = vld [vmem:[%s1671_s24 + $0x60] sm:$0xff]   ;;  %v1485_v30 = vld [vmem:[%s1671_s24 + $0x68] sm:$0xff]   ;;  %v1487_v32 = vld [vmem:[%s1671_s24 + $0x70] sm:$0xff]  }
  0x19   : > { %v1484_v29 = vld [vmem:[%s1671_s24 + $0xe0] sm:$0xff]   ;;  %v1486_v31 = vld [vmem:[%s1671_s24 + $0xe8] sm:$0xff]   ;;  %v1488_v33 = vld [vmem:[%s1671_s24 + $0xf0] sm:$0xff]  }
  0x1a   : > { %1381 = vmatmul.mubr.msk.bf16.gmra.mrb[4].mxu0 %vm426_vm1, %v1465_v10  ;;  %v1489_v34 = vld [vmem:[%s1671_s24 + $0x78] sm:$0xff]  }
  0x1b   : > { %1413 = vmatmul.mubr.msk.bf16.gmra.mrb[4].mxu1 %vm426_vm1, %v1466_v11  ;;  %1384 = vmatprep.mubr.msk.bf16.mxu0 %vm426_vm1, %v1467_v12  ;;  %v1490_v35 = vld [vmem:[%s1671_s24 + $0xf8] sm:$0xff]  }
  0x1c   : > { %1416 = vmatprep.mubr.msk.bf16.mxu1 %vm426_vm1, %v1468_v13 }
  0x22   : > { %1385 = vmatmul.mubr.msk.bf16.gmra.mrb[8].mxu0 %vm426_vm1, %v1469_v14 }
  0x23   : > { %1417 = vmatmul.mubr.msk.bf16.gmra.mrb[8].mxu1 %vm426_vm1, %v1470_v15  ;;  %1388 = vmatprep.mubr.msk.bf16.mxu0 %vm426_vm1, %v1471_v16 }
  0x24   : > { %1420 = vmatprep.mubr.msk.bf16.mxu1 %vm426_vm1, %v1472_v17 }
  0x2a   : > { %1389 = vmatmul.mubr.msk.bf16.gmra.mrb[12].mxu0 %vm426_vm1, %v1473_v18 }
  0x2b   : > { %1421 = vmatmul.mubr.msk.bf16.gmra.mrb[12].mxu1 %vm426_vm1, %v1474_v19  ;;  %1392 = vmatprep.mubr.msk.bf16.mxu0 %vm426_vm1, %v1475_v20 }
  0x2c   : > { %1424 = vmatprep.mubr.msk.bf16.mxu1 %vm426_vm1, %v1476_v21 }
  0x32   : > { %1393 = vmatmul.mubr.msk.bf16.gmra.mrb[16].mxu0 %vm426_vm1, %v1477_v22 }
  0x33   : > { %1425 = vmatmul.mubr.msk.bf16.gmra.mrb[16].mxu1 %vm426_vm1, %v1478_v23  ;;  %1396 = vmatprep.mubr.msk.bf16.mxu0 %vm426_vm1, %v1479_v24 }
  0x34   : > { %1428 = vmatprep.mubr.msk.bf16.mxu1 %vm426_vm1, %v1480_v25 }
  0x3a   : > { %1397 = vmatmul.mubr.msk.bf16.gmra.mrb[20].mxu0 %vm426_vm1, %v1481_v26 }
  0x3b   : > { %1429 = vmatmul.mubr.msk.bf16.gmra.mrb[20].mxu1 %vm426_vm1, %v1482_v27  ;;  %1400 = vmatprep.mubr.msk.bf16.mxu0 %vm426_vm1, %v1483_v28 }
  0x3c   : > { %1432 = vmatprep.mubr.msk.bf16.mxu1 %vm426_vm1, %v1484_v29 }
  0x42   : > { %1401 = vmatmul.mubr.msk.bf16.gmra.mrb[24].mxu0 %vm426_vm1, %v1485_v30 }
  0x43   : > { %1433 = vmatmul.mubr.msk.bf16.gmra.mrb[24].mxu1 %vm426_vm1, %v1486_v31  ;;  %1404 = vmatprep.mubr.msk.bf16.mxu0 %vm426_vm1, %v1487_v32 }
  0x44   : > { %1436 = vmatprep.mubr.msk.bf16.mxu1 %vm426_vm1, %v1488_v33 }
  0x4a   : > { %1405 = vmatmul.mubr.msk.bf16.gmra.mrb[28].mxu0 %vm426_vm1, %v1489_v34 }
  0x4b   : > { %1437 = vmatmul.mubr.msk.bf16.gmra.mrb[28].mxu1 %vm426_vm1, %v1490_v35 }
  0xe5   : > { %v1378_v37 = vpop.f32.mrb[0].mxu0 }
  0xe6   : > { %v1410_v38 = vpop.f32.mrb[0].mxu1  ;;  %v570_v39 = vadd.f32 %v1378_v37, %v1740_v36  ;;  %v561_v41 = vpop.f32.mrb[1].mxu0 }
  0xe7   : > { %v698_v40 = vadd.f32 %v1410_v38, %v1740_v36  ;;  %v689_v42 = vpop.f32.mrb[1].mxu1  ;;  %v562_v43 = vadd.f32 %v1740_v36, %v561_v41  ;;  %v1379_v45 = vpop.f32.mrb[2].mxu0 }
  0xe8   : > { %v690_v44 = vadd.f32 %v1740_v36, %v689_v42  ;;  %v1411_v46 = vpop.f32.mrb[2].mxu1  ;;  %v882_v47 = vmul.f32 0.70710677, %v570_v39  ;;  %v573_v51 = vadd.f32 %v1379_v45, %v1740_v36  ;;  %v564_v53 = vpop.f32.mrb[3].mxu0  ;;  %v818_v9 = vmul.f32 0.5, %v570_v39 }
  0xe9   : > { %v914_v48 = vmul.f32 0.70710677, %v698_v40  ;;  %v880_v49 = vmul.f32 0.70710677, %v562_v43  ;;  %v701_v52 = vadd.f32 %v1411_v46, %v1740_v36  ;;  %v692_v54 = vpop.f32.mrb[3].mxu1  ;;  %v565_v55 = vadd.f32 %v1740_v36, %v564_v53 }
  0xea   : > { %v912_v50 = vmul.f32 0.70710677, %v690_v44  ;;  %1491 = verf.f32 %v882_v47  ;;  %v693_v56 = vadd.f32 %v1740_v36, %v692_v54  ;;  %v883_v57 = vmul.f32 0.70710677, %v573_v51 }
  0xeb   : > { %1493 = verf.f32 %v914_v48  ;;  %v915_v58 = vmul.f32 0.70710677, %v701_v52  ;;  %v881_v59 = vmul.f32 0.70710677, %v565_v55  ;;  %v850_v10 = vmul.f32 0.5, %v698_v40 }
  0xec   : > { %1495 = verf.f32 %v880_v49  ;;  %v913_v61 = vmul.f32 0.70710677, %v693_v56  ;;  %v816_v13 = vmul.f32 0.5, %v562_v43  ;;  %v848_v20 = vmul.f32 0.5, %v690_v44 }
  0xed   : > { %1497 = verf.f32 %v912_v50  ;;  %v1382_v60 = vpop.f32.mrb[4].mxu0  ;;  %v819_v21 = vmul.f32 0.5, %v573_v51  ;;  %v851_v22 = vmul.f32 0.5, %v701_v52  ;;  %v817_v31 = vmul.f32 0.5, %v565_v55 }
  0xee   : > { %1499 = verf.f32 %v883_v57  ;;  %v586_v62 = vadd.f32 %v1382_v60, %v1740_v36  ;;  %v1414_v63 = vpop.f32.mrb[4].mxu1  ;;  %v577_v0 = vpop.f32.mrb[5].mxu0  ;;  %v849_v32 = vmul.f32 0.5, %v693_v56 }
  0xef   : > { %1501 = verf.f32 %v915_v58  ;;  %v1752_v1 = vadd.f32 %v1414_v63, %v1740_v36  ;;  %v1755_v2 = vadd.f32 %v1740_v36, %v577_v0  ;;  %v705_v3 = vpop.f32.mrb[5].mxu1  ;;  %v1383_v4 = vpop.f32.mrb[6].mxu0 }
  0xf0   : > { %1503 = verf.f32 %v881_v59  ;;  %v886_v5 = vmul.f32 0.70710677, %v586_v62  ;;  %v1758_v6 = vadd.f32 %v1740_v36, %v705_v3  ;;  %v1415_v7 = vpop.f32.mrb[6].mxu1  ;;  %v580_v8 = vpop.f32.mrb[7].mxu0  ;;  %v1765_v16 = vadd.f32 %v1383_v4, %v1740_v36 }
  0xf1   : > { %1505 = verf.f32 %v913_v61  ;;  %v918_v11 = vmul.f32 0.70710677, %v1752_v1  ;;  %v708_v12 = vpop.f32.mrb[7].mxu1  ;;  %v884_v14 = vmul.f32 0.70710677, %v1755_v2  ;;  %v1768_v17 = vadd.f32 %v1415_v7, %v1740_v36 }
  0xf2   : > { %1507 = verf.f32 %v886_v5  ;;  %v916_v15 = vmul.f32 0.70710677, %v1758_v6  ;;  %v1771_v18 = vadd.f32 %v1740_v36, %v580_v8  ;;  %v887_v25 = vmul.f32 0.70710677, %v1765_v16 }
  0xf3   : > { %1509 = verf.f32 %v918_v11  ;;  %v1775_v26 = vadd.f32 %v1740_v36, %v708_v12  ;;  %v919_v33 = vmul.f32 0.70710677, %v1768_v17  ;;  %v822_v45 = vmul.f32 0.5, %v586_v62 }
  0xf4   : > { %v1492_v19 = vpop.eup %1491  ;;  %1511 = verf.f32 %v884_v14  ;;  %v885_v39 = vmul.f32 0.70710677, %v1771_v18  ;;  %v854_v3 = vmul.f32 0.5, %v1752_v1 }
  0xf5   : > { %v1494_v23 = vpop.eup %1493  ;;  %v1010_v24 = vadd.f32 1.0, %v1492_v19  ;;  %1513 = verf.f32 %v916_v15  ;;  %v1386_v27 = vpop.f32.mrb[8].mxu0  ;;  %v917_v51 = vmul.f32 0.70710677, %v1775_v26  ;;  %v852_v15 = vmul.f32 0.5, %v1758_v6 }
  0xf6   : > { %v1418_v28 = vpop.f32.mrb[8].mxu1  ;;  %v1496_v29 = vpop.eup %1495  ;;  %v1042_v30 = vadd.f32 1.0, %v1494_v23  ;;  %1515 = verf.f32 %v887_v25  ;;  %v1790_v56 = vadd.f32 %v1386_v27, %v1740_v36 }
  0xf7   : > { %v593_v34 = vpop.f32.mrb[9].mxu0  ;;  %v1498_v35 = vpop.eup %1497  ;;  %v1074_v37 = vmul.f32 %v1010_v24, %v818_v9  ;;  %v1008_v38 = vadd.f32 1.0, %v1496_v29  ;;  %1517 = verf.f32 %v919_v33  ;;  %v1793_v57 = vadd.f32 %v1418_v28, %v1740_v36 }
  0xf8   : > { %v721_v40 = vpop.f32.mrb[9].mxu1  ;;  %v1387_v41 = vpop.f32.mrb[10].mxu0  ;;  %v1106_v43 = vmul.f32 %v1042_v30, %v850_v10  ;;  %v1040_v44 = vadd.f32 1.0, %v1498_v35  ;;  %1519 = verf.f32 %v885_v39  ;;  %v1797_v61 = vadd.f32 %v1740_v36, %v593_v34 }
  0xf9   : > { %v1500_v42 = vpop.eup %1499  ;;  %v1419_v46 = vpop.f32.mrb[10].mxu1  ;;  %1138 = vst [vmem:[%s1780_s30 + $0x10] sm:$0xff] %v1074_v37  ;;  %v1072_v49 = vmul.f32 %v1008_v38, %v816_v13  ;;  %1521 = verf.f32 %v917_v51  ;;  %v890_v4 = vmul.f32 0.70710677, %v1790_v56  ;;  %v820_v9 = vmul.f32 0.5, %v1755_v2 }
  0xfa   : > { %v596_v47 = vpop.f32.mrb[11].mxu0  ;;  %v1502_v48 = vpop.eup %1501  ;;  %v1011_v50 = vadd.f32 1.0, %v1500_v42  ;;  %1170 = vst [vmem:[%s1780_s30 + $0x110] sm:$0xff] %v1106_v43  ;;  %v1104_v54 = vmul.f32 %v1040_v44, %v848_v20  ;;  %v922_v10 = vmul.f32 0.70710677, %v1793_v57  ;;  %v1821_v28 = vadd.f32 %v1740_v36, %v721_v40 }
  0xfb   : > { %v1786_v52 = vpop.f32.mrb[11].mxu1  ;;  %v1504_v53 = vpop.eup %1503  ;;  %v1043_v55 = vadd.f32 1.0, %v1502_v48  ;;  %1136 = vst [vmem:[%s1780_s30] sm:$0xff] %v1072_v49  ;;  %1523 = verf.f32 %v890_v4  ;;  %v888_v23 = vmul.f32 0.70710677, %v1797_v61  ;;  %v1824_v29 = vadd.f32 %v1387_v41, %v1740_v36 }
  0xfc   : > { %v1506_v58 = vpop.eup %1505  ;;  %v1075_v59 = vmul.f32 %v1011_v50, %v819_v21  ;;  %v1009_v60 = vadd.f32 1.0, %v1504_v53  ;;  %1168 = vst [vmem:[%s1780_s30 + $0x100] sm:$0xff] %v1104_v54  ;;  %1525 = verf.f32 %v922_v10  ;;  %v1832_v34 = vadd.f32 %v1419_v46, %v1740_v36 }
  0xfd   : > { %v1508_v62 = vpop.eup %1507  ;;  %v1107_v63 = vmul.f32 %v1043_v55, %v851_v22  ;;  %v1041_v0 = vadd.f32 1.0, %v1506_v58  ;;  %v1805_v11 = vpop.f32.mrb[12].mxu0  ;;  %1527 = verf.f32 %v888_v23  ;;  %v1835_v35 = vadd.f32 %v1740_v36, %v596_v47 }
  0xfe   : > { %v1510_v5 = vpop.eup %1509  ;;  %1139 = vst [vmem:[%s1780_s30 + $0x18] sm:$0xff] %v1075_v59  ;;  %v1073_v7 = vmul.f32 %v1009_v60, %v817_v31  ;;  %v1014_v8 = vadd.f32 1.0, %v1508_v62  ;;  %v1807_v12 = vpop.f32.mrb[12].mxu1  ;;  %v823_v39 = vmul.f32 0.5, %v1765_v16  ;;  %v920_v41 = vmul.f32 0.70710677, %v1821_v28 }
  0xff   : > { %v1512_v13 = vpop.eup %1511  ;;  %1171 = vst [vmem:[%s1780_s30 + $0x118] sm:$0xff] %v1107_v63  ;;  %v1105_v14 = vmul.f32 %v1041_v0, %v849_v32  ;;  %v1046_v1 = vadd.f32 1.0, %v1510_v5  ;;  %v609_v19 = vpop.f32.mrb[13].mxu0  ;;  %v855_v43 = vmul.f32 0.5, %v1768_v17  ;;  %v891_v46 = vmul.f32 0.70710677, %v1824_v29 }
 0x100   : > { %v1811_v20 = vpop.f32.mrb[13].mxu1  ;;  %v1514_v21 = vpop.eup %1513  ;;  %1137 = vst [vmem:[%s1780_s30 + $0x8] sm:$0xff] %v1073_v7  ;;  %v1078_v2 = vmul.f32 %v1014_v8, %v822_v45  ;;  %v1012_v22 = vadd.f32 1.0, %v1512_v13  ;;  %v821_v45 = vmul.f32 0.5, %v1771_v18  ;;  %1529 = verf.f32 %v920_v41 }
 0x101   : > { %v1815_v24 = vpop.f32.mrb[14].mxu0  ;;  %v1817_v25 = vpop.f32.mrb[14].mxu1  ;;  %1169 = vst [vmem:[%s1780_s30 + $0x108] sm:$0xff] %v1105_v14  ;;  %v1110_v27 = vmul.f32 %v1046_v1, %v854_v3  ;;  %v1044_v6 = vadd.f32 1.0, %v1514_v21  ;;  %v923_v16 = vmul.f32 0.70710677, %v1832_v34  ;;  %1531 = verf.f32 %v891_v46 }
 0x102   : > { %v1826_v30 = vpop.f32.mrb[15].mxu0  ;;  %v1828_v31 = vpop.f32.mrb[15].mxu1  ;;  %1142 = vst [vmem:[%s1780_s30 + $0x30] sm:$0xff] %v1078_v2  ;;  %v1076_v33 = vmul.f32 %v1012_v22, %v820_v9  ;;  %v853_v51 = vmul.f32 0.5, %v1775_v26  ;;  %v889_v17 = vmul.f32 0.70710677, %v1835_v35  ;;  %v1853_v58 = vadd.f32 %v1740_v36, %v1786_v52 }
 0x103   : > { %v1516_v32 = vpop.eup %1515  ;;  %1174 = vst [vmem:[%s1780_s30 + $0x130] sm:$0xff] %v1110_v27  ;;  %v1108_v38 = vmul.f32 %v1044_v6, %v852_v15  ;;  %1533 = verf.f32 %v923_v16  ;;  %v1862_v26 = vadd.f32 %v1805_v11, %v1740_v36  ;;  %v1866_v62 = vadd.f32 %v1807_v12, %v1740_v36 }
 0x104   : > { %v1518_v37 = vpop.eup %1517  ;;  %v1015_v40 = vadd.f32 1.0, %v1516_v32  ;;  %1140 = vst [vmem:[%s1780_s30 + $0x20] sm:$0xff] %v1076_v33  ;;  %1535 = verf.f32 %v889_v17  ;;  %v1869_v63 = vadd.f32 %v1740_v36, %v609_v19  ;;  %v921_v5 = vmul.f32 0.70710677, %v1853_v58 }
 0x105   : > { %v1520_v42 = vpop.eup %1519  ;;  %v1047_v44 = vadd.f32 1.0, %v1518_v37  ;;  %1172 = vst [vmem:[%s1780_s30 + $0x120] sm:$0xff] %v1108_v38  ;;  %v1394_v53 = vpop.f32.mrb[16].mxu0  ;;  %v1879_v7 = vadd.f32 %v1740_v36, %v1811_v20  ;;  %v826_v11 = vmul.f32 0.5, %v1790_v56  ;;  %v858_v13 = vmul.f32 0.5, %v1793_v57 }
 0x106   : > { %v1079_v47 = vmul.f32 %v1015_v40, %v823_v39  ;;  %v1013_v48 = vadd.f32 1.0, %v1520_v42  ;;  %v1522_v49 = vpop.eup %1521  ;;  %v1848_v54 = vpop.f32.mrb[16].mxu1  ;;  %v894_v14 = vmul.f32 0.70710677, %v1862_v26  ;;  %v824_v15 = vmul.f32 0.5, %v1797_v61 }
 0x107   : > { %v1111_v50 = vmul.f32 %v1047_v44, %v855_v43  ;;  %v1045_v55 = vadd.f32 1.0, %v1522_v49  ;;  %v1855_v59 = vpop.f32.mrb[17].mxu0  ;;  %v1857_v60 = vpop.f32.mrb[17].mxu1  ;;  %1537 = verf.f32 %v921_v5  ;;  %v926_v19 = vmul.f32 0.70710677, %v1866_v62 }
 0x108   : > { %1143 = vst [vmem:[%s1780_s30 + $0x38] sm:$0xff] %v1079_v47  ;;  %v1077_v18 = vmul.f32 %v1013_v48, %v821_v45  ;;  %v1871_v52 = vpop.f32.mrb[18].mxu0  ;;  %v1873_v0 = vpop.f32.mrb[18].mxu1  ;;  %v856_v2 = vmul.f32 0.5, %v1821_v28  ;;  %1539 = verf.f32 %v894_v14  ;;  %v892_v56 = vmul.f32 0.70710677, %v1869_v63 }
 0x109   : > { %1175 = vst [vmem:[%s1780_s30 + $0x138] sm:$0xff] %v1111_v50  ;;  %v1524_v3 = vpop.eup %1523  ;;  %v1109_v4 = vmul.f32 %v1045_v55, %v853_v51  ;;  %v1881_v8 = vpop.f32.mrb[19].mxu0  ;;  %1541 = verf.f32 %v926_v19  ;;  %v924_v23 = vmul.f32 0.70710677, %v1879_v7  ;;  %v1897_v61 = vadd.f32 %v1815_v24, %v1740_v36 }
 0x10a   : > { %1141 = vst [vmem:[%s1780_s30 + $0x28] sm:$0xff] %v1077_v18  ;;  %v1883_v9 = vpop.f32.mrb[19].mxu1  ;;  %v1526_v10 = vpop.eup %1525  ;;  %v1018_v12 = vadd.f32 1.0, %v1524_v3  ;;  %1543 = verf.f32 %v892_v56  ;;  %v1901_v27 = vadd.f32 %v1817_v25, %v1740_v36  ;;  %v1905_v6 = vadd.f32 %v1740_v36, %v1826_v30 }
 0x10b   : > { %1173 = vst [vmem:[%s1780_s30 + $0x128] sm:$0xff] %v1109_v4  ;;  %v1050_v1 = vadd.f32 1.0, %v1526_v10  ;;  %v1528_v20 = vpop.eup %1527  ;;  %v827_v38 = vmul.f32 0.5, %v1824_v29  ;;  %1545 = verf.f32 %v924_v23  ;;  %v1915_v24 = vadd.f32 %v1740_v36, %v1828_v31 }
 0x10c   : > { %v1082_v21 = vmul.f32 %v1018_v12, %v826_v11  ;;  %v1016_v57 = vadd.f32 1.0, %v1528_v20  ;;  %v1530_v33 = vpop.eup %1529  ;;  %v859_v41 = vmul.f32 0.5, %v1832_v34  ;;  %v895_v42 = vmul.f32 0.70710677, %v1897_v61 }
 0x10d   : > { %v1114_v22 = vmul.f32 %v1050_v1, %v858_v13  ;;  %v1907_v28 = vpop.f32.mrb[20].mxu0  ;;  %v1532_v30 = vpop.eup %1531  ;;  %v1048_v40 = vadd.f32 1.0, %v1530_v33  ;;  %v1924_v43 = vadd.f32 %v1394_v53, %v1740_v36  ;;  %v825_v31 = vmul.f32 0.5, %v1835_v35 }
 0x10e   : > { %1146 = vst [vmem:[%s1780_s30 + $0x50] sm:$0xff] %v1082_v21  ;;  %v1909_v32 = vpop.f32.mrb[20].mxu1  ;;  %v1080_v37 = vmul.f32 %v1016_v57, %v824_v15  ;;  %v1917_v25 = vpop.f32.mrb[21].mxu0  ;;  %v1019_v45 = vadd.f32 1.0, %v1532_v30  ;;  %v927_v46 = vmul.f32 0.70710677, %v1901_v27  ;;  %1547 = verf.f32 %v895_v42 }
 0x10f   : > { %1178 = vst [vmem:[%s1780_s30 + $0x150] sm:$0xff] %v1114_v22  ;;  %v1919_v39 = vpop.f32.mrb[21].mxu1  ;;  %v1926_v44 = vpop.f32.mrb[22].mxu0  ;;  %v893_v47 = vmul.f32 0.70710677, %v1905_v6  ;;  %v1112_v16 = vmul.f32 %v1048_v40, %v856_v2  ;;  %v857_v49 = vmul.f32 0.5, %v1853_v58  ;;  %v1946_v10 = vadd.f32 %v1848_v54, %v1740_v36 }
 0x110   : > { %v1534_v29 = vpop.eup %1533  ;;  %1144 = vst [vmem:[%s1780_s30 + $0x40] sm:$0xff] %v1080_v37  ;;  %v1933_v50 = vpop.f32.mrb[22].mxu1  ;;  %v1083_v17 = vmul.f32 %v1019_v45, %v827_v38  ;;  %1549 = verf.f32 %v927_v46  ;;  %v925_v35 = vmul.f32 0.70710677, %v1915_v24  ;;  %v830_v3 = vmul.f32 0.5, %v1862_v26 }
 0x111   : > { %v1536_v48 = vpop.eup %1535  ;;  %v1051_v34 = vadd.f32 1.0, %v1534_v29  ;;  %v1935_v51 = vpop.f32.mrb[23].mxu0  ;;  %1176 = vst [vmem:[%s1780_s30 + $0x140] sm:$0xff] %v1112_v16  ;;  %1551 = verf.f32 %v893_v47  ;;  %v898_v58 = vmul.f32 0.70710677, %v1924_v43  ;;  %v1950_v11 = vadd.f32 %v1740_v36, %v1855_v59 }
 0x112   : > { %v1017_v53 = vadd.f32 1.0, %v1536_v48  ;;  %v1938_v18 = vpop.f32.mrb[23].mxu1  ;;  %v1538_v4 = vpop.eup %1537  ;;  %1147 = vst [vmem:[%s1780_s30 + $0x58] sm:$0xff] %v1083_v17  ;;  %1553 = verf.f32 %v925_v35  ;;  %v862_v26 = vmul.f32 0.5, %v1866_v62  ;;  %v1956_v14 = vadd.f32 %v1740_v36, %v1857_v60 }
 0x113   : > { %v1115_v55 = vmul.f32 %v1051_v34, %v859_v41  ;;  %v1540_v12 = vpop.eup %1539  ;;  %v1049_v13 = vadd.f32 1.0, %v1538_v4  ;;  %1555 = verf.f32 %v898_v58  ;;  %v828_v59 = vmul.f32 0.5, %v1869_v63 }
 0x114   : > { %v1081_v5 = vmul.f32 %v1017_v53, %v825_v31  ;;  %v1542_v54 = vpop.eup %1541  ;;  %v1022_v19 = vadd.f32 1.0, %v1540_v12  ;;  %v930_v20 = vmul.f32 0.70710677, %v1946_v10  ;;  %v1967_v21 = vadd.f32 %v1871_v52, %v1740_v36 }
 0x115   : > { %1179 = vst [vmem:[%s1780_s30 + $0x158] sm:$0xff] %v1115_v55  ;;  %v1958_v1 = vpop.f32.mrb[24].mxu0  ;;  %v1544_v60 = vpop.eup %1543  ;;  %v1113_v2 = vmul.f32 %v1049_v13, %v857_v49  ;;  %v1054_v56 = vadd.f32 1.0, %v1542_v54  ;;  %v860_v22 = vmul.f32 0.5, %v1879_v7  ;;  %v896_v57 = vmul.f32 0.70710677, %v1950_v11 }
 0x116   : > { %v1960_v15 = vpop.f32.mrb[24].mxu1  ;;  %1145 = vst [vmem:[%s1780_s30 + $0x48] sm:$0xff] %v1081_v5  ;;  %v1969_v62 = vpop.f32.mrb[25].mxu0  ;;  %v1086_v37 = vmul.f32 %v1022_v19, %v830_v3  ;;  %v1020_v38 = vadd.f32 1.0, %v1544_v60  ;;  %1557 = verf.f32 %v930_v20  ;;  %v928_v52 = vmul.f32 0.70710677, %v1956_v14 }
 0x117   : > { %v1973_v23 = vpop.f32.mrb[25].mxu1  ;;  %v1975_v63 = vpop.f32.mrb[26].mxu0  ;;  %1177 = vst [vmem:[%s1780_s30 + $0x148] sm:$0xff] %v1113_v2  ;;  %v1118_v7 = vmul.f32 %v1054_v56, %v862_v26  ;;  %v831_v42 = vmul.f32 0.5, %v1897_v61  ;;  %1559 = verf.f32 %v896_v57  ;;  %v899_v31 = vmul.f32 0.70710677, %v1967_v21 }
 0x118   : > { %v1546_v33 = vpop.eup %1545  ;;  %v1978_v30 = vpop.f32.mrb[26].mxu1  ;;  %1150 = vst [vmem:[%s1780_s30 + $0x70] sm:$0xff] %v1086_v37  ;;  %v1084_v45 = vmul.f32 %v1020_v38, %v828_v59  ;;  %1561 = verf.f32 %v928_v52  ;;  %v1990_v46 = vadd.f32 %v1873_v0, %v1740_v36  ;;  %v863_v16 = vmul.f32 0.5, %v1901_v27 }
 0x119   : > { %v1980_v40 = vpop.f32.mrb[27].mxu0  ;;  %v1052_v41 = vadd.f32 1.0, %v1546_v33  ;;  %v1984_v29 = vpop.f32.mrb[27].mxu1  ;;  %1182 = vst [vmem:[%s1780_s30 + $0x170] sm:$0xff] %v1118_v7  ;;  %v1996_v61 = vadd.f32 %v1740_v36, %v1881_v8  ;;  %v2000_v34 = vadd.f32 %v1740_v36, %v1883_v9  ;;  %1563 = verf.f32 %v899_v31 }
 0x11a   : > { %v1548_v47 = vpop.eup %1547  ;;  %1148 = vst [vmem:[%s1780_s30 + $0x60] sm:$0xff] %v1084_v45  ;;  %v931_v0 = vmul.f32 0.70710677, %v1990_v46  ;;  %v2006_v53 = vadd.f32 %v1907_v28, %v1740_v36  ;;  %v829_v8 = vmul.f32 0.5, %v1905_v6  ;;  %v861_v55 = vmul.f32 0.5, %v1915_v24 }
 0x11b   : > { %v1116_v48 = vmul.f32 %v1052_v41, %v860_v22  ;;  %v1550_v49 = vpop.eup %1549  ;;  %v1023_v17 = vadd.f32 1.0, %v1548_v47  ;;  %v897_v9 = vmul.f32 0.70710677, %v1996_v61  ;;  %v929_v12 = vmul.f32 0.70710677, %v2000_v34 }
 0x11c   : > { %v1552_v35 = vpop.eup %1551  ;;  %v1055_v27 = vadd.f32 1.0, %v1550_v49  ;;  %1565 = verf.f32 %v931_v0  ;;  %v834_v24 = vmul.f32 0.5, %v1924_v43  ;;  %v902_v2 = vmul.f32 0.70710677, %v2006_v53 }
 0x11d   : > { %1180 = vst [vmem:[%s1780_s30 + $0x160] sm:$0xff] %v1116_v48  ;;  %v2012_v3 = vpop.f32.mrb[28].mxu0  ;;  %v1554_v58 = vpop.eup %1553  ;;  %v1087_v4 = vmul.f32 %v1023_v17, %v831_v42  ;;  %v1021_v5 = vadd.f32 1.0, %v1552_v35  ;;  %1567 = verf.f32 %v897_v9  ;;  %v2033_v43 = vadd.f32 %v1909_v32, %v1740_v36 }
 0x11e   : > { %v2015_v28 = vpop.f32.mrb[28].mxu1  ;;  %v2017_v13 = vpop.f32.mrb[29].mxu0  ;;  %v1119_v6 = vmul.f32 %v1055_v27, %v863_v16  ;;  %v1053_v54 = vadd.f32 1.0, %v1554_v58  ;;  %1569 = verf.f32 %v929_v12  ;;  %v2037_v33 = vadd.f32 %v1740_v36, %v1917_v25 }
 0x11f   : > { %v1556_v26 = vpop.eup %1555  ;;  %v2020_v19 = vpop.f32.mrb[29].mxu1  ;;  %1151 = vst [vmem:[%s1780_s30 + $0x78] sm:$0xff] %v1087_v4  ;;  %v1085_v20 = vmul.f32 %v1021_v5, %v829_v8  ;;  %v2041_v37 = vadd.f32 %v1740_v36, %v1919_v39  ;;  %v866_v41 = vmul.f32 0.5, %v1946_v10  ;;  %1571 = verf.f32 %v902_v2 }
 0x120   : > { %v2022_v59 = vpop.f32.mrb[30].mxu0  ;;  %v1026_v60 = vadd.f32 1.0, %v1556_v26  ;;  %v2026_v56 = vpop.f32.mrb[30].mxu1  ;;  %1183 = vst [vmem:[%s1780_s30 + $0x178] sm:$0xff] %v1119_v6  ;;  %v1117_v57 = vmul.f32 %v1053_v54, %v861_v55  ;;  %v2049_v32 = vadd.f32 %v1926_v44, %v1740_v36  ;;  %v832_v45 = vmul.f32 0.5, %v1950_v11 }
 0x121   : > { %v2028_v22 = vpop.f32.mrb[31].mxu0  ;;  %v2043_v38 = vpop.f32.mrb[31].mxu1  ;;  %1149 = vst [vmem:[%s1780_s30 + $0x68] sm:$0xff] %v1085_v20  ;;  %v934_v39 = vmul.f32 0.70710677, %v2033_v43  ;;  %v2056_v31 = vadd.f32 %v1933_v50, %v1740_v36  ;;  %v864_v48 = vmul.f32 0.5, %v1956_v14  ;;  %v2078_v58 = vadd.f32 %v1958_v1, %v1740_v36 }
 0x122   : > { %v1558_v52 = vpop.eup %1557  ;;  %v1090_v7 = vmul.f32 %v1026_v60, %v834_v24  ;;  %1181 = vst [vmem:[%s1780_s30 + $0x168] sm:$0xff] %v1117_v57  ;;  %v900_v44 = vmul.f32 0.70710677, %v2037_v33  ;;  %v932_v16 = vmul.f32 0.70710677, %v2041_v37  ;;  %v835_v11 = vmul.f32 0.5, %v1967_v21 }
 0x123   : > { %v1560_v42 = vpop.eup %1559  ;;  %v1058_v25 = vadd.f32 1.0, %v1558_v52  ;;  %1573 = verf.f32 %v934_v39  ;;  %v867_v50 = vmul.f32 0.5, %v1990_v46  ;;  %v903_v27 = vmul.f32 0.70710677, %v2049_v32 }
 0x124   : > { %v1562_v47 = vpop.eup %1561  ;;  %1154 = vst [vmem:[%s1780_s30 + $0x90] sm:$0xff] %v1090_v7  ;;  %v1024_v10 = vadd.f32 1.0, %v1560_v42  ;;  %1575 = verf.f32 %v900_v44  ;;  %v935_v55 = vmul.f32 0.70710677, %v2056_v31  ;;  %v2070_v21 = vadd.f32 %v1740_v36, %v1935_v51 }
 0x125   : > { %v1122_v49 = vmul.f32 %v1058_v25, %v866_v41  ;;  %v1056_v17 = vadd.f32 1.0, %v1562_v47  ;;  %v1564_v0 = vpop.eup %1563  ;;  %1577 = verf.f32 %v932_v16  ;;  %v2074_v46 = vadd.f32 %v1740_v36, %v1938_v18 }
 0x126   : > { %v1088_v35 = vmul.f32 %v1024_v10, %v832_v45  ;;  %v1027_v8 = vadd.f32 1.0, %v1564_v0  ;;  %v1566_v9 = vpop.eup %1565  ;;  %1579 = verf.f32 %v903_v27  ;;  %v2083_v26 = vadd.f32 %v1960_v15, %v1740_v36 }
 0x127   : > { %1186 = vst [vmem:[%s1780_s30 + $0x190] sm:$0xff] %v1122_v49  ;;  %v1120_v14 = vmul.f32 %v1056_v17, %v864_v48  ;;  %v1568_v4 = vpop.eup %1567  ;;  %v1059_v12 = vadd.f32 1.0, %v1566_v9  ;;  %1581 = verf.f32 %v935_v55  ;;  %v833_v6 = vmul.f32 0.5, %v1996_v61 }
 0x128   : > { %1152 = vst [vmem:[%s1780_s30 + $0x80] sm:$0xff] %v1088_v35  ;;  %v1091_v5 = vmul.f32 %v1027_v8, %v835_v11  ;;  %v1570_v51 = vpop.eup %1569  ;;  %v1025_v54 = vadd.f32 1.0, %v1568_v4  ;;  %v901_v18 = vmul.f32 0.70710677, %v2070_v21  ;;  %v865_v24 = vmul.f32 0.5, %v2000_v34 }
 0x129   : > { %1184 = vst [vmem:[%s1780_s30 + $0x180] sm:$0xff] %v1120_v14  ;;  %v1123_v1 = vmul.f32 %v1059_v12, %v867_v50  ;;  %v1057_v20 = vadd.f32 1.0, %v1570_v51  ;;  %v933_v60 = vmul.f32 0.70710677, %v2074_v46  ;;  %v1572_v2 = vpop.eup %1571  ;;  %v838_v15 = vmul.f32 0.5, %v2006_v53 }
 0x12a   : > { %1155 = vst [vmem:[%s1780_s30 + $0x98] sm:$0xff] %v1091_v5  ;;  %v1089_v57 = vmul.f32 %v1025_v54, %v833_v6  ;;  %1583 = verf.f32 %v901_v18  ;;  %v906_v52 = vmul.f32 0.70710677, %v2078_v58  ;;  %v1030_v7 = vadd.f32 1.0, %v1572_v2 }
 0x12b   : > { %1187 = vst [vmem:[%s1780_s30 + $0x198] sm:$0xff] %v1123_v1  ;;  %v1121_v61 = vmul.f32 %v1057_v20, %v865_v24  ;;  %1585 = verf.f32 %v933_v60  ;;  %v938_v41 = vmul.f32 0.70710677, %v2083_v26  ;;  %v2097_v34 = vadd.f32 %v1740_v36, %v1969_v62 }
 0x12c   : > { %1153 = vst [vmem:[%s1780_s30 + $0x88] sm:$0xff] %v1089_v57  ;;  %1587 = verf.f32 %v906_v52  ;;  %v2101_v42 = vadd.f32 %v1740_v36, %v1973_v23  ;;  %v2105_v53 = vadd.f32 %v1975_v63, %v1740_v36  ;;  %v1094_v45 = vmul.f32 %v1030_v7, %v838_v15 }
 0x12d   : > { %v1574_v25 = vpop.eup %1573  ;;  %1185 = vst [vmem:[%s1780_s30 + $0x188] sm:$0xff] %v1121_v61  ;;  %v870_v39 = vmul.f32 0.5, %v2033_v43  ;;  %1589 = verf.f32 %v938_v41  ;;  %v2111_v47 = vadd.f32 %v1978_v30, %v1740_v36  ;;  %v836_v48 = vmul.f32 0.5, %v2037_v33 }
 0x12e   : > { %v1576_v62 = vpop.eup %1575  ;;  %v1062_v10 = vadd.f32 1.0, %v1574_v25  ;;  %v868_v23 = vmul.f32 0.5, %v2041_v37  ;;  %v904_v44 = vmul.f32 0.70710677, %v2097_v34  ;;  %1158 = vst [vmem:[%s1780_s30 + $0xb0] sm:$0xff] %v1094_v45  ;;  %v2121_v30 = vadd.f32 %v1740_v36, %v1980_v40 }
 0x12f   : > { %v1578_v63 = vpop.eup %1577  ;;  %v1028_v16 = vadd.f32 1.0, %v1576_v62  ;;  %v936_v49 = vmul.f32 0.70710677, %v2101_v42  ;;  %v907_v43 = vmul.f32 0.70710677, %v2105_v53  ;;  %v839_v37 = vmul.f32 0.5, %v2049_v32 }
 0x130   : > { %v1580_v17 = vpop.eup %1579  ;;  %v1126_v11 = vmul.f32 %v1062_v10, %v870_v39  ;;  %v1060_v33 = vadd.f32 1.0, %v1578_v63  ;;  %1591 = verf.f32 %v904_v44  ;;  %v939_v27 = vmul.f32 0.70710677, %v2111_v47 }
 0x131   : > { %v1582_v0 = vpop.eup %1581  ;;  %v1092_v35 = vmul.f32 %v1028_v16, %v836_v48  ;;  %v1031_v50 = vadd.f32 1.0, %v1580_v17  ;;  %1593 = verf.f32 %v936_v49  ;;  %v871_v40 = vmul.f32 0.5, %v2056_v31 }
 0x132   : > { %1190 = vst [vmem:[%s1780_s30 + $0x1b0] sm:$0xff] %v1126_v11  ;;  %v1124_v14 = vmul.f32 %v1060_v33, %v868_v23  ;;  %v1063_v8 = vadd.f32 1.0, %v1582_v0  ;;  %1595 = verf.f32 %v907_v43  ;;  %v905_v32 = vmul.f32 0.70710677, %v2121_v30  ;;  %v1619_v11 = vld [vmem:[%s2216_s2] ss:$0 sm:$0xff] }
 0x133   : > { %1156 = vst [vmem:[%s1780_s30 + $0xa0] sm:$0xff] %v1092_v35  ;;  %v1095_v55 = vmul.f32 %v1031_v50, %v839_v37  ;;  %1597 = verf.f32 %v939_v27  ;;  %v2131_v9 = vadd.f32 %v1740_v36, %v1984_v29  ;;  %v837_v12 = vmul.f32 0.5, %v2070_v21 }
 0x134   : > { %v1584_v4 = vpop.eup %1583  ;;  %1188 = vst [vmem:[%s1780_s30 + $0x1a0] sm:$0xff] %v1124_v14  ;;  %v1127_v5 = vmul.f32 %v1063_v8, %v871_v40  ;;  %v2137_v31 = vadd.f32 %v2012_v3, %v1740_v36  ;;  %v2141_v51 = vadd.f32 %v2015_v28, %v1740_v36  ;;  %1599 = verf.f32 %v905_v32 }
 0x135   : > { %v1586_v6 = vpop.eup %1585  ;;  %1159 = vst [vmem:[%s1780_s30 + $0xb8] sm:$0xff] %v1095_v55  ;;  %v1029_v54 = vadd.f32 1.0, %v1584_v4  ;;  %v937_v29 = vmul.f32 0.70710677, %v2131_v9  ;;  %v2147_v18 = vadd.f32 %v1740_v36, %v2017_v13  ;;  %v869_v3 = vmul.f32 0.5, %v2074_v46 }
 0x136   : > { %v1588_v21 = vpop.eup %1587  ;;  %1191 = vst [vmem:[%s1780_s30 + $0x1b8] sm:$0xff] %v1127_v5  ;;  %v1061_v1 = vadd.f32 1.0, %v1586_v6  ;;  %v842_v24 = vmul.f32 0.5, %v2078_v58  ;;  %v910_v28 = vmul.f32 0.70710677, %v2137_v31  ;;  %v874_v13 = vmul.f32 0.5, %v2083_v26 }
 0x137   : > { %v1590_v20 = vpop.eup %1589  ;;  %v1093_v60 = vmul.f32 %v1029_v54, %v837_v12  ;;  %v1034_v2 = vadd.f32 1.0, %v1588_v21  ;;  %1601 = verf.f32 %v937_v29  ;;  %v942_v57 = vmul.f32 0.70710677, %v2141_v51 }
 0x138   : > { %v1125_v15 = vmul.f32 %v1061_v1, %v869_v3  ;;  %v1066_v52 = vadd.f32 1.0, %v1590_v20  ;;  %1603 = verf.f32 %v910_v28  ;;  %v908_v58 = vmul.f32 0.70710677, %v2147_v18 }
 0x139   : > { %1157 = vst [vmem:[%s1780_s30 + $0xa8] sm:$0xff] %v1093_v60  ;;  %v1098_v46 = vmul.f32 %v1034_v2, %v842_v24  ;;  %1605 = verf.f32 %v942_v57  ;;  %v2159_v61 = vadd.f32 %v1740_v36, %v2020_v19  ;;  %v840_v25 = vmul.f32 0.5, %v2097_v34 }
 0x13a   : > { %v1592_v7 = vpop.eup %1591  ;;  %1189 = vst [vmem:[%s1780_s30 + $0x1a8] sm:$0xff] %v1125_v15  ;;  %v1130_v41 = vmul.f32 %v1066_v52, %v874_v13  ;;  %v2165_v26 = vadd.f32 %v2022_v59, %v1740_v36  ;;  %v2169_v45 = vadd.f32 %v2026_v56, %v1740_v36  ;;  %1607 = verf.f32 %v908_v58 }
 0x13b   : > { %v1594_v39 = vpop.eup %1593  ;;  %1162 = vst [vmem:[%s1780_s30 + $0xd0] sm:$0xff] %v1098_v46  ;;  %v1032_v62 = vadd.f32 1.0, %v1592_v7  ;;  %v940_v19 = vmul.f32 0.70710677, %v2159_v61  ;;  %v2175_v10 = vadd.f32 %v1740_v36, %v2028_v22  ;;  %v872_v59 = vmul.f32 0.5, %v2101_v42 }
 0x13c   : > { %v1596_v48 = vpop.eup %1595  ;;  %1194 = vst [vmem:[%s1780_s30 + $0x1d0] sm:$0xff] %v1130_v41  ;;  %v1064_v34 = vadd.f32 1.0, %v1594_v39  ;;  %v843_v23 = vmul.f32 0.5, %v2105_v53  ;;  %v911_v56 = vmul.f32 0.70710677, %v2165_v26  ;;  %v875_v36 = vmul.f32 0.5, %v2111_v47 }
 0x13d   : > { %v1598_v44 = vpop.eup %1597  ;;  %v1096_v63 = vmul.f32 %v1032_v62, %v840_v25  ;;  %v1035_v16 = vadd.f32 1.0, %v1596_v48  ;;  %1609 = verf.f32 %v940_v19  ;;  %v943_v49 = vmul.f32 0.70710677, %v2169_v45 }
 0x13e   : > { %v1128_v43 = vmul.f32 %v1064_v34, %v872_v59  ;;  %v1067_v22 = vadd.f32 1.0, %v1598_v44  ;;  %1611 = verf.f32 %v911_v56  ;;  %v1600_v17 = vpop.eup %1599  ;;  %v909_v53 = vmul.f32 0.70710677, %v2175_v10 }
 0x13f   : > { %1160 = vst [vmem:[%s1780_s30 + $0xc0] sm:$0xff] %v1096_v63  ;;  %v1099_v42 = vmul.f32 %v1035_v16, %v843_v23  ;;  %1613 = verf.f32 %v943_v49  ;;  %v805_v33 = vadd.f32 %v1619_v11, %v2043_v38  ;;  %v841_v47 = vmul.f32 0.5, %v2121_v30 }
 0x140   : > { %1192 = vst [vmem:[%s1780_s30 + $0x1c0] sm:$0xff] %v1128_v43  ;;  %v1131_v37 = vmul.f32 %v1067_v22, %v875_v36  ;;  %v1033_v0 = vadd.f32 1.0, %v1600_v17  ;;  %1615 = verf.f32 %v909_v53  ;;  %v873_v40 = vmul.f32 0.5, %v2131_v9 }
 0x141   : > { %v1602_v35 = vpop.eup %1601  ;;  %1163 = vst [vmem:[%s1780_s30 + $0xd8] sm:$0xff] %v1099_v42  ;;  %v941_v50 = vmul.f32 0.70710677, %v805_v33  ;;  %v846_v38 = vmul.f32 0.5, %v2137_v31  ;;  %v878_v4 = vmul.f32 0.5, %v2141_v51  ;;  %v844_v9 = vmul.f32 0.5, %v2147_v18 }
 0x142   : > { %v1604_v27 = vpop.eup %1603  ;;  %1195 = vst [vmem:[%s1780_s30 + $0x1d8] sm:$0xff] %v1131_v37  ;;  %v1097_v14 = vmul.f32 %v1033_v0, %v841_v47  ;;  %v1065_v8 = vadd.f32 1.0, %v1602_v35  ;;  %v876_v1 = vmul.f32 0.5, %v2159_v61  ;;  %v847_v28 = vmul.f32 0.5, %v2165_v26 }
 0x143   : > { %v1606_v55 = vpop.eup %1605  ;;  %v1038_v32 = vadd.f32 1.0, %v1604_v27  ;;  %1617 = verf.f32 %v941_v50  ;;  %v879_v18 = vmul.f32 0.5, %v2169_v45  ;;  %v845_v52 = vmul.f32 0.5, %v2175_v10 }
 0x144   : > { %1161 = vst [vmem:[%s1780_s30 + $0xc8] sm:$0xff] %v1097_v14  ;;  %v1129_v30 = vmul.f32 %v1065_v8, %v873_v40  ;;  %v1070_v5 = vadd.f32 1.0, %v1606_v55  ;;  %v1608_v12 = vpop.eup %1607  ;;  %v877_v7 = vmul.f32 0.5, %v805_v33 }
 0x145   : > { %v1102_v6 = vmul.f32 %v1038_v32, %v846_v38  ;;  %v1036_v29 = vadd.f32 1.0, %v1608_v12 }
 0x146   : > { %1193 = vst [vmem:[%s1780_s30 + $0x1c8] sm:$0xff] %v1129_v30  ;;  %v1134_v54 = vmul.f32 %v1070_v5, %v878_v4 }
 0x147   : > { %v1610_v21 = vpop.eup %1609  ;;  %1166 = vst [vmem:[%s1780_s30 + $0xf0] sm:$0xff] %v1102_v6  ;;  %v1100_v3 = vmul.f32 %v1036_v29, %v844_v9 }
 0x148   : > { %v1612_v31 = vpop.eup %1611  ;;  %1198 = vst [vmem:[%s1780_s30 + $0x1f0] sm:$0xff] %v1134_v54  ;;  %v1068_v24 = vadd.f32 1.0, %v1610_v21 }
 0x149   : > { %v1614_v51 = vpop.eup %1613  ;;  %v1039_v20 = vadd.f32 1.0, %v1612_v31  ;;  %1164 = vst [vmem:[%s1780_s30 + $0xe0] sm:$0xff] %v1100_v3 }
 0x14a   : > { %v1132_v60 = vmul.f32 %v1068_v24, %v876_v1  ;;  %v1071_v2 = vadd.f32 1.0, %v1614_v51  ;;  %v1616_v57 = vpop.eup %1615 }
 0x14b   : > { %v1103_v15 = vmul.f32 %v1039_v20, %v847_v28  ;;  %v1037_v46 = vadd.f32 1.0, %v1616_v57 }
 0x14c   : > { %1196 = vst [vmem:[%s1780_s30 + $0x1e0] sm:$0xff] %v1132_v60  ;;  %v1135_v13 = vmul.f32 %v1071_v2, %v879_v18 }
 0x14d   : > { %v1618_v58 = vpop.eup %1617  ;;  %1167 = vst [vmem:[%s1780_s30 + $0xf8] sm:$0xff] %v1103_v15  ;;  %v1101_v61 = vmul.f32 %v1037_v46, %v845_v52 }
 0x14e   : > { %1199 = vst [vmem:[%s1780_s30 + $0x1f8] sm:$0xff] %v1135_v13  ;;  %v1069_v41 = vadd.f32 1.0, %v1618_v58 }
 0x14f   : > { %1165 = vst [vmem:[%s1780_s30 + $0xe8] sm:$0xff] %v1101_v61 }
 0x150   : > { %v1133_v25 = vmul.f32 %v1069_v41, %v877_v7 }
 0x152   : > { %1197 = vst [vmem:[%s1780_s30 + $0x1e8] sm:$0xff] %v1133_v25 }
 0x153 PF: > { %s13_s12 = sadd.s32 1, %s1626_s12  }
 0x154   : > { %p10_p4 = scmp.ge.s32.totalorder %s13_s12, 10  }
 0x156   :  { %12 = sbr.rel (!%p10_p4) target bundleno = 1 (0x1), region = 62 }

// kernel: mlp_block2.17
= control target key start
LH: loop header
LB: loop body
LE: loop exit
PB: predicated region body
PF: predicated region fallthrough
CT: control target
= control target key end

     0   :  { %s1925_s18 = smov 0   ;;  %s1927_s19 = smov 0   ;;  %s2241_s0 = inlined_call_operand.vmem [shape: bf16[256,128], index: 0, kind: input, shape index: {}]   ;;  %s2242_s1 = inlined_call_operand.vmem [shape: bf16[128,256], index: 1, kind: input, shape index: {}]   ;;  %s2243_s2 = inlined_call_operand.vmem [shape: f32[1,256], index: 2, kind: input, shape index: {}]   ;;  %s2244_s3 = inlined_call_operand.vmem [shape: bf16[256,128], index: 3, kind: input, shape index: {}]   ;;  %s2245_s4 = inlined_call_operand.vmem [shape: bf16[128,256], index: 4, kind: input, shape index: {}]   ;;  %s2246_s5 = inlined_call_operand.vmem [shape: bf16[256,256], index: 5, kind: output, shape index: {}]  }
   0x1   :  { %s1929_s20 = smov 0  }
   0x2 LB: > { %s34_s21 = sadd.s32 1, %s1888_s19  ;;  %p1594_p0 = scmp.ge.s32.totalorder %s1892_s20, 1  ;;  %s1892_s20 = sphi %s1929_s20, %s15_s20   ;;  %s1888_s19 = sphi %s1927_s19, %s2248_s19   ;;  %s1884_s18 = sphi %s1925_s18, %s2247_s18  }
   0x3   : > { %p36_p1 = scmp.ge.s32.totalorder %s34_s21, 2  ;;  %p265_p2 = scmp.lt.s32.totalorder %s1892_s20, 3 }
   0x5   : > { %s2250_s21 = smov (%p36_p1, %s34_s21), 0  ;;  %p266_p3 = pnand %p1594_p0, %p265_p2 }
   0x6   : > { %v1742_v0 = vld [vmem:[%s2242_s1 + $0x4] ss:$8 sps:$4 sm:$0xff] (!%p266_p3)   ;;  %v1894_v2 = vmov (!%p266_p3), 0   ;;  %v1746_v3 = vld [vmem:[%s2242_s1] ss:$8 sps:$4 sm:$0xff] (!%p266_p3)   ;;  %s1595_s15 = sshll.u32 (!%p266_p3), %s1884_s18, 4  ;;  %v1123_v49 = vlaneseq (!%p266_p3) }
   0x7   : > { %269 = sbr.rel (%p266_p3) target bundleno = 336 (0x150), region = 40  ;;  %v1744_v1 = vld [vmem:[%s2245_s4 + $0x4] ss:$8 sps:$4 sm:$0xff] (!%p266_p3)   ;;  %636 = vmatprep.mubr.bf16.mxu1 (!%p266_p3), %v1894_v2  ;;  %1008 = vmatprep.mubr.bf16.mxu0 (!%p266_p3), %v1894_v2  ;;  %v1747_v4 = vld [vmem:[%s2245_s4] ss:$8 sps:$4 sm:$0xff] (!%p266_p3)   ;;  %p326_p4 = scmp.lt.s32.totalorder (!%p266_p3), %s1595_s15, 31 }
   0x8   : > { %604 = vmatprep.subr.bf16.mxu1 (!%p266_p3), %v1742_v0  ;;  %976 = vmatprep.subr.bf16.mxu0 (!%p266_p3), %v1744_v1  ;;  %v1748_v5 = vld [vmem:[%s2242_s1 + $0x14] ss:$8 sps:$4 sm:$0xff] (!%p266_p3)   ;;  %v1752_v7 = vld [vmem:[%s2242_s1 + $0x10] ss:$8 sps:$4 sm:$0xff] (!%p266_p3)   ;;  %v1754_v9 = vld [vmem:[%s2242_s1 + $0x24] ss:$8 sps:$4 sm:$0xff] (!%p266_p3)  }
   0x9   : > { %605 = vmatpush1.bf16.msra.mxu1 (!%p266_p3), %v1746_v3  ;;  %977 = vmatpush1.bf16.msra.mxu0 (!%p266_p3), %v1747_v4  ;;  %v1750_v6 = vld [vmem:[%s2245_s4 + $0x14] ss:$8 sps:$4 sm:$0xff] (!%p266_p3)   ;;  %v1753_v8 = vld [vmem:[%s2245_s4 + $0x10] ss:$8 sps:$4 sm:$0xff] (!%p266_p3)   ;;  %v1756_v10 = vld [vmem:[%s2245_s4 + $0x24] ss:$8 sps:$4 sm:$0xff] (!%p266_p3)  }
   0xa   : > { %606 = vmatprep.subr.bf16.mxu1 (!%p266_p3), %v1748_v5  ;;  %978 = vmatprep.subr.bf16.mxu0 (!%p266_p3), %v1750_v6  ;;  %v1758_v11 = vld [vmem:[%s2242_s1 + $0x20] ss:$8 sps:$4 sm:$0xff] (!%p266_p3)   ;;  %v1760_v13 = vld [vmem:[%s2242_s1 + $0x34] ss:$8 sps:$4 sm:$0xff] (!%p266_p3)   ;;  %v1764_v15 = vld [vmem:[%s2242_s1 + $0x30] ss:$8 sps:$4 sm:$0xff] (!%p266_p3)  }
   0xb   : > { %v1759_v12 = vld [vmem:[%s2245_s4 + $0x20] ss:$8 sps:$4 sm:$0xff] (!%p266_p3)   ;;  %v1762_v14 = vld [vmem:[%s2245_s4 + $0x34] ss:$8 sps:$4 sm:$0xff] (!%p266_p3)   ;;  %v1765_v16 = vld [vmem:[%s2245_s4 + $0x30] ss:$8 sps:$4 sm:$0xff] (!%p266_p3)  }
   0xc   : > { %v1766_v17 = vld [vmem:[%s2242_s1 + $0x44] ss:$8 sps:$4 sm:$0xff] (!%p266_p3)   ;;  %v1770_v19 = vld [vmem:[%s2242_s1 + $0x40] ss:$8 sps:$4 sm:$0xff] (!%p266_p3)   ;;  %v1772_v21 = vld [vmem:[%s2242_s1 + $0x54] ss:$8 sps:$4 sm:$0xff] (!%p266_p3)  }
   0xd   : > { %607 = vmatpush1.bf16.msra.mxu1 (!%p266_p3), %v1752_v7  ;;  %979 = vmatpush1.bf16.msra.mxu0 (!%p266_p3), %v1753_v8  ;;  %v1768_v18 = vld [vmem:[%s2245_s4 + $0x44] ss:$8 sps:$4 sm:$0xff] (!%p266_p3)   ;;  %v1771_v20 = vld [vmem:[%s2245_s4 + $0x40] ss:$8 sps:$4 sm:$0xff] (!%p266_p3)   ;;  %v1774_v22 = vld [vmem:[%s2245_s4 + $0x54] ss:$8 sps:$4 sm:$0xff] (!%p266_p3)  }
   0xe   : > { %608 = vmatprep.subr.bf16.mxu1 %v1754_v9  ;;  %980 = vmatprep.subr.bf16.mxu0 %v1756_v10  ;;  %s2252_s15 = smov (!%p326_p4, %s1595_s15), 31  ;;  %v1776_v23 = vld [vmem:[%s2242_s1 + $0x50] ss:$8 sps:$4 sm:$0xff]   ;;  %v1778_v25 = vld [vmem:[%s2242_s1 + $0x64] ss:$8 sps:$4 sm:$0xff]   ;;  %v1124_v50 = vshrl.u32 %v1123_v49, 7 }
   0xf   : > { %s1596_s25 = sshll.u32 %s2252_s15, 2  ;;  %v1777_v24 = vld [vmem:[%s2245_s4 + $0x50] ss:$8 sps:$4 sm:$0xff]   ;;  %v1780_v26 = vld [vmem:[%s2245_s4 + $0x64] ss:$8 sps:$4 sm:$0xff]   ;;  %s1668_s7 = sshll.u32 %s2252_s15, 3 }
  0x10   : > { %s2029_s8 = scalar_lea.vmem %s2241_s0, %s1596_s25  ;;  %s2037_s13 = scalar_lea.vmem %s2244_s3, %s1596_s25  ;;  %v1782_v27 = vld [vmem:[%s2242_s1 + $0x60] ss:$8 sps:$4 sm:$0xff]   ;;  %v1784_v29 = vld [vmem:[%s2242_s1 + $0x74] ss:$8 sps:$4 sm:$0xff]   ;;  %v1788_v31 = vld [vmem:[%s2242_s1 + $0x70] ss:$8 sps:$4 sm:$0xff]  }
  0x11   : > { %609 = vmatpush1.bf16.msra.mxu1 %v1758_v11  ;;  %981 = vmatpush1.bf16.msra.mxu0 %v1759_v12  ;;  %v1783_v28 = vld [vmem:[%s2245_s4 + $0x60] ss:$8 sps:$4 sm:$0xff]   ;;  %v1786_v30 = vld [vmem:[%s2245_s4 + $0x74] ss:$8 sps:$4 sm:$0xff]   ;;  %v1789_v32 = vld [vmem:[%s2245_s4 + $0x70] ss:$8 sps:$4 sm:$0xff]   ;;  %s2116_s9 = scalar_lea.vmem %s2246_s5, %s1668_s7 }
  0x12   : > { %610 = vmatprep.subr.bf16.mxu1 %v1760_v13  ;;  %982 = vmatprep.subr.bf16.mxu0 %v1762_v14  ;;  %v1790_v33 = vld [vmem:[%s2029_s8] sm:$0xff]   ;;  %v1792_v35 = vld [vmem:[%s2029_s8 + $0x8] sm:$0xff]   ;;  %v1794_v37 = vld [vmem:[%s2029_s8 + $0x10] sm:$0xff]   ;;  %v1125_v51 = vsub.s32 0, %v1124_v50  ;;  %v1129_v53 = vsub.s32 1, %v1124_v50 }
  0x13   : > { %v1791_v34 = vld [vmem:[%s2037_s13] sm:$0xff]   ;;  %v1793_v36 = vld [vmem:[%s2037_s13 + $0x8] sm:$0xff]   ;;  %v1795_v38 = vld [vmem:[%s2037_s13 + $0x10] sm:$0xff]  }
  0x14   : > { %v1796_v39 = vld [vmem:[%s2029_s8 + $0x18] sm:$0xff]   ;;  %v1798_v41 = vld [vmem:[%s2029_s8 + $0x20] sm:$0xff]   ;;  %v1800_v43 = vld [vmem:[%s2029_s8 + $0x28] sm:$0xff]  }
  0x15   : > { %611 = vmatpush1.bf16.msra.mxu1 %v1764_v15  ;;  %983 = vmatpush1.bf16.msra.mxu0 %v1765_v16  ;;  %v1797_v40 = vld [vmem:[%s2037_s13 + $0x18] sm:$0xff]   ;;  %v1799_v42 = vld [vmem:[%s2037_s13 + $0x20] sm:$0xff]   ;;  %v1801_v44 = vld [vmem:[%s2037_s13 + $0x28] sm:$0xff]  }
  0x16   : > { %612 = vmatprep.subr.bf16.mxu1 %v1766_v17  ;;  %984 = vmatprep.subr.bf16.mxu0 %v1768_v18  ;;  %v1802_v45 = vld [vmem:[%s2029_s8 + $0x30] sm:$0xff]   ;;  %v1804_v47 = vld [vmem:[%s2029_s8 + $0x38] sm:$0xff]   ;;  %v1121_v52 = vld [vmem:[%s2243_s2] sm:$0x3] }
  0x17   : > { %v1803_v46 = vld [vmem:[%s2037_s13 + $0x30] sm:$0xff]   ;;  %v1805_v48 = vld [vmem:[%s2037_s13 + $0x38] sm:$0xff]   ;;  %v2090_v54 = vrot.slane %v1121_v52, %v1125_v51  ;;  %v2092_v57 = vrot.slane %v1121_v52, %v1129_v53 }
  0x19   : > { %613 = vmatpush1.bf16.msra.mxu1 %v1770_v19  ;;  %985 = vmatpush1.bf16.msra.mxu0 %v1771_v20 }
  0x1a   : > { %614 = vmatprep.subr.bf16.mxu1 %v1772_v21  ;;  %986 = vmatprep.subr.bf16.mxu0 %v1774_v22 }
  0x1d   : > { %615 = vmatpush1.bf16.msra.mxu1 %v1776_v23  ;;  %987 = vmatpush1.bf16.msra.mxu0 %v1777_v24 }
  0x1e   : > { %616 = vmatprep.subr.bf16.mxu1 %v1778_v25  ;;  %988 = vmatprep.subr.bf16.mxu0 %v1780_v26 }
  0x21   : > { %617 = vmatpush1.bf16.msra.mxu1 %v1782_v27  ;;  %989 = vmatpush1.bf16.msra.mxu0 %v1783_v28 }
  0x22   : > { %618 = vmatprep.subr.bf16.mxu1 %v1784_v29  ;;  %990 = vmatprep.subr.bf16.mxu0 %v1786_v30 }
  0x25   : > { %619 = vmatpush1.bf16.msra.mxu1 %v1788_v31  ;;  %991 = vmatpush1.bf16.msra.mxu0 %v1789_v32 }
  0x28   : > { %637 = vmatmul.mubr.bf16.vlgmr.msra.gmra.mrb[0].mxu1 %v1790_v33  ;;  %1009 = vmatmul.mubr.bf16.vlgmr.msra.gmra.mrb[0].mxu0 %v1791_v34 }
  0x29   : > { %646 = vmatprep.mubr.bf16.mxu1 %v1894_v2  ;;  %1018 = vmatprep.mubr.bf16.mxu0 %v1894_v2 }
  0x30   : > { %647 = vmatmul.mubr.bf16.gmra.mrb[4].mxu1 %v1792_v35  ;;  %1019 = vmatmul.mubr.bf16.gmra.mrb[4].mxu0 %v1793_v36 }
  0x31   : > { %656 = vmatprep.mubr.bf16.mxu1 %v1894_v2  ;;  %1028 = vmatprep.mubr.bf16.mxu0 %v1894_v2 }
  0x38   : > { %657 = vmatmul.mubr.bf16.gmra.mrb[8].mxu1 %v1794_v37  ;;  %1029 = vmatmul.mubr.bf16.gmra.mrb[8].mxu0 %v1795_v38 }
  0x39   : > { %666 = vmatprep.mubr.bf16.mxu1 %v1894_v2  ;;  %1038 = vmatprep.mubr.bf16.mxu0 %v1894_v2 }
  0x40   : > { %667 = vmatmul.mubr.bf16.gmra.mrb[12].mxu1 %v1796_v39  ;;  %1039 = vmatmul.mubr.bf16.gmra.mrb[12].mxu0 %v1797_v40 }
  0x41   : > { %676 = vmatprep.mubr.bf16.mxu1 %v1894_v2  ;;  %1048 = vmatprep.mubr.bf16.mxu0 %v1894_v2 }
  0x48   : > { %677 = vmatmul.mubr.bf16.gmra.mrb[16].mxu1 %v1798_v41  ;;  %1049 = vmatmul.mubr.bf16.gmra.mrb[16].mxu0 %v1799_v42 }
  0x49   : > { %686 = vmatprep.mubr.bf16.mxu1 %v1894_v2  ;;  %1058 = vmatprep.mubr.bf16.mxu0 %v1894_v2 }
  0x50   : > { %687 = vmatmul.mubr.bf16.gmra.mrb[20].mxu1 %v1800_v43  ;;  %1059 = vmatmul.mubr.bf16.gmra.mrb[20].mxu0 %v1801_v44 }
  0x51   : > { %696 = vmatprep.mubr.bf16.mxu1 %v1894_v2  ;;  %1068 = vmatprep.mubr.bf16.mxu0 %v1894_v2 }
  0x58   : > { %697 = vmatmul.mubr.bf16.gmra.mrb[24].mxu1 %v1802_v45  ;;  %1069 = vmatmul.mubr.bf16.gmra.mrb[24].mxu0 %v1803_v46 }
  0x59   : > { %706 = vmatprep.mubr.bf16.mxu1 %v1894_v2  ;;  %1078 = vmatprep.mubr.bf16.mxu0 %v1894_v2 }
  0x60   : > { %707 = vmatmul.mubr.bf16.gmra.mrb[28].mxu1 %v1804_v47  ;;  %1079 = vmatmul.mubr.bf16.gmra.mrb[28].mxu0 %v1805_v48 }
  0xfb   : > { %v638_v55 = vpop.f32.mrb[0].mxu1  ;;  %v1010_v56 = vpop.f32.mrb[0].mxu0 }
  0xfc   : > { %v1089_v58 = vadd.f32 %v1010_v56, %v638_v55  ;;  %v640_v59 = vpop.f32.mrb[1].mxu1  ;;  %v1012_v60 = vpop.f32.mrb[1].mxu0 }
  0xfd   : > { %v1090_v61 = vadd.f32 %v1012_v60, %v640_v59  ;;  %v642_v62 = vpop.f32.mrb[2].mxu1  ;;  %v1014_v63 = vpop.f32.mrb[2].mxu0 }
  0xfe   : > { %v1133_v0 = vadd.f32 %v2090_v54, %v1089_v58  ;;  %v1091_v1 = vadd.f32 %v1014_v63, %v642_v62  ;;  %v644_v2 = vpop.f32.mrb[3].mxu1  ;;  %v1016_v3 = vpop.f32.mrb[3].mxu0 }
  0xff   : > { %v1134_v4 = vadd.f32 %v2092_v57, %v1090_v61  ;;  %v1092_v5 = vadd.f32 %v1016_v3, %v644_v2 }
 0x100   : > { %v1197_v6 = vmul.f32 0.70710677, %v1133_v0  ;;  %v1135_v7 = vadd.f32 %v2090_v54, %v1091_v1  ;;  %v1165_v35 = vmul.f32 0.5, %v1133_v0 }
 0x101   : > { %v1198_v8 = vmul.f32 0.70710677, %v1134_v4  ;;  %v1136_v9 = vadd.f32 %v2092_v57, %v1092_v5  ;;  %v1166_v41 = vmul.f32 0.5, %v1134_v4 }
 0x102   : > { %1806 = verf.f32 %v1197_v6  ;;  %v1199_v10 = vmul.f32 0.70710677, %v1135_v7  ;;  %v1167_v47 = vmul.f32 0.5, %v1135_v7 }
 0x103   : > { %1808 = verf.f32 %v1198_v8  ;;  %v1200_v11 = vmul.f32 0.70710677, %v1136_v9  ;;  %v648_v12 = vpop.f32.mrb[4].mxu1  ;;  %v1020_v13 = vpop.f32.mrb[4].mxu0  ;;  %v1168_v60 = vmul.f32 0.5, %v1136_v9 }
 0x104   : > { %1810 = verf.f32 %v1199_v10  ;;  %v1093_v14 = vadd.f32 %v1020_v13, %v648_v12  ;;  %v650_v15 = vpop.f32.mrb[5].mxu1  ;;  %v1022_v16 = vpop.f32.mrb[5].mxu0 }
 0x105   : > { %1812 = verf.f32 %v1200_v11  ;;  %v1094_v17 = vadd.f32 %v1022_v16, %v650_v15  ;;  %v652_v18 = vpop.f32.mrb[6].mxu1  ;;  %v1024_v19 = vpop.f32.mrb[6].mxu0 }
 0x106   : > { %v1137_v20 = vadd.f32 %v2090_v54, %v1093_v14  ;;  %v1095_v21 = vadd.f32 %v1024_v19, %v652_v18  ;;  %v654_v22 = vpop.f32.mrb[7].mxu1  ;;  %v1026_v23 = vpop.f32.mrb[7].mxu0 }
 0x107   : > { %v1138_v24 = vadd.f32 %v2092_v57, %v1094_v17  ;;  %v1096_v25 = vadd.f32 %v1026_v23, %v654_v22 }
 0x108   : > { %v1201_v26 = vmul.f32 0.70710677, %v1137_v20  ;;  %v1139_v27 = vadd.f32 %v2090_v54, %v1095_v21  ;;  %v1169_v5 = vmul.f32 0.5, %v1137_v20 }
 0x109   : > { %v1202_v28 = vmul.f32 0.70710677, %v1138_v24  ;;  %v2102_v29 = vadd.f32 %v2092_v57, %v1096_v25  ;;  %v1170_v11 = vmul.f32 0.5, %v1138_v24 }
 0x10a   : > { %1814 = verf.f32 %v1201_v26  ;;  %v1203_v30 = vmul.f32 0.70710677, %v1139_v27  ;;  %v1171_v18 = vmul.f32 0.5, %v1139_v27 }
 0x10b   : > { %1816 = verf.f32 %v1202_v28  ;;  %v1204_v31 = vmul.f32 0.70710677, %v2102_v29  ;;  %v658_v32 = vpop.f32.mrb[8].mxu1  ;;  %v1030_v33 = vpop.f32.mrb[8].mxu0 }
 0x10c   : > { %v1807_v34 = vpop.eup %1806  ;;  %1818 = verf.f32 %v1203_v30  ;;  %v1097_v36 = vadd.f32 %v1030_v33, %v658_v32  ;;  %v660_v37 = vpop.f32.mrb[9].mxu1 }
 0x10d   : > { %v1032_v38 = vpop.f32.mrb[9].mxu0  ;;  %v1809_v39 = vpop.eup %1808  ;;  %v1261_v40 = vadd.f32 1.0, %v1807_v34  ;;  %1820 = verf.f32 %v1204_v31 }
 0x10e   : > { %v1098_v42 = vadd.f32 %v1032_v38, %v660_v37  ;;  %v662_v43 = vpop.f32.mrb[10].mxu1  ;;  %v1034_v44 = vpop.f32.mrb[10].mxu0  ;;  %v1262_v46 = vadd.f32 1.0, %v1809_v39  ;;  %v2107_v48 = vadd.f32 %v2090_v54, %v1097_v36 }
 0x10f   : > { %v1811_v45 = vpop.eup %1810  ;;  %v1099_v49 = vadd.f32 %v1034_v44, %v662_v43  ;;  %v664_v50 = vpop.f32.mrb[11].mxu1  ;;  %v1293_v53 = vmul.f32 %v1261_v40, %v1165_v35  ;;  %v1172_v35 = vmul.f32 0.5, %v2102_v29 }
 0x110   : > { %v1036_v51 = vpop.f32.mrb[11].mxu0  ;;  %v1813_v52 = vpop.eup %1812  ;;  %v1263_v55 = vadd.f32 1.0, %v1811_v45  ;;  %v2110_v56 = vadd.f32 %v2092_v57, %v1098_v42  ;;  %v1294_v59 = vmul.f32 %v1262_v46, %v1166_v41  ;;  %v1205_v62 = vmul.f32 0.70710677, %v2107_v48 }
 0x111   : > { %v1100_v58 = vadd.f32 %v1036_v51, %v664_v50  ;;  %v1264_v61 = vadd.f32 1.0, %v1813_v52  ;;  %v2120_v1 = vadd.f32 %v2090_v54, %v1099_v49  ;;  %v1173_v49 = vmul.f32 0.5, %v2107_v48 }
 0x112   : > { %v1295_v63 = vmul.f32 %v1263_v55, %v1167_v47  ;;  %v1206_v0 = vmul.f32 0.70710677, %v2110_v56  ;;  %v1669_v2 = vpack.c.bf16 %v1294_v59, %v1293_v53  ;;  %1822 = verf.f32 %v1205_v62 }
 0x113   : > { %v1296_v3 = vmul.f32 %v1264_v61, %v1168_v60  ;;  %v2123_v4 = vadd.f32 %v2092_v57, %v1100_v58  ;;  %v1207_v6 = vmul.f32 0.70710677, %v2120_v1  ;;  %v668_v7 = vpop.f32.mrb[12].mxu1  ;;  %v1040_v8 = vpop.f32.mrb[12].mxu0  ;;  %v1174_v59 = vmul.f32 0.5, %v2110_v56 }
 0x114   : > { %1824 = verf.f32 %v1206_v0  ;;  %v1815_v9 = vpop.eup %1814  ;;  %1421 = vst [vmem:[%s2116_s9] sm:$0xff] %v1669_v2  ;;  %v1101_v13 = vadd.f32 %v1040_v8, %v668_v7  ;;  %v670_v14 = vpop.f32.mrb[13].mxu1 }
 0x115   : > { %v1670_v10 = vpack.c.bf16 %v1296_v3, %v1295_v63  ;;  %v1208_v12 = vmul.f32 0.70710677, %v2123_v4  ;;  %v1042_v15 = vpop.f32.mrb[13].mxu0  ;;  %v1817_v16 = vpop.eup %1816  ;;  %v1265_v17 = vadd.f32 1.0, %v1815_v9  ;;  %1826 = verf.f32 %v1207_v6 }
 0x116   : > { %v1102_v19 = vadd.f32 %v1042_v15, %v670_v14  ;;  %v672_v20 = vpop.f32.mrb[14].mxu1  ;;  %v1044_v21 = vpop.f32.mrb[14].mxu0  ;;  %v1266_v23 = vadd.f32 1.0, %v1817_v16  ;;  %v2130_v25 = vadd.f32 %v2090_v54, %v1101_v13  ;;  %v1176_v13 = vmul.f32 0.5, %v2123_v4 }
 0x117   : > { %v1819_v22 = vpop.eup %1818  ;;  %1422 = vst [vmem:[%s2116_s9 + $0x8] sm:$0xff] %v1670_v10  ;;  %1828 = verf.f32 %v1208_v12  ;;  %v1103_v24 = vadd.f32 %v1044_v21, %v672_v20  ;;  %v674_v26 = vpop.f32.mrb[15].mxu1  ;;  %v1297_v31 = vmul.f32 %v1265_v17, %v1169_v5  ;;  %v1175_v10 = vmul.f32 0.5, %v2120_v1 }
 0x118   : > { %v1046_v28 = vpop.f32.mrb[15].mxu0  ;;  %v1821_v30 = vpop.eup %1820  ;;  %v1267_v32 = vadd.f32 1.0, %v1819_v22  ;;  %v2133_v33 = vadd.f32 %v2092_v57, %v1102_v19  ;;  %v1298_v34 = vmul.f32 %v1266_v23, %v1170_v11  ;;  %v1209_v37 = vmul.f32 0.70710677, %v2130_v25 }
 0x119   : > { %v1104_v27 = vadd.f32 %v1046_v28, %v674_v26  ;;  %v1268_v36 = vadd.f32 1.0, %v1821_v30  ;;  %v2139_v40 = vadd.f32 %v2090_v54, %v1103_v24  ;;  %v1177_v4 = vmul.f32 0.5, %v2130_v25 }
 0x11a   : > { %v1299_v38 = vmul.f32 %v1267_v32, %v1171_v18  ;;  %v1210_v39 = vmul.f32 0.70710677, %v2133_v33  ;;  %v1671_v41 = vpack.c.bf16 %v1298_v34, %v1297_v31  ;;  %1830 = verf.f32 %v1209_v37 }
 0x11b   : > { %v1300_v42 = vmul.f32 %v1268_v36, %v1172_v35  ;;  %v2142_v43 = vadd.f32 %v2092_v57, %v1104_v27  ;;  %v1211_v44 = vmul.f32 0.70710677, %v2139_v40  ;;  %v678_v45 = vpop.f32.mrb[16].mxu1  ;;  %v1050_v29 = vpop.f32.mrb[16].mxu0  ;;  %v1178_v24 = vmul.f32 0.5, %v2133_v33 }
 0x11c   : > { %1832 = verf.f32 %v1210_v39  ;;  %v1823_v46 = vpop.eup %1822  ;;  %1423 = vst [vmem:[%s2116_s9 + $0x10] sm:$0xff] %v1671_v41  ;;  %v1105_v51 = vadd.f32 %v1050_v29, %v678_v45  ;;  %v680_v52 = vpop.f32.mrb[17].mxu1 }
 0x11d   : > { %v1672_v47 = vpack.c.bf16 %v1300_v42, %v1299_v38  ;;  %v1212_v50 = vmul.f32 0.70710677, %v2142_v43  ;;  %v1052_v53 = vpop.f32.mrb[17].mxu0  ;;  %v1269_v58 = vadd.f32 1.0, %v1823_v46  ;;  %1834 = verf.f32 %v1211_v44  ;;  %v682_v61 = vpop.f32.mrb[18].mxu1 }
 0x11e   : > { %v1825_v55 = vpop.eup %1824  ;;  %v1106_v60 = vadd.f32 %v1052_v53, %v680_v52  ;;  %v1054_v62 = vpop.f32.mrb[18].mxu0  ;;  %v2151_v0 = vadd.f32 %v2090_v54, %v1105_v51  ;;  %v1180_v52 = vmul.f32 0.5, %v2142_v43 }
 0x11f   : > { %1424 = vst [vmem:[%s2116_s9 + $0x18] sm:$0xff] %v1672_v47  ;;  %v1270_v63 = vadd.f32 1.0, %v1825_v55  ;;  %1836 = verf.f32 %v1212_v50  ;;  %v1107_v48 = vadd.f32 %v1054_v62, %v682_v61  ;;  %v684_v2 = vpop.f32.mrb[19].mxu1  ;;  %v1056_v3 = vpop.f32.mrb[19].mxu0  ;;  %v1301_v6 = vmul.f32 %v1269_v58, %v1173_v49 }
 0x120   : > { %v1827_v5 = vpop.eup %1826  ;;  %v2154_v7 = vadd.f32 %v2092_v57, %v1106_v60  ;;  %v1108_v8 = vadd.f32 %v1056_v3, %v684_v2  ;;  %v1213_v12 = vmul.f32 0.70710677, %v2151_v0  ;;  %v1179_v49 = vmul.f32 0.5, %v2139_v40 }
 0x121   : > { %v1829_v56 = vpop.eup %1828  ;;  %v1302_v9 = vmul.f32 %v1270_v63, %v1174_v59  ;;  %v1271_v11 = vadd.f32 1.0, %v1827_v5  ;;  %v2161_v16 = vadd.f32 %v2090_v54, %v1107_v48  ;;  %v1181_v43 = vmul.f32 0.5, %v2151_v0 }
 0x122   : > { %v1272_v14 = vadd.f32 1.0, %v1829_v56  ;;  %v1214_v15 = vmul.f32 0.70710677, %v2154_v7  ;;  %1838 = verf.f32 %v1213_v12  ;;  %v2164_v19 = vadd.f32 %v2092_v57, %v1108_v8 }
 0x123   : > { %v1673_v17 = vpack.c.bf16 %v1302_v9, %v1301_v6  ;;  %v1303_v18 = vmul.f32 %v1271_v11, %v1175_v10  ;;  %v1215_v1 = vmul.f32 0.70710677, %v2161_v16  ;;  %v688_v21 = vpop.f32.mrb[20].mxu1  ;;  %v1060_v22 = vpop.f32.mrb[20].mxu0  ;;  %v1182_v3 = vmul.f32 0.5, %v2154_v7 }
 0x124   : > { %v1304_v20 = vmul.f32 %v1272_v14, %v1176_v13  ;;  %1840 = verf.f32 %v1214_v15  ;;  %v1831_v23 = vpop.eup %1830  ;;  %v1216_v26 = vmul.f32 0.70710677, %v2164_v19  ;;  %v1109_v28 = vadd.f32 %v1060_v22, %v688_v21  ;;  %v690_v30 = vpop.f32.mrb[21].mxu1 }
 0x125   : > { %1425 = vst [vmem:[%s2116_s9 + $0x20] sm:$0xff] %v1673_v17  ;;  %v1062_v31 = vpop.f32.mrb[21].mxu0  ;;  %v1273_v34 = vadd.f32 1.0, %v1831_v23  ;;  %1842 = verf.f32 %v1215_v1  ;;  %v692_v36 = vpop.f32.mrb[22].mxu1 }
 0x126   : > { %v1833_v32 = vpop.eup %1832  ;;  %v1674_v27 = vpack.c.bf16 %v1304_v20, %v1303_v18  ;;  %v1110_v35 = vadd.f32 %v1062_v31, %v690_v30  ;;  %v1064_v37 = vpop.f32.mrb[22].mxu0  ;;  %1844 = verf.f32 %v1216_v26  ;;  %v2172_v39 = vadd.f32 %v2090_v54, %v1109_v28 }
 0x127   : > { %v1274_v38 = vadd.f32 1.0, %v1833_v32  ;;  %v1111_v25 = vadd.f32 %v1064_v37, %v692_v36  ;;  %v694_v33 = vpop.f32.mrb[23].mxu1  ;;  %v1066_v41 = vpop.f32.mrb[23].mxu0  ;;  %v1305_v44 = vmul.f32 %v1273_v34, %v1177_v4  ;;  %v1184_v30 = vmul.f32 0.5, %v2164_v19 }
 0x128   : > { %v1835_v42 = vpop.eup %1834  ;;  %1426 = vst [vmem:[%s2116_s9 + $0x28] sm:$0xff] %v1674_v27  ;;  %v2176_v45 = vadd.f32 %v2092_v57, %v1110_v35  ;;  %v1112_v29 = vadd.f32 %v1066_v41, %v694_v33  ;;  %v1217_v51 = vmul.f32 0.70710677, %v2172_v39  ;;  %v1185_v19 = vmul.f32 0.5, %v2172_v39 }
 0x129   : > { %v1837_v46 = vpop.eup %1836  ;;  %v1306_v47 = vmul.f32 %v1274_v38, %v1178_v24  ;;  %v1275_v50 = vadd.f32 1.0, %v1835_v42  ;;  %v2183_v58 = vadd.f32 %v2090_v54, %v1111_v25  ;;  %v1183_v24 = vmul.f32 0.5, %v2161_v16 }
 0x12a   : > { %v1276_v53 = vadd.f32 1.0, %v1837_v46  ;;  %v1218_v55 = vmul.f32 0.70710677, %v2176_v45  ;;  %1846 = verf.f32 %v1217_v51  ;;  %v2186_v61 = vadd.f32 %v2092_v57, %v1112_v29 }
 0x12b   : > { %v1675_v59 = vpack.c.bf16 %v1306_v47, %v1305_v44  ;;  %v1307_v60 = vmul.f32 %v1275_v50, %v1179_v49  ;;  %v1219_v40 = vmul.f32 0.70710677, %v2183_v58  ;;  %v698_v63 = vpop.f32.mrb[24].mxu1  ;;  %v1070_v48 = vpop.f32.mrb[24].mxu0  ;;  %v1186_v41 = vmul.f32 0.5, %v2176_v45 }
 0x12c   : > { %v1308_v62 = vmul.f32 %v1276_v53, %v1180_v52  ;;  %1848 = verf.f32 %v1218_v55  ;;  %v1839_v2 = vpop.eup %1838  ;;  %v1220_v5 = vmul.f32 0.70710677, %v2186_v61  ;;  %v1113_v6 = vadd.f32 %v1070_v48, %v698_v63  ;;  %v700_v8 = vpop.f32.mrb[25].mxu1 }
 0x12d   : > { %1427 = vst [vmem:[%s2116_s9 + $0x30] sm:$0xff] %v1675_v59  ;;  %v1072_v56 = vpop.f32.mrb[25].mxu0  ;;  %v1277_v11 = vadd.f32 1.0, %v1839_v2  ;;  %1850 = verf.f32 %v1219_v40  ;;  %v702_v13 = vpop.f32.mrb[26].mxu1 }
 0x12e   : > { %v1841_v9 = vpop.eup %1840  ;;  %v1676_v10 = vpack.c.bf16 %v1308_v62, %v1307_v60  ;;  %v1114_v12 = vadd.f32 %v1072_v56, %v700_v8  ;;  %v1074_v14 = vpop.f32.mrb[26].mxu0  ;;  %1852 = verf.f32 %v1220_v5  ;;  %v2194_v17 = vadd.f32 %v2090_v54, %v1113_v6 }
 0x12f   : > { %v1278_v15 = vadd.f32 1.0, %v1841_v9  ;;  %v1115_v0 = vadd.f32 %v1074_v14, %v702_v13  ;;  %v704_v7 = vpop.f32.mrb[27].mxu1  ;;  %v1076_v18 = vpop.f32.mrb[27].mxu0  ;;  %v1309_v1 = vmul.f32 %v1277_v11, %v1181_v43  ;;  %v1188_v8 = vmul.f32 0.5, %v2186_v61 }
 0x130   : > { %v1843_v20 = vpop.eup %1842  ;;  %1428 = vst [vmem:[%s2116_s9 + $0x38] sm:$0xff] %v1676_v10  ;;  %v2198_v21 = vadd.f32 %v2092_v57, %v1114_v12  ;;  %v1116_v22 = vadd.f32 %v1076_v18, %v704_v7  ;;  %v1221_v28 = vmul.f32 0.70710677, %v2194_v17  ;;  %v1189_v61 = vmul.f32 0.5, %v2194_v17 }
 0x131   : > { %v1845_v23 = vpop.eup %1844  ;;  %v1310_v4 = vmul.f32 %v1278_v15, %v1182_v3  ;;  %v1279_v26 = vadd.f32 1.0, %v1843_v20  ;;  %v2205_v27 = vadd.f32 %v2090_v54, %v1115_v0  ;;  %v1187_v3 = vmul.f32 0.5, %v2183_v58 }
 0x132   : > { %v1280_v31 = vadd.f32 1.0, %v1845_v23  ;;  %v1222_v32 = vmul.f32 0.70710677, %v2198_v21  ;;  %1854 = verf.f32 %v1221_v28  ;;  %v2208_v36 = vadd.f32 %v2092_v57, %v1116_v22 }
 0x133   : > { %v1677_v34 = vpack.c.bf16 %v1310_v4, %v1309_v1  ;;  %v1311_v35 = vmul.f32 %v1279_v26, %v1183_v24  ;;  %v1223_v16 = vmul.f32 0.70710677, %v2205_v27  ;;  %v708_v38 = vpop.f32.mrb[28].mxu1  ;;  %v1080_v25 = vpop.f32.mrb[28].mxu0  ;;  %v1191_v24 = vmul.f32 0.5, %v2205_v27 }
 0x134   : > { %v1312_v37 = vmul.f32 %v1280_v31, %v1184_v30  ;;  %1856 = verf.f32 %v1222_v32  ;;  %v1847_v33 = vpop.eup %1846  ;;  %v1224_v42 = vmul.f32 0.70710677, %v2208_v36  ;;  %v1117_v44 = vadd.f32 %v1080_v25, %v708_v38  ;;  %v710_v29 = vpop.f32.mrb[29].mxu1 }
 0x135   : > { %1429 = vst [vmem:[%s2116_s9 + $0x40] sm:$0xff] %v1677_v34  ;;  %v1082_v46 = vpop.f32.mrb[29].mxu0  ;;  %v1281_v50 = vadd.f32 1.0, %v1847_v33  ;;  %1858 = verf.f32 %v1223_v16  ;;  %v712_v52 = vpop.f32.mrb[30].mxu1  ;;  %v1192_v28 = vmul.f32 0.5, %v2208_v36 }
 0x136   : > { %v1849_v47 = vpop.eup %1848  ;;  %v1678_v49 = vpack.c.bf16 %v1312_v37, %v1311_v35  ;;  %v1118_v51 = vadd.f32 %v1082_v46, %v710_v29  ;;  %v1084_v53 = vpop.f32.mrb[30].mxu0  ;;  %1860 = verf.f32 %v1224_v42  ;;  %v1161_v59 = vadd.f32 %v2090_v54, %v1117_v44 }
 0x137   : > { %v1282_v55 = vadd.f32 1.0, %v1849_v47  ;;  %v1119_v39 = vadd.f32 %v1084_v53, %v712_v52  ;;  %v714_v60 = vpop.f32.mrb[31].mxu1  ;;  %v1086_v45 = vpop.f32.mrb[31].mxu0  ;;  %v1313_v40 = vmul.f32 %v1281_v50, %v1185_v19 }
 0x138   : > { %v1851_v62 = vpop.eup %1850  ;;  %1430 = vst [vmem:[%s2116_s9 + $0x48] sm:$0xff] %v1678_v49  ;;  %v1162_v63 = vadd.f32 %v2092_v57, %v1118_v51  ;;  %v1120_v48 = vadd.f32 %v1086_v45, %v714_v60  ;;  %v1225_v6 = vmul.f32 0.70710677, %v1161_v59  ;;  %v1193_v37 = vmul.f32 0.5, %v1161_v59 }
 0x139   : > { %v1853_v2 = vpop.eup %1852  ;;  %v1314_v43 = vmul.f32 %v1282_v55, %v1186_v41  ;;  %v1283_v5 = vadd.f32 1.0, %v1851_v62  ;;  %v1163_v10 = vadd.f32 %v2090_v54, %v1119_v39  ;;  %v1190_v54 = vmul.f32 0.5, %v2198_v21 }
 0x13a   : > { %v1284_v56 = vadd.f32 1.0, %v1853_v2  ;;  %v1226_v9 = vmul.f32 0.70710677, %v1162_v63  ;;  %1862 = verf.f32 %v1225_v6  ;;  %v1164_v13 = vadd.f32 %v2092_v57, %v1120_v48 }
 0x13b   : > { %v1679_v11 = vpack.c.bf16 %v1314_v43, %v1313_v40  ;;  %v1315_v12 = vmul.f32 %v1283_v5, %v1187_v3  ;;  %v1227_v15 = vmul.f32 0.70710677, %v1163_v10  ;;  %v1194_v38 = vmul.f32 0.5, %v1162_v63 }
 0x13c   : > { %v1316_v14 = vmul.f32 %v1284_v56, %v1188_v8  ;;  %1864 = verf.f32 %v1226_v9  ;;  %v1855_v0 = vpop.eup %1854  ;;  %v1228_v58 = vmul.f32 0.70710677, %v1164_v13  ;;  %v1195_v36 = vmul.f32 0.5, %v1163_v10 }
 0x13d   : > { %1431 = vst [vmem:[%s2116_s9 + $0x50] sm:$0xff] %v1679_v11  ;;  %v1285_v20 = vadd.f32 1.0, %v1855_v0  ;;  %1866 = verf.f32 %v1227_v15  ;;  %v1196_v44 = vmul.f32 0.5, %v1164_v13 }
 0x13e   : > { %v1857_v7 = vpop.eup %1856  ;;  %v1680_v18 = vpack.c.bf16 %v1316_v14, %v1315_v12  ;;  %1868 = verf.f32 %v1228_v58 }
 0x13f   : > { %v1286_v1 = vadd.f32 1.0, %v1857_v7  ;;  %v1859_v22 = vpop.eup %1858  ;;  %v1317_v57 = vmul.f32 %v1285_v20, %v1189_v61 }
 0x140   : > { %1432 = vst [vmem:[%s2116_s9 + $0x58] sm:$0xff] %v1680_v18  ;;  %v1861_v23 = vpop.eup %1860  ;;  %v1287_v26 = vadd.f32 1.0, %v1859_v22 }
 0x141   : > { %v1318_v4 = vmul.f32 %v1286_v1, %v1190_v54  ;;  %v1288_v30 = vadd.f32 1.0, %v1861_v23 }
 0x142   : > { %v1319_v31 = vmul.f32 %v1287_v26, %v1191_v24 }
 0x143   : > { %v1681_v17 = vpack.c.bf16 %v1318_v4, %v1317_v57  ;;  %v1320_v32 = vmul.f32 %v1288_v30, %v1192_v28 }
 0x144   : > { %v1863_v34 = vpop.eup %1862 }
 0x145   : > { %1433 = vst [vmem:[%s2116_s9 + $0x60] sm:$0xff] %v1681_v17  ;;  %v1682_v35 = vpack.c.bf16 %v1320_v32, %v1319_v31  ;;  %v1289_v16 = vadd.f32 1.0, %v1863_v34 }
 0x146   : > { %v1865_v21 = vpop.eup %1864 }
 0x147   : > { %v1290_v25 = vadd.f32 1.0, %v1865_v21  ;;  %v1867_v33 = vpop.eup %1866  ;;  %1434 = vst [vmem:[%s2116_s9 + $0x68] sm:$0xff] %v1682_v35  ;;  %v1321_v27 = vmul.f32 %v1289_v16, %v1193_v37 }
 0x148   : > { %v1869_v19 = vpop.eup %1868  ;;  %v1291_v42 = vadd.f32 1.0, %v1867_v33 }
 0x149   : > { %v1322_v41 = vmul.f32 %v1290_v25, %v1194_v38  ;;  %v1292_v29 = vadd.f32 1.0, %v1869_v19 }
 0x14a   : > { %v1323_v47 = vmul.f32 %v1291_v42, %v1195_v36 }
 0x14b   : > { %v1683_v46 = vpack.c.bf16 %v1322_v41, %v1321_v27  ;;  %v1324_v49 = vmul.f32 %v1292_v29, %v1196_v44 }
 0x14d   : > { %1435 = vst [vmem:[%s2116_s9 + $0x70] sm:$0xff] %v1683_v46  ;;  %v1684_v50 = vpack.c.bf16 %v1324_v49, %v1323_v47 }
 0x14f   : > { %1436 = vst [vmem:[%s2116_s9 + $0x78] sm:$0xff] %v1684_v50 }
 0x150 PF: > { %s15_s20 = sadd.s32 1, %s1892_s20   ;;  %s2247_s18 = smov %s1888_s19 }
 0x151   : > { %p12_p5 = scmp.ge.s32.totalorder %s15_s20, 4   ;;  %s2248_s19 = smov %s2250_s21 }
 0x153   :  { %14 = sbr.rel (!%p12_p5) target bundleno = 2 (0x2), region = 90 }

// kernel: mlp_block2.18
= control target key start
LH: loop header
LB: loop body
LE: loop exit
PB: predicated region body
PF: predicated region fallthrough
CT: control target
= control target key end

     0   :  { %s883_s9 = smov 0   ;;  %s980_s0 = inlined_call_operand.vmem [shape: bf16[256,256], index: 0, kind: input, shape index: {}]   ;;  %s981_s1 = inlined_call_operand.vmem [shape: bf16[256,128], index: 1, kind: input, shape index: {}]   ;;  %s982_s2 = inlined_call_operand.vmem [shape: bf16[256,128], index: 2, kind: output, shape index: {}]  }
   0x1 LB: > { %s608_s10 = sadd.s32 4294967295, %s866_s9   ;;  %p612_p0 = scmp.ge.s32.totalorder %s866_s9, 1  ;;  %s866_s9 = sphi %s883_s9, %s12_s9  }
   0x2   : > { %p114_p1 = scmp.lt.s32.totalorder %s866_s9, 3 }
   0x4   : > { %p115_p2 = pnand %p612_p0, %p114_p1 }
   0x5   : > { %v820_v0 = vld [vmem:[%s981_s1 + $0x40] sm:$0xff] (!%p115_p2)   ;;  %s613_s13 = sshll.u32 (!%p115_p2), %s608_s10, 4  ;;  %v822_v2 = vld [vmem:[%s981_s1 + $0x48] sm:$0xff] (!%p115_p2)   ;;  %v824_v4 = vld [vmem:[%s981_s1 + $0x50] sm:$0xff] (!%p115_p2)  }
   0x6   : > { %118 = sbr.rel (%p115_p2) target bundleno = 282 (0x11a), region = 28  ;;  %v821_v1 = vld [vmem:[%s981_s1] sm:$0xff] (!%p115_p2)   ;;  %732 = vmatprep.subr.bf16.mxu0 (!%p115_p2), %v820_v0  ;;  %796 = vmatprep.subr.bf16.mxu1 (!%p115_p2), %v820_v0  ;;  %v823_v3 = vld [vmem:[%s981_s1 + $0x8] sm:$0xff] (!%p115_p2)   ;;  %p138_p3 = scmp.lt.s32.totalorder (!%p115_p2), %s613_s13, 31  ;;  %v825_v5 = vld [vmem:[%s981_s1 + $0x10] sm:$0xff] (!%p115_p2)  }
   0x7   : > { %733 = vmatpush3.bf16.msra.mxu0 (!%p115_p2), %v821_v1  ;;  %804 = vmatpush3.bf16.msra.mxu1 (!%p115_p2), %v821_v1  ;;  %v826_v6 = vld [vmem:[%s981_s1 + $0x58] sm:$0xff] (!%p115_p2)   ;;  %v828_v8 = vld [vmem:[%s981_s1 + $0x60] sm:$0xff] (!%p115_p2)   ;;  %v830_v10 = vld [vmem:[%s981_s1 + $0x68] sm:$0xff] (!%p115_p2)  }
   0x8   : > { %734 = vmatprep.subr.bf16.mxu0 (!%p115_p2), %v822_v2  ;;  %797 = vmatprep.subr.bf16.mxu1 (!%p115_p2), %v822_v2  ;;  %v827_v7 = vld [vmem:[%s981_s1 + $0x18] sm:$0xff] (!%p115_p2)   ;;  %v829_v9 = vld [vmem:[%s981_s1 + $0x20] sm:$0xff] (!%p115_p2)   ;;  %v831_v13 = vld [vmem:[%s981_s1 + $0x28] sm:$0xff] (!%p115_p2)  }
   0x9   : > { %v832_v14 = vld [vmem:[%s981_s1 + $0x70] sm:$0xff] (!%p115_p2)   ;;  %v834_v16 = vld [vmem:[%s981_s1 + $0x78] sm:$0xff] (!%p115_p2)  }
   0xa   : > { %v833_v15 = vld [vmem:[%s981_s1 + $0x30] sm:$0xff] (!%p115_p2)   ;;  %v835_v17 = vld [vmem:[%s981_s1 + $0x38] sm:$0xff] (!%p115_p2)  }
   0xb   : > { %735 = vmatpush3.bf16.msra.mxu0 (!%p115_p2), %v823_v3  ;;  %805 = vmatpush3.bf16.msra.mxu1 (!%p115_p2), %v823_v3 }
   0xc   : > { %736 = vmatprep.subr.bf16.mxu0 (!%p115_p2), %v824_v4  ;;  %798 = vmatprep.subr.bf16.mxu1 (!%p115_p2), %v824_v4 }
   0xd   : > { %s984_s13 = smov (!%p138_p3, %s613_s13), 31 }
   0xe   : > { %s668_s28 = sshll.u32 %s984_s13, 3  ;;  %s617_s22 = sshll.u32 %s984_s13, 2 }
   0xf   : > { %737 = vmatpush3.bf16.msra.mxu0 %v825_v5  ;;  %806 = vmatpush3.bf16.msra.mxu1 %v825_v5  ;;  %s924_s5 = scalar_lea.vmem %s980_s0, %s668_s28  ;;  %s967_s25 = scalar_lea.vmem %s982_s2, %s617_s22 }
  0x10   : > { %738 = vmatprep.subr.bf16.mxu0 %v826_v6  ;;  %799 = vmatprep.subr.bf16.mxu1 %v826_v6  ;;  %v838_v11 = vld [vmem:[%s924_s5 + $0x4] ss:$8 sps:$4 sm:$0xff]   ;;  %v836_v18 = vld [vmem:[%s924_s5] ss:$8 sps:$4 sm:$0xff]   ;;  %v842_v20 = vld [vmem:[%s924_s5 + $0x14] ss:$8 sps:$4 sm:$0xff]  }
  0x11   : > { %v841_v12 = vld [vmem:[%s924_s5 + $0x44] ss:$8 sps:$4 sm:$0xff]   ;;  %407 = vmatprep.mubr.bf16.mxu0 %v838_v11  ;;  %v839_v19 = vld [vmem:[%s924_s5 + $0x40] ss:$8 sps:$4 sm:$0xff]   ;;  %v844_v21 = vld [vmem:[%s924_s5 + $0x54] ss:$8 sps:$4 sm:$0xff]  }
  0x12   : > { %439 = vmatprep.mubr.bf16.mxu1 %v841_v12  ;;  %v846_v22 = vld [vmem:[%s924_s5 + $0x10] ss:$8 sps:$4 sm:$0xff]   ;;  %v848_v24 = vld [vmem:[%s924_s5 + $0x24] ss:$8 sps:$4 sm:$0xff]   ;;  %v852_v26 = vld [vmem:[%s924_s5 + $0x20] ss:$8 sps:$4 sm:$0xff]  }
  0x13   : > { %739 = vmatpush3.bf16.msra.mxu0 %v827_v7  ;;  %807 = vmatpush3.bf16.msra.mxu1 %v827_v7  ;;  %v847_v23 = vld [vmem:[%s924_s5 + $0x50] ss:$8 sps:$4 sm:$0xff]   ;;  %v850_v25 = vld [vmem:[%s924_s5 + $0x64] ss:$8 sps:$4 sm:$0xff]   ;;  %v853_v27 = vld [vmem:[%s924_s5 + $0x60] ss:$8 sps:$4 sm:$0xff]  }
  0x14   : > { %740 = vmatprep.subr.bf16.mxu0 %v828_v8  ;;  %800 = vmatprep.subr.bf16.mxu1 %v828_v8  ;;  %v854_v28 = vld [vmem:[%s924_s5 + $0x34] ss:$8 sps:$4 sm:$0xff]   ;;  %v858_v30 = vld [vmem:[%s924_s5 + $0x30] ss:$8 sps:$4 sm:$0xff]  }
  0x15   : > { %v856_v29 = vld [vmem:[%s924_s5 + $0x74] ss:$8 sps:$4 sm:$0xff]   ;;  %v859_v31 = vld [vmem:[%s924_s5 + $0x70] ss:$8 sps:$4 sm:$0xff]  }
  0x17   : > { %741 = vmatpush3.bf16.msra.mxu0 %v829_v9  ;;  %808 = vmatpush3.bf16.msra.mxu1 %v829_v9 }
  0x18   : > { %742 = vmatprep.subr.bf16.mxu0 %v830_v10  ;;  %801 = vmatprep.subr.bf16.mxu1 %v830_v10 }
  0x1b   : > { %743 = vmatpush3.bf16.msra.mxu0 %v831_v13  ;;  %809 = vmatpush3.bf16.msra.mxu1 %v831_v13 }
  0x1c   : > { %744 = vmatprep.subr.bf16.mxu0 %v832_v14  ;;  %802 = vmatprep.subr.bf16.mxu1 %v832_v14 }
  0x1f   : > { %745 = vmatpush3.bf16.msra.mxu0 %v833_v15  ;;  %810 = vmatpush3.bf16.msra.mxu1 %v833_v15 }
  0x20   : > { %746 = vmatprep.subr.bf16.mxu0 %v834_v16  ;;  %803 = vmatprep.subr.bf16.mxu1 %v834_v16 }
  0x23   : > { %747 = vmatpush3.bf16.msra.mxu0 %v835_v17  ;;  %811 = vmatpush3.bf16.msra.mxu1 %v835_v17 }
  0x26   : > { %408 = vmatmul.mubr.bf16.vlgmr.msra.gmra.mrb[0].mxu0 %v836_v18  ;;  %440 = vmatmul.mubr.bf16.vlgmr.msra.gmra.mrb[0].mxu1 %v839_v19 }
  0x27   : > { %415 = vmatprep.mubr.bf16.mxu0 %v842_v20  ;;  %447 = vmatprep.mubr.bf16.mxu1 %v844_v21 }
  0x2e   : > { %416 = vmatmul.mubr.bf16.gmra.mrb[4].mxu0 %v846_v22  ;;  %448 = vmatmul.mubr.bf16.gmra.mrb[4].mxu1 %v847_v23 }
  0x2f   : > { %423 = vmatprep.mubr.bf16.mxu0 %v848_v24  ;;  %455 = vmatprep.mubr.bf16.mxu1 %v850_v25 }
  0x36   : > { %424 = vmatmul.mubr.bf16.gmra.mrb[8].mxu0 %v852_v26  ;;  %456 = vmatmul.mubr.bf16.gmra.mrb[8].mxu1 %v853_v27 }
  0x37   : > { %431 = vmatprep.mubr.bf16.mxu0 %v854_v28  ;;  %463 = vmatprep.mubr.bf16.mxu1 %v856_v29 }
  0x3e   : > { %432 = vmatmul.mubr.bf16.gmra.mrb[12].mxu0 %v858_v30  ;;  %464 = vmatmul.mubr.bf16.gmra.mrb[12].mxu1 %v859_v31 }
  0xf9   : > { %v748_v32 = vpop.f32.mrb[0].mxu0  ;;  %v772_v33 = vpop.f32.mrb[0].mxu1 }
  0xfa   : > { %v749_v34 = vpop.f32.mrb[1].mxu0  ;;  %v773_v35 = vpop.f32.mrb[1].mxu1 }
  0xfb   : > { %v750_v36 = vadd.f32 %v749_v34, %v748_v32  ;;  %v774_v37 = vadd.f32 %v773_v35, %v772_v33  ;;  %v751_v38 = vpop.f32.mrb[2].mxu0  ;;  %v775_v39 = vpop.f32.mrb[2].mxu1 }
  0xfc   : > { %v752_v40 = vpop.f32.mrb[3].mxu0  ;;  %v776_v41 = vpop.f32.mrb[3].mxu1 }
  0xfd   : > { %v753_v42 = vadd.f32 %v752_v40, %v751_v38  ;;  %v777_v43 = vadd.f32 %v776_v41, %v775_v39 }
  0xff   : > { %v688_v44 = vpack.c.bf16 %v753_v42, %v750_v36  ;;  %v708_v45 = vpack.c.bf16 %v777_v43, %v774_v37 }
 0x101   : > { %689 = vst [vmem:[%s967_s25] sm:$0xff] %v688_v44   ;;  %728 = vst [vmem:[%s967_s25 + $0x20] sm:$0xff] %v708_v45   ;;  %v754_v46 = vpop.f32.mrb[4].mxu0  ;;  %v778_v47 = vpop.f32.mrb[4].mxu1 }
 0x102   : > { %v755_v48 = vpop.f32.mrb[5].mxu0  ;;  %v779_v49 = vpop.f32.mrb[5].mxu1 }
 0x103   : > { %v756_v50 = vadd.f32 %v755_v48, %v754_v46  ;;  %v780_v51 = vadd.f32 %v779_v49, %v778_v47  ;;  %v757_v52 = vpop.f32.mrb[6].mxu0  ;;  %v781_v53 = vpop.f32.mrb[6].mxu1 }
 0x104   : > { %v758_v54 = vpop.f32.mrb[7].mxu0  ;;  %v782_v55 = vpop.f32.mrb[7].mxu1 }
 0x105   : > { %v759_v56 = vadd.f32 %v758_v54, %v757_v52  ;;  %v783_v57 = vadd.f32 %v782_v55, %v781_v53 }
 0x107   : > { %v693_v58 = vpack.c.bf16 %v759_v56, %v756_v50  ;;  %v713_v59 = vpack.c.bf16 %v783_v57, %v780_v51 }
 0x109   : > { %725 = vst [vmem:[%s967_s25 + $0x8] sm:$0xff] %v693_v58   ;;  %729 = vst [vmem:[%s967_s25 + $0x28] sm:$0xff] %v713_v59   ;;  %v760_v60 = vpop.f32.mrb[8].mxu0  ;;  %v784_v61 = vpop.f32.mrb[8].mxu1 }
 0x10a   : > { %v761_v62 = vpop.f32.mrb[9].mxu0  ;;  %v785_v63 = vpop.f32.mrb[9].mxu1 }
 0x10b   : > { %v762_v0 = vadd.f32 %v761_v62, %v760_v60  ;;  %v786_v1 = vadd.f32 %v785_v63, %v784_v61  ;;  %v763_v2 = vpop.f32.mrb[10].mxu0  ;;  %v787_v3 = vpop.f32.mrb[10].mxu1 }
 0x10c   : > { %v764_v4 = vpop.f32.mrb[11].mxu0  ;;  %v788_v5 = vpop.f32.mrb[11].mxu1 }
 0x10d   : > { %v765_v6 = vadd.f32 %v764_v4, %v763_v2  ;;  %v789_v7 = vadd.f32 %v788_v5, %v787_v3 }
 0x10f   : > { %v698_v8 = vpack.c.bf16 %v765_v6, %v762_v0  ;;  %v718_v9 = vpack.c.bf16 %v789_v7, %v786_v1 }
 0x111   : > { %726 = vst [vmem:[%s967_s25 + $0x10] sm:$0xff] %v698_v8   ;;  %730 = vst [vmem:[%s967_s25 + $0x30] sm:$0xff] %v718_v9   ;;  %v766_v10 = vpop.f32.mrb[12].mxu0  ;;  %v790_v11 = vpop.f32.mrb[12].mxu1 }
 0x112   : > { %v767_v12 = vpop.f32.mrb[13].mxu0  ;;  %v791_v13 = vpop.f32.mrb[13].mxu1 }
 0x113   : > { %v768_v14 = vadd.f32 %v767_v12, %v766_v10  ;;  %v792_v15 = vadd.f32 %v791_v13, %v790_v11  ;;  %v769_v16 = vpop.f32.mrb[14].mxu0  ;;  %v793_v17 = vpop.f32.mrb[14].mxu1 }
 0x114   : > { %v770_v18 = vpop.f32.mrb[15].mxu0  ;;  %v794_v19 = vpop.f32.mrb[15].mxu1 }
 0x115   : > { %v771_v20 = vadd.f32 %v770_v18, %v769_v16  ;;  %v795_v21 = vadd.f32 %v794_v19, %v793_v17 }
 0x117   : > { %v703_v22 = vpack.c.bf16 %v771_v20, %v768_v14  ;;  %v723_v23 = vpack.c.bf16 %v795_v21, %v792_v15 }
 0x119   : > { %727 = vst [vmem:[%s967_s25 + $0x18] sm:$0xff] %v703_v22   ;;  %731 = vst [vmem:[%s967_s25 + $0x38] sm:$0xff] %v723_v23  }
 0x11a PF: > { %s12_s9 = sadd.s32 1, %s866_s9  }
 0x11b   : > { %p9_p4 = scmp.ge.s32.totalorder %s12_s9, 4  }
 0x11d   :  { %11 = sbr.rel (!%p9_p4) target bundleno = 1 (0x1), region = 58 }

// kernel: mlp_block2.23
= control target key start
LH: loop header
LB: loop body
LE: loop exit
PB: predicated region body
PF: predicated region fallthrough
CT: control target
= control target key end

     0   :  { %s1503_s18 = smov 0   ;;  %s1505_s19 = smov 0   ;;  %s1689_s0 = inlined_call_operand.vmem [shape: bf16[256,256], index: 0, kind: input, shape index: {}]   ;;  %s1690_s1 = inlined_call_operand.vmem [shape: bf16[256,128], index: 1, kind: input, shape index: {}]   ;;  %s1691_s2 = inlined_call_operand.vmem [shape: f32[1,128], index: 2, kind: input, shape index: {}]   ;;  %s1692_s3 = inlined_call_operand.vmem [shape: bf16[256,128], index: 3, kind: input, shape index: {}]   ;;  %s1693_s4 = inlined_call_operand.vmem [shape: bf16[128,128], index: 4, kind: input, shape index: {}]   ;;  %s1694_s5 = inlined_call_operand.vmem [shape: f32[256,128], index: 5, kind: output, shape index: {}]  }
   0x1   :  { %s1507_s20 = smov 0  }
   0x2 LB: > { %s34_s21 = sadd.s32 1, %s1467_s19  ;;  %p1197_p0 = scmp.ge.s32.totalorder %s1471_s20, 1  ;;  %s1471_s20 = sphi %s1507_s20, %s15_s20   ;;  %s1467_s19 = sphi %s1505_s19, %s1696_s19   ;;  %s1463_s18 = sphi %s1503_s18, %s1695_s18  }
   0x3   : > { %p36_p1 = scmp.ge.s32.totalorder %s34_s21, 2  ;;  %p261_p2 = scmp.lt.s32.totalorder %s1471_s20, 3 }
   0x5   : > { %s1698_s21 = smov (%p36_p1, %s34_s21), 0  ;;  %p262_p3 = pnand %p1197_p0, %p261_p2 }
   0x6   : > { %v1393_v0 = vld [vmem:[%s1690_s1 + $0x40] sm:$0xff] (!%p262_p3)   ;;  %v1396_v3 = vld [vmem:[%s1690_s1 + $0x48] sm:$0xff] (!%p262_p3)   ;;  %v1399_v6 = vld [vmem:[%s1690_s1 + $0x50] sm:$0xff] (!%p262_p3)   ;;  %s1198_s15 = sshll.u32 (!%p262_p3), %s1463_s18, 4 }
   0x7   : > { %265 = sbr.rel (%p262_p3) target bundleno = 317 (0x13d), region = 40  ;;  %v1394_v1 = vld [vmem:[%s1690_s1] sm:$0xff] (!%p262_p3)   ;;  %1257 = vmatprep.subr.bf16.mxu0 (!%p262_p3), %v1393_v0  ;;  %v1397_v4 = vld [vmem:[%s1690_s1 + $0x8] sm:$0xff] (!%p262_p3)   ;;  %v1400_v7 = vld [vmem:[%s1690_s1 + $0x10] sm:$0xff] (!%p262_p3)   ;;  %p319_p4 = scmp.lt.s32.totalorder (!%p262_p3), %s1198_s15, 31 }
   0x8   : > { %v1395_v2 = vld [vmem:[%s1693_s4] sm:$0xff] (!%p262_p3)   ;;  %1258 = vmatpush3.bf16.msra.mxu0 (!%p262_p3), %v1394_v1  ;;  %v1398_v5 = vld [vmem:[%s1693_s4 + $0x8] sm:$0xff] (!%p262_p3)   ;;  %v1401_v8 = vld [vmem:[%s1693_s4 + $0x10] sm:$0xff] (!%p262_p3)  }
   0x9   : > { %1337 = vmatprep.subr.bf16.mxu1 (!%p262_p3), %v1395_v2  ;;  %1259 = vmatprep.subr.bf16.mxu0 (!%p262_p3), %v1396_v3  ;;  %v1402_v9 = vld [vmem:[%s1690_s1 + $0x58] sm:$0xff] (!%p262_p3)   ;;  %v1405_v12 = vld [vmem:[%s1690_s1 + $0x60] sm:$0xff] (!%p262_p3)   ;;  %v1408_v15 = vld [vmem:[%s1690_s1 + $0x68] sm:$0xff] (!%p262_p3)  }
   0xa   : > { %1338 = vmatpush3.bf16.msra.mxu1 (!%p262_p3), %v1395_v2  ;;  %v1403_v10 = vld [vmem:[%s1690_s1 + $0x18] sm:$0xff] (!%p262_p3)   ;;  %v1407_v13 = vld [vmem:[%s1693_s4 + $0x20] sm:$0xff] (!%p262_p3)   ;;  %v1410_v16 = vld [vmem:[%s1693_s4 + $0x28] sm:$0xff] (!%p262_p3)  }
   0xb   : > { %1339 = vmatprep.subr.bf16.mxu1 (!%p262_p3), %v1398_v5  ;;  %v1404_v11 = vld [vmem:[%s1693_s4 + $0x18] sm:$0xff] (!%p262_p3)   ;;  %v1406_v14 = vld [vmem:[%s1690_s1 + $0x20] sm:$0xff] (!%p262_p3)   ;;  %v1409_v17 = vld [vmem:[%s1690_s1 + $0x28] sm:$0xff] (!%p262_p3)  }
   0xc   : > { %1260 = vmatpush3.bf16.msra.mxu0 (!%p262_p3), %v1397_v4  ;;  %v1411_v18 = vld [vmem:[%s1690_s1 + $0x70] sm:$0xff] (!%p262_p3)   ;;  %v1414_v21 = vld [vmem:[%s1690_s1 + $0x78] sm:$0xff] (!%p262_p3)   ;;  %v1639_v55 = vld [vmem:[%s1691_s2] ss:$0 sm:$0xff] (!%p262_p3) }
   0xd   : > { %1261 = vmatprep.subr.bf16.mxu0 (!%p262_p3), %v1399_v6  ;;  %v1412_v19 = vld [vmem:[%s1690_s1 + $0x30] sm:$0xff] (!%p262_p3)   ;;  %v1416_v22 = vld [vmem:[%s1693_s4 + $0x38] sm:$0xff] (!%p262_p3)  }
   0xe   : > { %1340 = vmatpush3.bf16.msra.mxu1 %v1398_v5  ;;  %s1700_s15 = smov (!%p319_p4, %s1198_s15), 31  ;;  %v1413_v20 = vld [vmem:[%s1693_s4 + $0x30] sm:$0xff]   ;;  %v1415_v25 = vld [vmem:[%s1690_s1 + $0x38] sm:$0xff]  }
   0xf   : > { %1341 = vmatprep.subr.bf16.mxu1 %v1401_v8  ;;  %s1256_s12 = sshll.u32 %s1700_s15, 3  ;;  %s1202_s16 = sshll.u32 %s1700_s15, 2 }
  0x10   : > { %1262 = vmatpush3.bf16.msra.mxu0 %v1400_v7  ;;  %s1596_s27 = scalar_lea.vmem %s1689_s0, %s1256_s12  ;;  %s1604_s6 = scalar_lea.vmem %s1692_s3, %s1202_s16 }
  0x11   : > { %1263 = vmatprep.subr.bf16.mxu0 %v1402_v9  ;;  %v1419_v23 = vld [vmem:[%s1596_s27 + $0x4] ss:$8 sps:$4 sm:$0xff]   ;;  %v1417_v26 = vld [vmem:[%s1596_s27] ss:$8 sps:$4 sm:$0xff]   ;;  %v1422_v27 = vld [vmem:[%s1596_s27 + $0x14] ss:$8 sps:$4 sm:$0xff]   ;;  %s1646_s17 = scalar_lea.vmem %s1694_s5, %s1256_s12 }
  0x12   : > { %1342 = vmatpush3.bf16.msra.mxu1 %v1401_v8  ;;  %v1420_v24 = vld [vmem:[%s1604_s6] sm:$0xff]   ;;  %653 = vmatprep.mubr.bf16.mxu0 %v1419_v23  ;;  %v1421_v28 = vld [vmem:[%s1604_s6 + $0x8] sm:$0xff]   ;;  %v1428_v29 = vld [vmem:[%s1604_s6 + $0x10] sm:$0xff]  }
  0x13   : > { %1343 = vmatprep.subr.bf16.mxu1 %v1404_v11  ;;  %1353 = vmatprep.mubr.bf16.mxu1 %v1420_v24  ;;  %v1424_v30 = vld [vmem:[%s1596_s27 + $0x10] ss:$8 sps:$4 sm:$0xff]   ;;  %v1425_v31 = vld [vmem:[%s1596_s27 + $0x24] ss:$8 sps:$4 sm:$0xff]   ;;  %v1427_v34 = vld [vmem:[%s1596_s27 + $0x20] ss:$8 sps:$4 sm:$0xff]  }
  0x14   : > { %1264 = vmatpush3.bf16.msra.mxu0 %v1403_v10  ;;  %v1429_v32 = vld [vmem:[%s1604_s6 + $0x18] sm:$0xff]   ;;  %v1436_v33 = vld [vmem:[%s1604_s6 + $0x20] sm:$0xff]   ;;  %v1437_v36 = vld [vmem:[%s1604_s6 + $0x28] sm:$0xff]  }
  0x15   : > { %1265 = vmatprep.subr.bf16.mxu0 %v1405_v12  ;;  %v1430_v35 = vld [vmem:[%s1596_s27 + $0x34] ss:$8 sps:$4 sm:$0xff]   ;;  %v1432_v38 = vld [vmem:[%s1596_s27 + $0x30] ss:$8 sps:$4 sm:$0xff]   ;;  %v1433_v39 = vld [vmem:[%s1596_s27 + $0x44] ss:$8 sps:$4 sm:$0xff]  }
  0x16   : > { %1344 = vmatpush3.bf16.msra.mxu1 %v1404_v11  ;;  %v1444_v37 = vld [vmem:[%s1604_s6 + $0x30] sm:$0xff]   ;;  %v1445_v40 = vld [vmem:[%s1604_s6 + $0x38] sm:$0xff]   ;;  %v1435_v41 = vld [vmem:[%s1596_s27 + $0x40] ss:$8 sps:$4 sm:$0xff]  }
  0x17   : > { %1345 = vmatprep.subr.bf16.mxu1 %v1407_v13  ;;  %v1438_v42 = vld [vmem:[%s1596_s27 + $0x54] ss:$8 sps:$4 sm:$0xff]   ;;  %v1440_v43 = vld [vmem:[%s1596_s27 + $0x50] ss:$8 sps:$4 sm:$0xff]   ;;  %v1441_v44 = vld [vmem:[%s1596_s27 + $0x64] ss:$8 sps:$4 sm:$0xff]  }
  0x18   : > { %1266 = vmatpush3.bf16.msra.mxu0 %v1406_v14  ;;  %v1443_v45 = vld [vmem:[%s1596_s27 + $0x60] ss:$8 sps:$4 sm:$0xff]   ;;  %v1446_v46 = vld [vmem:[%s1596_s27 + $0x74] ss:$8 sps:$4 sm:$0xff]   ;;  %v1448_v47 = vld [vmem:[%s1596_s27 + $0x70] ss:$8 sps:$4 sm:$0xff]  }
  0x19   : > { %1267 = vmatprep.subr.bf16.mxu0 %v1408_v15 }
  0x1a   : > { %1346 = vmatpush3.bf16.msra.mxu1 %v1407_v13 }
  0x1b   : > { %1347 = vmatprep.subr.bf16.mxu1 %v1410_v16 }
  0x1c   : > { %1268 = vmatpush3.bf16.msra.mxu0 %v1409_v17 }
  0x1d   : > { %1269 = vmatprep.subr.bf16.mxu0 %v1411_v18 }
  0x1e   : > { %1348 = vmatpush3.bf16.msra.mxu1 %v1410_v16 }
  0x1f   : > { %1349 = vmatprep.subr.bf16.mxu1 %v1413_v20 }
  0x20   : > { %1270 = vmatpush3.bf16.msra.mxu0 %v1412_v19 }
  0x21   : > { %1271 = vmatprep.subr.bf16.mxu0 %v1414_v21 }
  0x22   : > { %1350 = vmatpush3.bf16.msra.mxu1 %v1413_v20 }
  0x23   : > { %1351 = vmatprep.subr.bf16.mxu1 %v1416_v22 }
  0x24   : > { %1272 = vmatpush3.bf16.msra.mxu0 %v1415_v25 }
  0x26   : > { %1352 = vmatpush3.bf16.msra.mxu1 %v1416_v22 }
  0x27   : > { %654 = vmatmul.mubr.bf16.vlgmr.msra.gmra.mrb[0].mxu0 %v1417_v26 }
  0x28   : > { %661 = vmatprep.mubr.bf16.mxu0 %v1422_v27 }
  0x29   : > { %1354 = vmatmul.mubr.bf16.vlgmr.msra.gmra.mrb[0].mxu1 %v1421_v28 }
  0x2a   : > { %1357 = vmatprep.mubr.bf16.mxu1 %v1428_v29 }
  0x2f   : > { %662 = vmatmul.mubr.bf16.gmra.mrb[4].mxu0 %v1424_v30 }
  0x30   : > { %669 = vmatprep.mubr.bf16.mxu0 %v1425_v31 }
  0x31   : > { %1358 = vmatmul.mubr.bf16.gmra.mrb[4].mxu1 %v1429_v32 }
  0x32   : > { %1361 = vmatprep.mubr.bf16.mxu1 %v1436_v33 }
  0x37   : > { %670 = vmatmul.mubr.bf16.gmra.mrb[8].mxu0 %v1427_v34 }
  0x38   : > { %677 = vmatprep.mubr.bf16.mxu0 %v1430_v35 }
  0x39   : > { %1362 = vmatmul.mubr.bf16.gmra.mrb[8].mxu1 %v1437_v36 }
  0x3a   : > { %1365 = vmatprep.mubr.bf16.mxu1 %v1444_v37 }
  0x3f   : > { %678 = vmatmul.mubr.bf16.gmra.mrb[12].mxu0 %v1432_v38 }
  0x40   : > { %685 = vmatprep.mubr.bf16.mxu0 %v1433_v39 }
  0x41   : > { %1366 = vmatmul.mubr.bf16.gmra.mrb[12].mxu1 %v1445_v40 }
  0x47   : > { %686 = vmatmul.mubr.bf16.gmra.mrb[16].mxu0 %v1435_v41 }
  0x48   : > { %693 = vmatprep.mubr.bf16.mxu0 %v1438_v42 }
  0x4f   : > { %694 = vmatmul.mubr.bf16.gmra.mrb[20].mxu0 %v1440_v43 }
  0x50   : > { %701 = vmatprep.mubr.bf16.mxu0 %v1441_v44 }
  0x57   : > { %702 = vmatmul.mubr.bf16.gmra.mrb[24].mxu0 %v1443_v45 }
  0x58   : > { %709 = vmatprep.mubr.bf16.mxu0 %v1446_v46 }
  0x5f   : > { %710 = vmatmul.mubr.bf16.gmra.mrb[28].mxu0 %v1448_v47 }
  0xfa   : > { %v1273_v48 = vpop.f32.mrb[0].mxu0 }
  0xfb   : > { %v1274_v49 = vpop.f32.mrb[1].mxu0 }
  0xfc   : > { %v1275_v50 = vadd.f32 %v1274_v49, %v1273_v48  ;;  %v1276_v51 = vpop.f32.mrb[2].mxu0  ;;  %v1355_v52 = vpop.f32.mrb[0].mxu1 }
  0xfd   : > { %v1277_v53 = vpop.f32.mrb[3].mxu0  ;;  %v931_v54 = vpop.f32.mrb[1].mxu1 }
  0xfe   : > { %v1278_v56 = vadd.f32 %v1277_v53, %v1276_v51  ;;  %v994_v57 = vadd.f32 %v1275_v50, %v931_v54  ;;  %v1356_v58 = vpop.f32.mrb[2].mxu1 }
  0xff   : > { %v934_v59 = vpop.f32.mrb[3].mxu1 }
 0x100   : > { %v1017_v60 = vadd.f32 %v1639_v55, %v994_v57  ;;  %v995_v61 = vadd.f32 %v1278_v56, %v934_v59 }
 0x102   : > { %1033 = vst [vmem:[%s1646_s17] sm:$0xff] %v1017_v60  ;;  %v1018_v62 = vadd.f32 %v1639_v55, %v995_v61  ;;  %v1279_v63 = vpop.f32.mrb[4].mxu0 }
 0x103   : > { %v1280_v0 = vpop.f32.mrb[5].mxu0 }
 0x104   : > { %1034 = vst [vmem:[%s1646_s17 + $0x8] sm:$0xff] %v1018_v62  ;;  %v1281_v1 = vadd.f32 %v1280_v0, %v1279_v63  ;;  %v1282_v2 = vpop.f32.mrb[6].mxu0  ;;  %v1359_v3 = vpop.f32.mrb[4].mxu1 }
 0x105   : > { %v1283_v4 = vpop.f32.mrb[7].mxu0  ;;  %v947_v5 = vpop.f32.mrb[5].mxu1 }
 0x106   : > { %v996_v6 = vadd.f32 %v1355_v52, %v1281_v1  ;;  %v1284_v7 = vadd.f32 %v1283_v4, %v1282_v2  ;;  %v1360_v8 = vpop.f32.mrb[6].mxu1 }
 0x107   : > { %v950_v9 = vpop.f32.mrb[7].mxu1 }
 0x108   : > { %v1019_v10 = vadd.f32 %v1639_v55, %v996_v6  ;;  %v997_v11 = vadd.f32 %v1356_v58, %v1284_v7 }
 0x10a   : > { %1035 = vst [vmem:[%s1646_s17 + $0x10] sm:$0xff] %v1019_v10  ;;  %v1020_v12 = vadd.f32 %v1639_v55, %v997_v11  ;;  %v1285_v13 = vpop.f32.mrb[8].mxu0 }
 0x10b   : > { %v1286_v14 = vpop.f32.mrb[9].mxu0 }
 0x10c   : > { %1036 = vst [vmem:[%s1646_s17 + $0x18] sm:$0xff] %v1020_v12  ;;  %v1287_v15 = vadd.f32 %v1286_v14, %v1285_v13  ;;  %v1288_v16 = vpop.f32.mrb[10].mxu0  ;;  %v1363_v17 = vpop.f32.mrb[8].mxu1 }
 0x10d   : > { %v1289_v18 = vpop.f32.mrb[11].mxu0  ;;  %v963_v19 = vpop.f32.mrb[9].mxu1 }
 0x10e   : > { %v1290_v20 = vadd.f32 %v1289_v18, %v1288_v16  ;;  %v998_v21 = vadd.f32 %v1287_v15, %v947_v5  ;;  %v1364_v22 = vpop.f32.mrb[10].mxu1 }
 0x10f   : > { %v966_v23 = vpop.f32.mrb[11].mxu1 }
 0x110   : > { %v1021_v24 = vadd.f32 %v1639_v55, %v998_v21  ;;  %v999_v25 = vadd.f32 %v1290_v20, %v950_v9 }
 0x112   : > { %1037 = vst [vmem:[%s1646_s17 + $0x20] sm:$0xff] %v1021_v24  ;;  %v1022_v26 = vadd.f32 %v1639_v55, %v999_v25  ;;  %v1291_v27 = vpop.f32.mrb[12].mxu0 }
 0x113   : > { %v1292_v28 = vpop.f32.mrb[13].mxu0 }
 0x114   : > { %1038 = vst [vmem:[%s1646_s17 + $0x28] sm:$0xff] %v1022_v26  ;;  %v1293_v29 = vadd.f32 %v1292_v28, %v1291_v27  ;;  %v1294_v30 = vpop.f32.mrb[14].mxu0  ;;  %v1367_v31 = vpop.f32.mrb[12].mxu1 }
 0x115   : > { %v1295_v32 = vpop.f32.mrb[15].mxu0  ;;  %v979_v33 = vpop.f32.mrb[13].mxu1 }
 0x116   : > { %v1000_v34 = vadd.f32 %v1359_v3, %v1293_v29  ;;  %v1296_v35 = vadd.f32 %v1295_v32, %v1294_v30  ;;  %v1368_v36 = vpop.f32.mrb[14].mxu1 }
 0x117   : > { %v982_v37 = vpop.f32.mrb[15].mxu1 }
 0x118   : > { %v1023_v38 = vadd.f32 %v1639_v55, %v1000_v34  ;;  %v1001_v39 = vadd.f32 %v1360_v8, %v1296_v35 }
 0x11a   : > { %1039 = vst [vmem:[%s1646_s17 + $0x30] sm:$0xff] %v1023_v38  ;;  %v1024_v40 = vadd.f32 %v1639_v55, %v1001_v39  ;;  %v1297_v41 = vpop.f32.mrb[16].mxu0 }
 0x11b   : > { %v1298_v42 = vpop.f32.mrb[17].mxu0 }
 0x11c   : > { %1040 = vst [vmem:[%s1646_s17 + $0x38] sm:$0xff] %v1024_v40  ;;  %v1299_v43 = vadd.f32 %v1298_v42, %v1297_v41  ;;  %v1300_v44 = vpop.f32.mrb[18].mxu0 }
 0x11d   : > { %v1301_v45 = vpop.f32.mrb[19].mxu0 }
 0x11e   : > { %v1302_v46 = vadd.f32 %v1301_v45, %v1300_v44  ;;  %v1002_v47 = vadd.f32 %v1299_v43, %v963_v19 }
 0x120   : > { %v1025_v48 = vadd.f32 %v1639_v55, %v1002_v47  ;;  %v1003_v49 = vadd.f32 %v1302_v46, %v966_v23 }
 0x122   : > { %1041 = vst [vmem:[%s1646_s17 + $0x40] sm:$0xff] %v1025_v48  ;;  %v1026_v50 = vadd.f32 %v1639_v55, %v1003_v49  ;;  %v1303_v51 = vpop.f32.mrb[20].mxu0 }
 0x123   : > { %v1304_v52 = vpop.f32.mrb[21].mxu0 }
 0x124   : > { %1042 = vst [vmem:[%s1646_s17 + $0x48] sm:$0xff] %v1026_v50  ;;  %v1305_v53 = vadd.f32 %v1304_v52, %v1303_v51  ;;  %v1306_v54 = vpop.f32.mrb[22].mxu0 }
 0x125   : > { %v1307_v56 = vpop.f32.mrb[23].mxu0 }
 0x126   : > { %v1004_v57 = vadd.f32 %v1363_v17, %v1305_v53  ;;  %v1308_v58 = vadd.f32 %v1307_v56, %v1306_v54 }
 0x128   : > { %v1027_v59 = vadd.f32 %v1639_v55, %v1004_v57  ;;  %v1005_v60 = vadd.f32 %v1364_v22, %v1308_v58 }
 0x12a   : > { %1043 = vst [vmem:[%s1646_s17 + $0x50] sm:$0xff] %v1027_v59  ;;  %v1028_v61 = vadd.f32 %v1639_v55, %v1005_v60  ;;  %v1309_v62 = vpop.f32.mrb[24].mxu0 }
 0x12b   : > { %v1310_v63 = vpop.f32.mrb[25].mxu0 }
 0x12c   : > { %1044 = vst [vmem:[%s1646_s17 + $0x58] sm:$0xff] %v1028_v61  ;;  %v1311_v0 = vadd.f32 %v1310_v63, %v1309_v62  ;;  %v1312_v1 = vpop.f32.mrb[26].mxu0 }
 0x12d   : > { %v1313_v2 = vpop.f32.mrb[27].mxu0 }
 0x12e   : > { %v1314_v3 = vadd.f32 %v1313_v2, %v1312_v1  ;;  %v1006_v4 = vadd.f32 %v1311_v0, %v979_v33 }
 0x130   : > { %v1029_v5 = vadd.f32 %v1639_v55, %v1006_v4  ;;  %v1007_v6 = vadd.f32 %v1314_v3, %v982_v37 }
 0x132   : > { %1045 = vst [vmem:[%s1646_s17 + $0x60] sm:$0xff] %v1029_v5  ;;  %v1030_v7 = vadd.f32 %v1639_v55, %v1007_v6  ;;  %v1315_v8 = vpop.f32.mrb[28].mxu0 }
 0x133   : > { %v1316_v9 = vpop.f32.mrb[29].mxu0 }
 0x134   : > { %1046 = vst [vmem:[%s1646_s17 + $0x68] sm:$0xff] %v1030_v7  ;;  %v1317_v10 = vadd.f32 %v1316_v9, %v1315_v8  ;;  %v1318_v11 = vpop.f32.mrb[30].mxu0 }
 0x135   : > { %v1319_v12 = vpop.f32.mrb[31].mxu0 }
 0x136   : > { %v1008_v13 = vadd.f32 %v1367_v31, %v1317_v10  ;;  %v1320_v14 = vadd.f32 %v1319_v12, %v1318_v11 }
 0x138   : > { %v1031_v15 = vadd.f32 %v1639_v55, %v1008_v13  ;;  %v1009_v16 = vadd.f32 %v1368_v36, %v1320_v14 }
 0x13a   : > { %1047 = vst [vmem:[%s1646_s17 + $0x70] sm:$0xff] %v1031_v15  ;;  %v1032_v17 = vadd.f32 %v1639_v55, %v1009_v16 }
 0x13c   : > { %1048 = vst [vmem:[%s1646_s17 + $0x78] sm:$0xff] %v1032_v17 }
 0x13d PF: > { %s15_s20 = sadd.s32 1, %s1471_s20   ;;  %s1695_s18 = smov %s1467_s19 }
 0x13e   : > { %p12_p5 = scmp.ge.s32.totalorder %s15_s20, 4   ;;  %s1696_s19 = smov %s1698_s21 }
 0x140   :  { %14 = sbr.rel (!%p12_p5) target bundleno = 2 (0x2), region = 90 }

</bundles_post_ra>
